<compile_context>
chip_gen: v7x
topology: tpu7x:2x2x1
jax: 0.10.0
libtpu: 0.0.40
codegen_flags: <defaults>
</compile_context>

<pallas_src>
import functools

import jax
import jax.numpy as jnp
from jax import lax
from jax.experimental import pallas as pl
from jax.experimental.pallas import tpu as pltpu

VGG_types = {
    'VGG11': [64, 'M', 128, 'M', 256, 256, 'M', 512, 512, 'M', 512, 512, 'M'],
    'VGG13': [64, 64, 'M', 128, 128, 'M', 256, 256, 'M', 512, 512, 'M', 512, 512, 'M'],
    'VGG16': [64, 64, 'M', 128, 128, 'M', 256, 256, 256, 'M', 512, 512, 512, 'M',
              512, 512, 512, 'M'],
    'VGG19': [64, 64, 'M', 128, 128, 'M', 256, 256, 256, 256, 'M', 512, 512, 512, 512,
              'M', 512, 512, 512, 512, 'M'],
}

_VMEM_LIMIT = 48 * 1024 * 1024  # <= v7x 64 MiB/TC with headroom; fine on v5e/v6e.


# ---------------------------------------------------------------------------
# small helpers
# ---------------------------------------------------------------------------
def _round_up(a, b):
    return -(-a // b) * b


def _largest_divisor(n, cap, mult):
    """Largest multiple of `mult` dividing `n` and <= cap, else None."""
    best = None
    d = mult
    while d <= min(n, cap):
        if n % d == 0:
            best = d
        d += mult
    return best


def _row_tile(n, row_bytes, budget):
    """Largest divisor d of n with d*row_bytes <= budget (at least 1)."""
    best = 1
    for d in range(1, n + 1):
        if n % d == 0 and d * row_bytes <= budget:
            best = d
    return best


def _cparams(*sem):
    return pltpu.CompilerParams(dimension_semantics=sem,
                                vmem_limit_bytes=_VMEM_LIMIT)


# ---------------------------------------------------------------------------
# Conv 3x3 (pad 1, stride 1) + folded BatchNorm (eval) + ReLU
# ---------------------------------------------------------------------------
def _conv_strip_kernel(x_ref, w_ref, sb_ref, o_ref, *, th, ws, wpad):
    """One row-tile of a padded image strip; all 9 taps in one grid step.

    x_ref : (1, (H+3)*wpad, Cin)  whole padded strip, resident across axis 1
    w_ref : (9, Cin, Cout)        tap-major weights
    sb_ref: (2, Cout)             folded BN scale / bias
    o_ref : (1, th, ws, Cout)     valid output rows/cols of this tile
    """
    i = pl.program_id(1)
    cout = o_ref.shape[3]
    rows = th * wpad                       # multiple of 8 by construction
    base = pl.multiple_of(i * rows, 8)

    acc = jnp.zeros((rows, cout), jnp.float32)
    for t in range(9):                     # unrolled 9 shifted-row matmuls
        dy, dx = divmod(t, 3)
        xt = x_ref[0, pl.ds(base + dy * wpad + dx, rows), :]
        acc = acc + jnp.dot(xt, w_ref[t], preferred_element_type=jnp.float32)

    y = acc * sb_ref[0:1, :] + sb_ref[1:2, :]      # fused eval-BN affine
    y = jnp.maximum(y, 0.0)                        # fused ReLU
    y = y.reshape(th, wpad, cout)[:, :ws, :]       # drop halo / alignment cols
    o_ref[0] = y.astype(o_ref.dtype)


def _conv_im2col_kernel(x_ref, w_ref, sb_ref, o_ref):
    y = jnp.dot(x_ref[...], w_ref[...], preferred_element_type=jnp.float32)
    y = y * sb_ref[0:1, :] + sb_ref[1:2, :]
    o_ref[...] = jnp.maximum(y, 0.0).astype(o_ref.dtype)


def _conv_first(x, w9, scale, bias):
    """Tiny-Cin path (first layer): host im2col to K=9*Cin, one matmul pass."""
    N, H, W, Cin = x.shape
    Cout = w9.shape[2]
    M = N * H * W

    xp = jnp.pad(x, ((0, 0), (1, 1), (1, 1), (0, 0)))
    cols = jnp.concatenate(
        [xp[:, dy:dy + H, dx:dx + W, :] for dy in range(3) for dx in range(3)],
        axis=-1).reshape(M, 9 * Cin)
    w27 = w9.reshape(9 * Cin, Cout)
    sb = jnp.stack([scale, bias], axis=0)

    tm = _largest_divisor(M, cap=4096, mult=8) or M
    out = pl.pallas_call(
        _conv_im2col_kernel,
        out_shape=jax.ShapeDtypeStruct((M, Cout), x.dtype),
        grid_spec=pltpu.PrefetchScalarGridSpec(
            num_scalar_prefetch=0,
            grid=(M // tm,),
            in_specs=[
                pl.BlockSpec((tm, 9 * Cin), lambda i: (i, 0)),
                pl.BlockSpec((9 * Cin, Cout), lambda i: (0, 0)),
                pl.BlockSpec((2, Cout), lambda i: (0, 0)),
            ],
            out_specs=pl.BlockSpec((tm, Cout), lambda i: (i, 0)),
        ),
        compiler_params=_cparams("parallel"),
    )(cols, w27, sb)
    return out.reshape(N, H, W, Cout)


def _conv_general(x, w9, scale, bias):
    """General path: padded image strips resident in VMEM, 9 taps per step."""
    N, H, W, Cin = x.shape
    Cout = w9.shape[2]
    lanes_in = _round_up(Cin, 128)
    lanes_out = _round_up(Cout, 128)

    # Split W into `ns` strips so one padded strip (lane-padded) fits ~8 MB
    # (double-buffered => <=16 MB, safe on v7x's 64 MiB VMEM).
    ns = W
    for cand in range(1, W + 1):
        if W % cand:
            continue
        wpad_c = _round_up(W // cand + 2, 8)
        if (H + 3) * wpad_c * lanes_in * 4 <= 8 * 2**20:
            ns = cand
            break
    ws = W // ns
    wpad = _round_up(ws + 2, 8)            # halo + alignment padding columns

    # Output row tile: keep the f32 accumulator around ~2 MB.
    th = _row_tile(H, wpad * lanes_out * 4, 2 * 2**20)

    # Host glue: one fused pad/slice per layer (no 9x tap materialisation).
    xp = jnp.pad(x, ((0, 0), (1, 2), (1, 1), (0, 0)))      # (N, H+3, W+2, Cin)
    if ns == 1:
        xs = jnp.pad(xp, ((0, 0), (0, 0), (0, wpad - (W + 2)), (0, 0)))
        xs = xs.reshape(N, (H + 3) * wpad, Cin)
    else:
        strips = [jnp.pad(xp[:, :, s * ws:s * ws + ws + 2, :],
                          ((0, 0), (0, 0), (0, wpad - (ws + 2)), (0, 0)))
                  for s in range(ns)]
        xs = jnp.stack(strips, axis=1).reshape(N * ns, (H + 3) * wpad, Cin)
    nb = N * ns
    sb = jnp.stack([scale, bias], axis=0)

    out = pl.pallas_call(
        functools.partial(_conv_strip_kernel, th=th, ws=ws, wpad=wpad),
        out_shape=jax.ShapeDtypeStruct((nb, H, ws, Cout), x.dtype),
        grid_spec=pltpu.PrefetchScalarGridSpec(
            num_scalar_prefetch=0,
            grid=(nb, H // th),
            in_specs=[
                # whole padded strip: constant block index along i => resident
                pl.BlockSpec((1, (H + 3) * wpad, Cin), lambda b, i: (b, 0, 0)),
                pl.BlockSpec((9, Cin, Cout), lambda b, i: (0, 0, 0)),
                pl.BlockSpec((2, Cout), lambda b, i: (0, 0)),
            ],
            out_specs=pl.BlockSpec((1, th, ws, Cout), lambda b, i: (b, i, 0, 0)),
        ),
        compiler_params=_cparams("parallel", "arbitrary"),
    )(xs, w9, sb)

    if ns == 1:
        return out.reshape(N, H, W, Cout)
    return (out.reshape(N, ns, H, ws, Cout)
               .transpose(0, 2, 1, 3, 4)
               .reshape(N, H, W, Cout))


@jax.jit
def conv3x3_bn_relu(x, w9, scale, bias):
    """x: (N,H,W,Cin); w9: (9,Cin,Cout) tap-major; scale/bias: (Cout,)."""
    if x.shape[-1] * 9 <= 64:      # first layer (Cin=3): K=27 im2col path
        return _conv_first(x, w9, scale, bias)
    return _conv_general(x, w9, scale, bias)


# ---------------------------------------------------------------------------
# MaxPool 2x2 stride 2  (single read of the input per block)
# ---------------------------------------------------------------------------
def _maxpool_kernel(x_ref, o_ref):
    c = o_ref.shape[2]
    m = jnp.maximum(x_ref[:, 0], x_ref[:, 1])            # row-pair max
    o_ref[...] = jnp.maximum(m[..., :c], m[..., c:]).astype(o_ref.dtype)


@jax.jit
def maxpool2x2(x):
    N, H, W, C = x.shape
    Ho, Wo = H // 2, W // 2
    R = N * Ho
    # metadata-only reshape: (N,H,W,C) -> (N*Ho, 2, Wo, 2C)
    xv = x.reshape(R, 2, Wo, 2 * C)

    row_bytes = 2 * Wo * _round_up(2 * C, 128) * 4
    tr = _row_tile(R, row_bytes, 4 * 2**20)

    out = pl.pallas_call(
        _maxpool_kernel,
        out_shape=jax.ShapeDtypeStruct((R, Wo, C), x.dtype),
        grid_spec=pltpu.PrefetchScalarGridSpec(
            num_scalar_prefetch=0,
            grid=(R // tr,),
            in_specs=[pl.BlockSpec((tr, 2, Wo, 2 * C), lambda i: (i, 0, 0, 0))],
            out_specs=pl.BlockSpec((tr, Wo, C), lambda i: (i, 0, 0)),
        ),
        compiler_params=_cparams("parallel"),
    )(xv)
    return out.reshape(N, Ho, Wo, C)


# ---------------------------------------------------------------------------
# Linear (+ optional fused ReLU): weights streamed in torch (Nout, K) layout
# ---------------------------------------------------------------------------
def _dense_kernel(x_ref, w_ref, b_ref, o_ref, acc_ref, *, relu):
    k = pl.program_id(1)

    @pl.when(k == 0)
    def _():
        acc_ref[...] = jnp.zeros_like(acc_ref)

    xk = x_ref[k]                                   # (B, tk), x fully resident
    acc_ref[...] += lax.dot_general(
        xk, w_ref[...], (((1,), (1,)), ((), ())),   # contract K of both (w untransposed)
        preferred_element_type=jnp.float32)

    @pl.when(k == pl.num_programs(1) - 1)
    def _():
        y = acc_ref[...] + b_ref[...]
        if relu:
            y = jnp.maximum(y, 0.0)
        o_ref[...] = y.astype(o_ref.dtype)


@functools.partial(jax.jit, static_argnames=("relu",))
def linear(x, w, b, relu=False):
    """x: (B, K); w: (Nout, K) torch layout (NOT transposed); b: (Nout,)."""
    B, K = x.shape
    Nout = w.shape[0]

    tk = _largest_divisor(K, cap=2048, mult=128) or K
    tn = _largest_divisor(Nout, cap=1024, mult=128) or Nout
    nk, nj = K // tk, Nout // tn

    xr = x.reshape(B, nk, tk).transpose(1, 0, 2)    # (nk, B, tk), ~tiny, resident
    b2 = b.reshape(1, Nout)

    return pl.pallas_call(
        functools.partial(_dense_kernel, relu=relu),
        out_shape=jax.ShapeDtypeStruct((B, Nout), x.dtype),
        grid_spec=pltpu.PrefetchScalarGridSpec(
            num_scalar_prefetch=0,
            grid=(nj, nk),
            in_specs=[
                pl.BlockSpec((nk, B, tk), lambda j, k: (0, 0, 0)),  # resident x
                pl.BlockSpec((tn, tk), lambda j, k: (j, k)),        # ~7-8 MB blocks
                pl.BlockSpec((1, tn), lambda j, k: (0, j)),
            ],
            out_specs=pl.BlockSpec((B, tn), lambda j, k: (0, j)),
            scratch_shapes=[pltpu.VMEM((B, tn), jnp.float32)],
        ),
        compiler_params=_cparams("parallel", "arbitrary"),
    )(xr, w, b2)


# ---------------------------------------------------------------------------
# VGGNet
# ---------------------------------------------------------------------------
class VGGNet:
    def __init__(self, in_channels=3, num_classes=1000, arch='VGG16', key=None):
        if key is None:
            key = jax.random.PRNGKey(0)
        self.in_channels = in_channels
        self.num_classes = num_classes
        eps = 1e-5

        self.conv_layers = []
        c_in = in_channels
        for v in VGG_types[arch]:
            if v == 'M':
                self.conv_layers.append(('pool',))
                continue
            c_out = v
            key, kw, kb, kg, kbt, km, kv = jax.random.split(key, 7)
            w = jax.random.normal(kw, (c_out, c_in, 3, 3), jnp.float32) * (2.0 / (c_in * 9)) ** 0.5
            b = 0.01 * jax.random.normal(kb, (c_out,), jnp.float32)
            gamma = 1.0 + 0.1 * jax.random.normal(kg, (c_out,), jnp.float32)
            beta = 0.1 * jax.random.normal(kbt, (c_out,), jnp.float32)
            r_mean = 0.1 * jax.random.normal(km, (c_out,), jnp.float32)
            r_var = 1.0 + 0.1 * jax.random.uniform(kv, (c_out,), jnp.float32)
            # Fold conv bias + eval-mode BatchNorm into a per-channel affine.
            scale = gamma / jnp.sqrt(r_var + eps)
            bias = beta + scale * (b - r_mean)
            # Store weights tap-major (9, Cin, Cout) once at init (no per-forward transpose).
            w9 = jnp.transpose(w, (2, 3, 1, 0)).reshape(9, c_in, c_out)
            self.conv_layers.append(('conv', w9, scale, bias))
            c_in = c_out

        def _linear_init(k, n_out, n_in):
            kw, kb = jax.random.split(k)
            s = 1.0 / (n_in ** 0.5)
            # torch layout (Nout, K): streamed untransposed by the kernel.
            return (s * jax.random.normal(kw, (n_out, n_in), jnp.float32),
                    s * jax.random.normal(kb, (n_out,), jnp.float32))

        key, k1, k2, k3 = jax.random.split(key, 4)
        self.fc1 = _linear_init(k1, 4096, 512 * 7 * 7)
        self.fc2 = _linear_init(k2, 4096, 4096)
        self.fc3 = _linear_init(k3, num_classes, 4096)

    def __call__(self, x_nchw):
        x = jnp.transpose(x_nchw.astype(jnp.float32), (0, 2, 3, 1))  # NCHW -> NHWC
        for layer in self.conv_layers:
            if layer[0] == 'conv':
                _, w9, scale, bias = layer
                x = conv3x3_bn_relu(x, w9, scale, bias)
            else:
                x = maxpool2x2(x)
        n = x.shape[0]
        x = jnp.transpose(x, (0, 3, 1, 2)).reshape(n, -1)  # torch NCHW flatten order
        x = linear(x, *self.fc1, relu=True)
        # TODO(synk): nn.Dropout(p=0.5)/BatchNorm train-mode RNG & batch stats have no
        # PyTorch-bit-matching equivalent; eval-mode semantics (identity / running stats) used.
        x = linear(x, *self.fc2, relu=True)
        x = linear(x, *self.fc3, relu=False)
        return x


if __name__ == "__main__":
    root = jax.random.PRNGKey(0)
    k_param, k_x = jax.random.split(root)

    model = VGGNet(in_channels=3, num_classes=1000, arch='VGG16', key=k_param)

    # Spatial size 224 is forced by the hard-coded Linear(512*7*7, ...) after 5 maxpools;
    # batch kept small (2).
    x = jax.random.normal(k_x, (2, 3, 224, 224), jnp.float32)

    out = model(x)
    out = jax.block_until_ready(out)
    assert out.shape == (2, 1000), out.shape
    assert bool(jnp.all(jnp.isfinite(out)))
    print("KERNEL_OK")
</pallas_src>

<mosaic_0001>
module attributes {stable_mosaic.version = 11 : i64} {
  func.func @_conv_im2col_kernel(%arg0: i32, %arg1: memref<3584x27xf32, #tpu.memory_space<vmem>>, %arg2: memref<27x64xf32, #tpu.memory_space<vmem>>, %arg3: memref<2x64xf32, #tpu.memory_space<vmem>>, %arg4: memref<3584x64xf32, #tpu.memory_space<vmem>>) attributes {dimension_semantics = [#tpu.dimension_semantics<parallel>], iteration_bounds = array<i64: 28>, scalar_prefetch = 0 : i64, scratch_operands = 0 : i64, tpu.core_type = #tpu.core_type<tc>, window_params = [{transform_indices = @transform_0, window_bounds = array<i64: 3584, 27>}, {pipeline_mode = #tpu.pipeline_mode<synchronous>, transform_indices = @transform_1, window_bounds = array<i64: 27, 64>}, {pipeline_mode = #tpu.pipeline_mode<synchronous>, transform_indices = @transform_2, window_bounds = array<i64: 2, 64>}, {transform_indices = @transform_3, window_bounds = array<i64: 3584, 64>}]} {
    %c0 = arith.constant 0 : index
    %c0_0 = arith.constant 0 : index
    %0 = vector.load %arg1[%c0, %c0_0] : memref<3584x27xf32, #tpu.memory_space<vmem>>, vector<3584x27xf32>
    %c0_1 = arith.constant 0 : index
    %c0_2 = arith.constant 0 : index
    %1 = vector.load %arg2[%c0_1, %c0_2] : memref<27x64xf32, #tpu.memory_space<vmem>>, vector<27x64xf32>
    %cst = arith.constant dense<0.000000e+00> : vector<3584x64xf32>
    %2 = tpu.matmul %0, %1, %cst {dimension_numbers = #tpu.dot_dimension_numbers<[1], [0], [0], [1], [0, 0, 1, 1], [], []>} : vector<3584x27xf32>, vector<27x64xf32>, vector<3584x64xf32> -> vector<3584x64xf32>
    %c0_3 = arith.constant 0 : index
    %c0_4 = arith.constant 0 : index
    %3 = vector.load %arg3[%c0_3, %c0_4] : memref<2x64xf32, #tpu.memory_space<vmem>>, vector<1x64xf32>
    %4 = vector.broadcast %3 : vector<1x64xf32> to vector<3584x64xf32>
    %5 = arith.mulf %2, %4 : vector<3584x64xf32>
    %c1 = arith.constant 1 : index
    %c0_5 = arith.constant 0 : index
    %6 = vector.load %arg3[%c1, %c0_5] : memref<2x64xf32, #tpu.memory_space<vmem>>, vector<1x64xf32>
    %7 = vector.broadcast %6 : vector<1x64xf32> to vector<3584x64xf32>
    %8 = arith.addf %5, %7 : vector<3584x64xf32>
    %cst_6 = arith.constant 0.000000e+00 : f32
    %9 = vector.broadcast %cst_6 : f32 to vector<3584x64xf32>
    %10 = arith.maximumf %8, %9 : vector<3584x64xf32>
    %c0_7 = arith.constant 0 : index
    %c0_8 = arith.constant 0 : index
    %11 = vector.load %arg4[%c0_7, %c0_8] : memref<3584x64xf32, #tpu.memory_space<vmem>>, vector<3584x64xf32>
    tpu.vector_store %arg4[%c0_7, %c0_8], %10 {strides = array<i32>} : memref<3584x64xf32, #tpu.memory_space<vmem>>, vector<3584x64xf32>,
    return
  }
  func.func @transform_0(%arg0: i32) -> (i32, i32) {
    %c0_i32 = arith.constant 0 : i32
    %c0_i32_0 = arith.constant 0 : i32
    return %arg0, %c0_i32 : i32, i32
  }
  func.func @transform_1(%arg0: i32) -> (i32, i32) {
    %c0_i32 = arith.constant 0 : i32
    %c0_i32_0 = arith.constant 0 : i32
    %c0_i32_1 = arith.constant 0 : i32
    return %c0_i32, %c0_i32_0 : i32, i32
  }
  func.func @transform_2(%arg0: i32) -> (i32, i32) {
    %c0_i32 = arith.constant 0 : i32
    %c0_i32_0 = arith.constant 0 : i32
    %c0_i32_1 = arith.constant 0 : i32
    return %c0_i32, %c0_i32_0 : i32, i32
  }
  func.func @transform_3(%arg0: i32) -> (i32, i32) {
    %c0_i32 = arith.constant 0 : i32
    %c0_i32_0 = arith.constant 0 : i32
    return %arg0, %c0_i32 : i32, i32
  }
}

</mosaic_0001>

<bundles_post_ra>
// kernel: conv3x3_bn_relu.1
= control target key start
LH: loop header
LB: loop body
LE: loop exit
PB: predicated region body
PF: predicated region fallthrough
CT: control target
= control target key end

     0   :  { %8 = vsyncpa [#allocation3], 0  ;;  %s10905_s0 = inlined_call_operand.hbm [shape: f32[100352,27], index: 0, kind: input, shape index: {}]   ;;  %s10906_s1 = inlined_call_operand.vmem [shape: f32[27,64], index: 1, kind: input, shape index: {}]   ;;  %s10907_s2 = inlined_call_operand.vmem [shape: f32[2,64], index: 2, kind: input, shape index: {}]   ;;  %s10908_s3 = inlined_call_operand.hbm [shape: f32[100352,64], index: 3, kind: output, shape index: {}]  }
   0x1   :  { %10 = vsyncpa [#allocation3 + $0x1], 0 }
   0x2   :  { %11 = vsyncpa [#allocation4], 0 }
   0x3   :  { %13 = vsyncpa [#allocation4 + $0x1], 0  ;;  %s7982_s12 = smov 0   ;;  %s7984_s13 = smov 0  }
   0x4   :  { %s7986_s14 = smov 0   ;;  %s7988_s15 = smov 0  }
   0x5 LB: > { %s8003_s16 = sadd.s32 4294967295, %s7953_s15   ;;  %s6187_s17 = sadd.s32 4294967294, %s7953_s15   ;;  %s7953_s15 = sphi %s7988_s15, %s10919_s15   ;;  %s7949_s14 = sphi %s7986_s14, %s10918_s14   ;;  %s7945_s13 = sphi %s7984_s13, %s10917_s13   ;;  %s7941_s12 = sphi %s7982_s12, %s10916_s12  }
   0x6   : > { %s8007_s18 = sadd.s32 1, %s7953_s15   ;;  %s26_s19 = sadd.s32 1, %s7949_s14 }
   0x7   : > { %s23_s20 = ssub.s32 %s7953_s15, %s8007_s18  ;;  %p33_p0 = scmp.ne.s32.totalorder %s7949_s14, %s7945_s13 }
   0x8   : > { %p24_p1 = scmp.eq.s32.totalorder %s23_s20, 0  ;;  %p34_p2 = scmp.eq.s32.totalorder %s7953_s15, 0 }
   0x9   : > { %p39_p3 = scmp.ne.s32.totalorder %s7945_s13, %s7941_s12  ;;  %p40_p4 = scmp.eq.s32.totalorder %s8003_s16, 0 }
   0xa   : > { %s8019_s21 = scalar_select %p24_p1, %s7949_s14, %s26_s19  }
   0xb   : > { %p35_p5 = por %p34_p2, %p33_p0  ;;  %p8021_p6 = por %p40_p4, %p39_p3 }
   0xc   : > { %p105_p7 = scmp.eq.s32.totalorder %s8003_s16, 27  ;;  %p111_p8 = scmp.eq.s32.totalorder %s6187_s17, 27 }
   0xd   : > { %p7808_p9 = scmp.lt.s32.totalorder %s7953_s15, 28  ;;  %s137_s25 = sand.u32 1, %s7949_s14  }
   0xe   : > { %p8027_p10 = por %p105_p7, %p33_p0  ;;  %p8031_p11 = por %p111_p8, %p39_p3 }
   0xf   : > { %s6646_s26 = smul.u32 57344, %s7953_s15  ;;  %p8042_p12 = pnand %p7808_p9, %p35_p5 }
  0x10   : > { %s10911_s23 = scalar_select %p8027_p10, 1, 0 }
  0x11   : > { %s10912_s24 = scalar_select %p8031_p11, 1, 0 }
  0x12   : > { %s7794_s27 = smul.u32 3584, %s137_s25  ;;  %s8040_s30 = scalar_lea.hbm %s10905_s0, %s6646_s26 }
  0x13   : > { %s8048_s7 = scalar_lea.sflag [#allocation3], %s137_s25  ;;  %s7857_s8 = scalar_lea.hbm %s8040_s30, 57344 }
  0x14   : > { %s141_s5 = scalar_lea.vmem [#allocation2], %s7794_s27  ;;  %p7858_p13 = scmp.ne.s32.totalorder %s8040_s30, %s7857_s8 }
  0x15   : > { %s148_s6 = sshll.u32 %s141_s5, 4  ;;  %p7859_p0 = pneg %p8042_p12  ;;  %s8046_s6 = int_to_ptr.vmem [resolvable:$true] %s148_s6 }
  0x16   : > { %s7862_s11 = scalar_lea.hbm %s10905_s0, 1605632  ;;  %p7863_p3 = scmp.lt.u32.totalorder %s8040_s30, %s10905_s0 }
  0x17   : > { %p7860_p1 = pnand %p7859_p0, %p7858_p13  ;;  %p7864_p4 = scmp.lt.u32.totalorder %s7862_s11, %s7857_s8 }
  0x18   : > { %p7866_p7 = scmp.lt.u32.totalorder %s7857_s8, %s8040_s30 }
  0x19   : > { %p7861_p2 = pneg %p7860_p1  ;;  %p7865_p5 = por %p7864_p4, %p7863_p3 }
  0x1b   : > { %p7867_p8 = por %p7866_p7, %p7865_p5 }
  0x1d   : > { %p7868_p9 = pnand %p7867_p8, %p7861_p2 }
  0x1f   : > { %7871 = shalt.err (!%p7868_p9)
}
  0x20   : > { %s7872_s20 = scalar_lea.vmem %s8046_s6, 57344  ;;  %s7955_s25 = smov [#allocation2]  }
  0x21   : > { %p7873_p13 = scmp.ne.s32.totalorder %s8046_s6, %s7872_s20  ;;  %s7877_s26 = sshll.u32 %s7955_s25, 4  ;;  %s7878_s26 = int_to_ptr.vmem [resolvable:$false] %s7877_s26 }
  0x22   : > { %s7879_s27 = scalar_lea.vmem %s7878_s26, 114688  ;;  %p7880_p10 = scmp.lt.s32.totalorder %s8046_s6, %s7878_s26 }
  0x23   : > { %p7875_p1 = pnand %p7873_p13, %p7859_p0  ;;  %p7881_p3 = scmp.lt.s32.totalorder %s7879_s27, %s7872_s20 }
  0x25   : > { %p7876_p11 = pneg %p7875_p1  ;;  %p7882_p4 = por %p7881_p3, %p7880_p10 }
  0x27   : > { %p7883_p5 = pnand %p7882_p4, %p7876_p11 }
  0x29   : > { %7886 = shalt.err (!%p7883_p5)
}
  0x2a   : > { %s7956_s28 = smov 128   ;;  %s7957_s29 = smov 8  }
  0x2b   : > { %7803 = dma.hbm_to_vmem [thread:$0]  (!%p8042_p12), %s8040_s30, 57344, %s8046_s6, %s8048_s7, %s7956_s28, %s7956_s28, %s7957_s29  }
  0x2c   : > { %p6191_p0 = scmp.ge.s32.totalorder %s7953_s15, 1  ;;  %p156_p2 = scmp.lt.s32.totalorder %s7953_s15, 29 }
  0x2e   : > { %p157_p7 = pnand %p6191_p0, %p156_p2 }
  0x2f   : > { %s8079_s5 = sand.u32 (!%p157_p7), 1, %s7945_s13  }
  0x30   : > { %160 = sbr.rel (%p157_p7) target bundleno = 746 (0x2ea), region = 32  ;;  %s163_s9 = scalar_lea.sflag (!%p157_p7), [#allocation3], %s8079_s5 }
  0x31   : > { %s7795_s8 = smul.u32 (!%p157_p7), 3584, %s8079_s5 }
  0x33   : > { %s8085_s10 = scalar_lea.vmem (!%p157_p7), [#allocation2], %s7795_s8 }
  0x37   : > { %7932 = dma.done.wait (%p8021_p6), %s163_s9, 57344  }
  0x38   : > { %7934 = vsyncadd (%p8021_p6), %s163_s9, 4294909952  ;;  %vm1988_vm0 = vcmask 1042432   ;;  %vm643_vm1 = vcmask 220160   ;;  %v639_v0 = vld [vmem:[%s10906_s1] sm:$0xff]  ;;  %v640_v1 = vld [vmem:[%s10906_s1 + $0x8] sm:$0xff]  ;;  %vm7958_vm2 = vmmov 1  }
  0x39   : > { %v641_v2 = vld [vmem:[%s10906_s1 + $0x10] sm:$0xff]  ;;  %v7780_v3 = vpack.c.bf16 %v640_v1, %v639_v0  ;;  %v642_v4 = vld [vmem:[%s10906_s1 + $0x18] sm:$0x7]  ;;  %v191_v5 = vld [vmem:[%s8085_s10] sm:$0xff]  ;;  %vm5651_vm4 = vcmask 523264   ;;  %s8573_s28 = scalar_lea.vmem [#allocation5], %s7795_s8 }
  0x3a   : > { %v415_v6 = vld [vmem:[%s8085_s10 + $0x700] sm:$0xff]  ;;  %v7784_v7 = vpack.c.bf16 %v642_v4, %v641_v2  ;;  %vm7785_vm3 = vmpackc.low %vm1988_vm0, %vm7958_vm2  ;;  %7108 = vmatprep.mubr.msk.f32.mxu0 %vm643_vm1, %v191_v5  ;;  %v192_v8 = vld [vmem:[%s8085_s10 + $0x8] sm:$0xff]  ;;  %s6647_s4 = smul.u32 57344, %s8003_s16  ;;  %s6114_s6 = sshll.u32 %s8573_s28, 4  ;;  %s10854_s6 = int_to_ptr.vmem [resolvable:$true] %s6114_s6 }
  0x3b   : > { %7444 = vmatprep.mubr.msk.f32.mxu1 %vm643_vm1, %v415_v6  ;;  %7781 = vmatprep.subr.bf16.mxu0 %v7780_v3  ;;  %v416_v9 = vld [vmem:[%s8085_s10 + $0x708] sm:$0xff]  ;;  %v193_v10 = vld [vmem:[%s8085_s10 + $0x10] sm:$0xff]  ;;  %v194_v12 = vld [vmem:[%s8085_s10 + $0x18] sm:$0xff]  ;;  %s6101_s17 = scalar_lea.sflag [#allocation4], %s8079_s5  ;;  %s7887_s19 = scalar_lea.vmem %s10854_s6, 57344 }
  0x3c   : > { %7790 = vmatprep.subr.bf16.mxu1 %v7780_v3  ;;  %7783 = vmatpush3.bf16.msra.mxu0 %v7780_v3  ;;  %v417_v11 = vld [vmem:[%s8085_s10 + $0x710] sm:$0xff]  ;;  %v418_v13 = vld [vmem:[%s8085_s10 + $0x718] sm:$0xff]  ;;  %v195_v14 = vld [vmem:[%s8085_s10 + $0x20] sm:$0xff]  ;;  %s10852_s11 = scalar_lea.hbm %s10908_s3, %s6647_s4  ;;  %p7888_p6 = scmp.ne.s32.totalorder %s10854_s6, %s7887_s19 }
  0x3d   : > { %7792 = vmatpush3.bf16.msra.mxu1 %v7780_v3  ;;  %7786 = vmatprep.subr.msk.bf16.mxu0 %vm7785_vm3, %v7784_v7  ;;  %v419_v15 = vld [vmem:[%s8085_s10 + $0x720] sm:$0xff]  ;;  %v196_v16 = vld [vmem:[%s8085_s10 + $0x28] sm:$0xff]  ;;  %v197_v18 = vld [vmem:[%s8085_s10 + $0x30] sm:$0xff]  ;;  %p10914_p10 = scmp.ne.s32.totalorder %s10911_s23, 0  ;;  %s7959_s22 = smov [#allocation5]  }
  0x3e   : > { %7791 = vmatprep.subr.msk.bf16.mxu1 %vm7785_vm3, %v7784_v7  ;;  %v420_v17 = vld [vmem:[%s8085_s10 + $0x728] sm:$0xff]  ;;  %v421_v19 = vld [vmem:[%s8085_s10 + $0x730] sm:$0xff]  ;;  %v198_v20 = vld [vmem:[%s8085_s10 + $0x38] sm:$0xff]  ;;  %s7891_s20 = sshll.u32 %s7959_s22, 4  ;;  %s7892_s20 = int_to_ptr.vmem [resolvable:$false] %s7891_s20 }
  0x3f   : > { %v422_v21 = vld [vmem:[%s8085_s10 + $0x738] sm:$0xff]  ;;  %v199_v22 = vld [vmem:[%s8085_s10 + $0x40] sm:$0xff]  ;;  %v200_v24 = vld [vmem:[%s8085_s10 + $0x48] sm:$0xff]  ;;  %p7889_p11 = pnand %p7888_p6, %p10914_p10  ;;  %p7894_p8 = scmp.lt.s32.totalorder %s10854_s6, %s7892_s20 }
  0x40   : > { %7789 = vmatpush3.bf16.msk.msra.mxu0 %vm7785_vm3, %v7784_v7  ;;  %v423_v23 = vld [vmem:[%s8085_s10 + $0x740] sm:$0xff]  ;;  %v424_v25 = vld [vmem:[%s8085_s10 + $0x748] sm:$0xff]  ;;  %v201_v26 = vld [vmem:[%s8085_s10 + $0x50] sm:$0xff] }
  0x41   : > { %7793 = vmatpush3.bf16.msk.msra.mxu1 %vm7785_vm3, %v7784_v7  ;;  %v425_v27 = vld [vmem:[%s8085_s10 + $0x750] sm:$0xff]  ;;  %v202_v28 = vld [vmem:[%s8085_s10 + $0x58] sm:$0xff]  ;;  %v203_v30 = vld [vmem:[%s8085_s10 + $0x60] sm:$0xff]  ;;  %p7890_p12 = pneg %p7889_p11 }
  0x42   : > { %v426_v29 = vld [vmem:[%s8085_s10 + $0x758] sm:$0xff]  ;;  %v427_v31 = vld [vmem:[%s8085_s10 + $0x760] sm:$0xff]  ;;  %v204_v32 = vld [vmem:[%s8085_s10 + $0x68] sm:$0xff] }
  0x43   : > { %7109 = vmatmul.mubr.msk.f32.vlgmr.msra.gmra.mrb[0].mxu0 %vm643_vm1, %v192_v8  ;;  %v428_v33 = vld [vmem:[%s8085_s10 + $0x768] sm:$0xff]  ;;  %v205_v34 = vld [vmem:[%s8085_s10 + $0x70] sm:$0xff]  ;;  %v206_v36 = vld [vmem:[%s8085_s10 + $0x78] sm:$0xff] }
  0x44   : > { %7445 = vmatmul.mubr.msk.f32.vlgmr.msra.gmra.mrb[0].mxu1 %vm643_vm1, %v416_v9  ;;  %7111 = vmatprep.mubr.msk.f32.mxu0 %vm643_vm1, %v193_v10  ;;  %v429_v35 = vld [vmem:[%s8085_s10 + $0x770] sm:$0xff]  ;;  %v430_v37 = vld [vmem:[%s8085_s10 + $0x778] sm:$0xff]  ;;  %v207_v38 = vld [vmem:[%s8085_s10 + $0x80] sm:$0xff] }
  0x45   : > { %7447 = vmatprep.mubr.msk.f32.mxu1 %vm643_vm1, %v417_v11  ;;  %v431_v39 = vld [vmem:[%s8085_s10 + $0x780] sm:$0xff]  ;;  %v208_v40 = vld [vmem:[%s8085_s10 + $0x88] sm:$0xff]  ;;  %v209_v42 = vld [vmem:[%s8085_s10 + $0x90] sm:$0xff] }
  0x46   : > { %v432_v41 = vld [vmem:[%s8085_s10 + $0x788] sm:$0xff]  ;;  %v433_v43 = vld [vmem:[%s8085_s10 + $0x790] sm:$0xff]  ;;  %v210_v44 = vld [vmem:[%s8085_s10 + $0x98] sm:$0xff] }
  0x47   : > { %7112 = vmatmul.mubr.msk.f32.gmra.mrb[2].mxu0 %vm643_vm1, %v194_v12  ;;  %v434_v45 = vld [vmem:[%s8085_s10 + $0x798] sm:$0xff]  ;;  %v211_v46 = vld [vmem:[%s8085_s10 + $0xa0] sm:$0xff]  ;;  %v212_v48 = vld [vmem:[%s8085_s10 + $0xa8] sm:$0xff] }
  0x48   : > { %7448 = vmatmul.mubr.msk.f32.gmra.mrb[2].mxu1 %vm643_vm1, %v418_v13  ;;  %7114 = vmatprep.mubr.msk.f32.mxu0 %vm643_vm1, %v195_v14  ;;  %v435_v47 = vld [vmem:[%s8085_s10 + $0x7a0] sm:$0xff]  ;;  %v436_v49 = vld [vmem:[%s8085_s10 + $0x7a8] sm:$0xff]  ;;  %v213_v50 = vld [vmem:[%s8085_s10 + $0xb0] sm:$0xff] }
  0x49   : > { %7450 = vmatprep.mubr.msk.f32.mxu1 %vm643_vm1, %v419_v15  ;;  %v437_v51 = vld [vmem:[%s8085_s10 + $0x7b0] sm:$0xff]  ;;  %v214_v52 = vld [vmem:[%s8085_s10 + $0xb8] sm:$0xff]  ;;  %v215_v54 = vld [vmem:[%s8085_s10 + $0xc0] sm:$0xff] }
  0x4a   : > { %v438_v53 = vld [vmem:[%s8085_s10 + $0x7b8] sm:$0xff]  ;;  %v439_v55 = vld [vmem:[%s8085_s10 + $0x7c0] sm:$0xff]  ;;  %v216_v56 = vld [vmem:[%s8085_s10 + $0xc8] sm:$0xff] }
  0x4b   : > { %7115 = vmatmul.mubr.msk.f32.gmra.mrb[4].mxu0 %vm643_vm1, %v196_v16  ;;  %v440_v57 = vld [vmem:[%s8085_s10 + $0x7c8] sm:$0xff]  ;;  %v217_v58 = vld [vmem:[%s8085_s10 + $0xd0] sm:$0xff]  ;;  %v218_v60 = vld [vmem:[%s8085_s10 + $0xd8] sm:$0xff] }
  0x4c   : > { %7451 = vmatmul.mubr.msk.f32.gmra.mrb[4].mxu1 %vm643_vm1, %v420_v17  ;;  %7117 = vmatprep.mubr.msk.f32.mxu0 %vm643_vm1, %v197_v18  ;;  %v441_v59 = vld [vmem:[%s8085_s10 + $0x7d0] sm:$0xff]  ;;  %v442_v61 = vld [vmem:[%s8085_s10 + $0x7d8] sm:$0xff]  ;;  %v219_v62 = vld [vmem:[%s8085_s10 + $0xe0] sm:$0xff] }
  0x4d   : > { %7453 = vmatprep.mubr.msk.f32.mxu1 %vm643_vm1, %v421_v19  ;;  %v443_v63 = vld [vmem:[%s8085_s10 + $0x7e0] sm:$0xff]  ;;  %v220_v0 = vld [vmem:[%s8085_s10 + $0xe8] sm:$0xff]  ;;  %v221_v2 = vld [vmem:[%s8085_s10 + $0xf0] sm:$0xff] }
  0x4e   : > { %v444_v1 = vld [vmem:[%s8085_s10 + $0x7e8] sm:$0xff]  ;;  %v445_v3 = vld [vmem:[%s8085_s10 + $0x7f0] sm:$0xff]  ;;  %v222_v4 = vld [vmem:[%s8085_s10 + $0xf8] sm:$0xff] }
  0x4f   : > { %7118 = vmatmul.mubr.msk.f32.gmra.mrb[6].mxu0 %vm643_vm1, %v198_v20  ;;  %v446_v5 = vld [vmem:[%s8085_s10 + $0x7f8] sm:$0xff]  ;;  %v223_v6 = vld [vmem:[%s8085_s10 + $0x100] sm:$0xff]  ;;  %v224_v8 = vld [vmem:[%s8085_s10 + $0x108] sm:$0xff] }
  0x50   : > { %7454 = vmatmul.mubr.msk.f32.gmra.mrb[6].mxu1 %vm643_vm1, %v422_v21  ;;  %7120 = vmatprep.mubr.msk.f32.mxu0 %vm643_vm1, %v199_v22  ;;  %v447_v7 = vld [vmem:[%s8085_s10 + $0x800] sm:$0xff]  ;;  %v448_v9 = vld [vmem:[%s8085_s10 + $0x808] sm:$0xff]  ;;  %v225_v10 = vld [vmem:[%s8085_s10 + $0x110] sm:$0xff] }
  0x51   : > { %7456 = vmatprep.mubr.msk.f32.mxu1 %vm643_vm1, %v423_v23  ;;  %v449_v11 = vld [vmem:[%s8085_s10 + $0x810] sm:$0xff]  ;;  %v226_v12 = vld [vmem:[%s8085_s10 + $0x118] sm:$0xff]  ;;  %v227_v14 = vld [vmem:[%s8085_s10 + $0x120] sm:$0xff] }
  0x52   : > { %v450_v13 = vld [vmem:[%s8085_s10 + $0x818] sm:$0xff]  ;;  %v451_v15 = vld [vmem:[%s8085_s10 + $0x820] sm:$0xff]  ;;  %v228_v16 = vld [vmem:[%s8085_s10 + $0x128] sm:$0xff] }
  0x53   : > { %7121 = vmatmul.mubr.msk.f32.gmra.mrb[8].mxu0 %vm643_vm1, %v200_v24  ;;  %v452_v17 = vld [vmem:[%s8085_s10 + $0x828] sm:$0xff]  ;;  %v229_v18 = vld [vmem:[%s8085_s10 + $0x130] sm:$0xff]  ;;  %v230_v20 = vld [vmem:[%s8085_s10 + $0x138] sm:$0xff] }
  0x54   : > { %7457 = vmatmul.mubr.msk.f32.gmra.mrb[8].mxu1 %vm643_vm1, %v424_v25  ;;  %7123 = vmatprep.mubr.msk.f32.mxu0 %vm643_vm1, %v201_v26  ;;  %v453_v19 = vld [vmem:[%s8085_s10 + $0x830] sm:$0xff]  ;;  %v454_v21 = vld [vmem:[%s8085_s10 + $0x838] sm:$0xff]  ;;  %v231_v22 = vld [vmem:[%s8085_s10 + $0x140] sm:$0xff] }
  0x55   : > { %7459 = vmatprep.mubr.msk.f32.mxu1 %vm643_vm1, %v425_v27  ;;  %v455_v23 = vld [vmem:[%s8085_s10 + $0x840] sm:$0xff]  ;;  %v232_v24 = vld [vmem:[%s8085_s10 + $0x148] sm:$0xff]  ;;  %v233_v26 = vld [vmem:[%s8085_s10 + $0x150] sm:$0xff] }
  0x56   : > { %v456_v25 = vld [vmem:[%s8085_s10 + $0x848] sm:$0xff]  ;;  %v457_v27 = vld [vmem:[%s8085_s10 + $0x850] sm:$0xff] }
  0x57   : > { %7124 = vmatmul.mubr.msk.f32.gmra.mrb[10].mxu0 %vm643_vm1, %v202_v28  ;;  %v234_v28 = vld [vmem:[%s8085_s10 + $0x158] sm:$0xff] }
  0x58   : > { %7460 = vmatmul.mubr.msk.f32.gmra.mrb[10].mxu1 %vm643_vm1, %v426_v29  ;;  %7126 = vmatprep.mubr.msk.f32.mxu0 %vm643_vm1, %v203_v30  ;;  %v458_v29 = vld [vmem:[%s8085_s10 + $0x858] sm:$0xff]  ;;  %v235_v30 = vld [vmem:[%s8085_s10 + $0x160] sm:$0xff] }
  0x59   : > { %7462 = vmatprep.mubr.msk.f32.mxu1 %vm643_vm1, %v427_v31  ;;  %v459_v31 = vld [vmem:[%s8085_s10 + $0x860] sm:$0xff] }
  0x5b   : > { %7127 = vmatmul.mubr.msk.f32.gmra.mrb[12].mxu0 %vm643_vm1, %v204_v32  ;;  %v236_v32 = vld [vmem:[%s8085_s10 + $0x168] sm:$0xff] }
  0x5c   : > { %7463 = vmatmul.mubr.msk.f32.gmra.mrb[12].mxu1 %vm643_vm1, %v428_v33  ;;  %7129 = vmatprep.mubr.msk.f32.mxu0 %vm643_vm1, %v205_v34  ;;  %v460_v33 = vld [vmem:[%s8085_s10 + $0x868] sm:$0xff]  ;;  %v237_v34 = vld [vmem:[%s8085_s10 + $0x170] sm:$0xff] }
  0x5d   : > { %7465 = vmatprep.mubr.msk.f32.mxu1 %vm643_vm1, %v429_v35  ;;  %v461_v35 = vld [vmem:[%s8085_s10 + $0x870] sm:$0xff] }
  0x5f   : > { %7130 = vmatmul.mubr.msk.f32.gmra.mrb[14].mxu0 %vm643_vm1, %v206_v36  ;;  %v238_v36 = vld [vmem:[%s8085_s10 + $0x178] sm:$0xff] }
  0x60   : > { %7466 = vmatmul.mubr.msk.f32.gmra.mrb[14].mxu1 %vm643_vm1, %v430_v37  ;;  %7132 = vmatprep.mubr.msk.f32.mxu0 %vm643_vm1, %v207_v38  ;;  %v462_v37 = vld [vmem:[%s8085_s10 + $0x878] sm:$0xff]  ;;  %v239_v38 = vld [vmem:[%s8085_s10 + $0x180] sm:$0xff] }
  0x61   : > { %7468 = vmatprep.mubr.msk.f32.mxu1 %vm643_vm1, %v431_v39  ;;  %v463_v39 = vld [vmem:[%s8085_s10 + $0x880] sm:$0xff] }
  0x63   : > { %7133 = vmatmul.mubr.msk.f32.gmra.mrb[16].mxu0 %vm643_vm1, %v208_v40  ;;  %v240_v40 = vld [vmem:[%s8085_s10 + $0x188] sm:$0xff] }
  0x64   : > { %7469 = vmatmul.mubr.msk.f32.gmra.mrb[16].mxu1 %vm643_vm1, %v432_v41  ;;  %7135 = vmatprep.mubr.msk.f32.mxu0 %vm643_vm1, %v209_v42  ;;  %v464_v41 = vld [vmem:[%s8085_s10 + $0x888] sm:$0xff]  ;;  %v241_v42 = vld [vmem:[%s8085_s10 + $0x190] sm:$0xff] }
  0x65   : > { %7471 = vmatprep.mubr.msk.f32.mxu1 %vm643_vm1, %v433_v43  ;;  %v465_v43 = vld [vmem:[%s8085_s10 + $0x890] sm:$0xff] }
  0x67   : > { %7136 = vmatmul.mubr.msk.f32.gmra.mrb[18].mxu0 %vm643_vm1, %v210_v44  ;;  %v242_v44 = vld [vmem:[%s8085_s10 + $0x198] sm:$0xff] }
  0x68   : > { %7472 = vmatmul.mubr.msk.f32.gmra.mrb[18].mxu1 %vm643_vm1, %v434_v45  ;;  %7138 = vmatprep.mubr.msk.f32.mxu0 %vm643_vm1, %v211_v46  ;;  %v466_v45 = vld [vmem:[%s8085_s10 + $0x898] sm:$0xff]  ;;  %v243_v46 = vld [vmem:[%s8085_s10 + $0x1a0] sm:$0xff] }
  0x69   : > { %7474 = vmatprep.mubr.msk.f32.mxu1 %vm643_vm1, %v435_v47  ;;  %v467_v47 = vld [vmem:[%s8085_s10 + $0x8a0] sm:$0xff] }
  0x6b   : > { %7139 = vmatmul.mubr.msk.f32.gmra.mrb[20].mxu0 %vm643_vm1, %v212_v48  ;;  %v244_v48 = vld [vmem:[%s8085_s10 + $0x1a8] sm:$0xff] }
  0x6c   : > { %7475 = vmatmul.mubr.msk.f32.gmra.mrb[20].mxu1 %vm643_vm1, %v436_v49  ;;  %7141 = vmatprep.mubr.msk.f32.mxu0 %vm643_vm1, %v213_v50  ;;  %v468_v49 = vld [vmem:[%s8085_s10 + $0x8a8] sm:$0xff]  ;;  %v245_v50 = vld [vmem:[%s8085_s10 + $0x1b0] sm:$0xff] }
  0x6d   : > { %7477 = vmatprep.mubr.msk.f32.mxu1 %vm643_vm1, %v437_v51  ;;  %v469_v51 = vld [vmem:[%s8085_s10 + $0x8b0] sm:$0xff] }
  0x6f   : > { %7142 = vmatmul.mubr.msk.f32.gmra.mrb[22].mxu0 %vm643_vm1, %v214_v52  ;;  %v246_v52 = vld [vmem:[%s8085_s10 + $0x1b8] sm:$0xff] }
  0x70   : > { %7478 = vmatmul.mubr.msk.f32.gmra.mrb[22].mxu1 %vm643_vm1, %v438_v53  ;;  %7144 = vmatprep.mubr.msk.f32.mxu0 %vm643_vm1, %v215_v54  ;;  %v470_v53 = vld [vmem:[%s8085_s10 + $0x8b8] sm:$0xff]  ;;  %v247_v54 = vld [vmem:[%s8085_s10 + $0x1c0] sm:$0xff] }
  0x71   : > { %7480 = vmatprep.mubr.msk.f32.mxu1 %vm643_vm1, %v439_v55  ;;  %v471_v55 = vld [vmem:[%s8085_s10 + $0x8c0] sm:$0xff] }
  0x73   : > { %7145 = vmatmul.mubr.msk.f32.gmra.mrb[24].mxu0 %vm643_vm1, %v216_v56  ;;  %v248_v56 = vld [vmem:[%s8085_s10 + $0x1c8] sm:$0xff] }
  0x74   : > { %7481 = vmatmul.mubr.msk.f32.gmra.mrb[24].mxu1 %vm643_vm1, %v440_v57  ;;  %7147 = vmatprep.mubr.msk.f32.mxu0 %vm643_vm1, %v217_v58  ;;  %v472_v57 = vld [vmem:[%s8085_s10 + $0x8c8] sm:$0xff]  ;;  %v249_v58 = vld [vmem:[%s8085_s10 + $0x1d0] sm:$0xff] }
  0x75   : > { %7483 = vmatprep.mubr.msk.f32.mxu1 %vm643_vm1, %v441_v59  ;;  %v473_v59 = vld [vmem:[%s8085_s10 + $0x8d0] sm:$0xff] }
  0x77   : > { %7148 = vmatmul.mubr.msk.f32.gmra.mrb[26].mxu0 %vm643_vm1, %v218_v60  ;;  %v250_v60 = vld [vmem:[%s8085_s10 + $0x1d8] sm:$0xff] }
  0x78   : > { %7484 = vmatmul.mubr.msk.f32.gmra.mrb[26].mxu1 %vm643_vm1, %v442_v61  ;;  %7150 = vmatprep.mubr.msk.f32.mxu0 %vm643_vm1, %v219_v62  ;;  %v474_v61 = vld [vmem:[%s8085_s10 + $0x8d8] sm:$0xff]  ;;  %v251_v62 = vld [vmem:[%s8085_s10 + $0x1e0] sm:$0xff] }
  0x79   : > { %7486 = vmatprep.mubr.msk.f32.mxu1 %vm643_vm1, %v443_v63  ;;  %v475_v63 = vld [vmem:[%s8085_s10 + $0x8e0] sm:$0xff] }
  0x7b   : > { %7151 = vmatmul.mubr.msk.f32.gmra.mrb[28].mxu0 %vm643_vm1, %v220_v0  ;;  %v252_v0 = vld [vmem:[%s8085_s10 + $0x1e8] sm:$0xff] }
  0x7c   : > { %7487 = vmatmul.mubr.msk.f32.gmra.mrb[28].mxu1 %vm643_vm1, %v444_v1  ;;  %7153 = vmatprep.mubr.msk.f32.mxu0 %vm643_vm1, %v221_v2  ;;  %v476_v1 = vld [vmem:[%s8085_s10 + $0x8e8] sm:$0xff]  ;;  %v253_v2 = vld [vmem:[%s8085_s10 + $0x1f0] sm:$0xff] }
  0x7d   : > { %7489 = vmatprep.mubr.msk.f32.mxu1 %vm643_vm1, %v445_v3  ;;  %v477_v3 = vld [vmem:[%s8085_s10 + $0x8f0] sm:$0xff] }
  0x7f   : > { %7154 = vmatmul.mubr.msk.f32.gmra.mrb[30].mxu0 %vm643_vm1, %v222_v4  ;;  %v254_v4 = vld [vmem:[%s8085_s10 + $0x1f8] sm:$0xff] }
  0x80   : > { %7490 = vmatmul.mubr.msk.f32.gmra.mrb[30].mxu1 %vm643_vm1, %v446_v5  ;;  %7156 = vmatprep.mubr.msk.f32.mxu0 %vm643_vm1, %v223_v6  ;;  %v478_v5 = vld [vmem:[%s8085_s10 + $0x8f8] sm:$0xff]  ;;  %v255_v6 = vld [vmem:[%s8085_s10 + $0x200] sm:$0xff] }
  0x81   : > { %7492 = vmatprep.mubr.msk.f32.mxu1 %vm643_vm1, %v447_v7  ;;  %v479_v7 = vld [vmem:[%s8085_s10 + $0x900] sm:$0xff] }
  0x83   : > { %7157 = vmatmul.mubr.msk.f32.gmra.mrb[32].mxu0 %vm643_vm1, %v224_v8  ;;  %v256_v8 = vld [vmem:[%s8085_s10 + $0x208] sm:$0xff] }
  0x84   : > { %7493 = vmatmul.mubr.msk.f32.gmra.mrb[32].mxu1 %vm643_vm1, %v448_v9  ;;  %7159 = vmatprep.mubr.msk.f32.mxu0 %vm643_vm1, %v225_v10  ;;  %v480_v9 = vld [vmem:[%s8085_s10 + $0x908] sm:$0xff]  ;;  %v257_v10 = vld [vmem:[%s8085_s10 + $0x210] sm:$0xff] }
  0x85   : > { %7495 = vmatprep.mubr.msk.f32.mxu1 %vm643_vm1, %v449_v11  ;;  %v481_v11 = vld [vmem:[%s8085_s10 + $0x910] sm:$0xff] }
  0x87   : > { %7160 = vmatmul.mubr.msk.f32.gmra.mrb[34].mxu0 %vm643_vm1, %v226_v12  ;;  %v258_v12 = vld [vmem:[%s8085_s10 + $0x218] sm:$0xff] }
  0x88   : > { %7496 = vmatmul.mubr.msk.f32.gmra.mrb[34].mxu1 %vm643_vm1, %v450_v13  ;;  %7162 = vmatprep.mubr.msk.f32.mxu0 %vm643_vm1, %v227_v14  ;;  %v482_v13 = vld [vmem:[%s8085_s10 + $0x918] sm:$0xff]  ;;  %v259_v14 = vld [vmem:[%s8085_s10 + $0x220] sm:$0xff] }
  0x89   : > { %7498 = vmatprep.mubr.msk.f32.mxu1 %vm643_vm1, %v451_v15  ;;  %v483_v15 = vld [vmem:[%s8085_s10 + $0x920] sm:$0xff] }
  0x8b   : > { %7163 = vmatmul.mubr.msk.f32.gmra.mrb[36].mxu0 %vm643_vm1, %v228_v16  ;;  %v260_v16 = vld [vmem:[%s8085_s10 + $0x228] sm:$0xff] }
  0x8c   : > { %7499 = vmatmul.mubr.msk.f32.gmra.mrb[36].mxu1 %vm643_vm1, %v452_v17  ;;  %7165 = vmatprep.mubr.msk.f32.mxu0 %vm643_vm1, %v229_v18  ;;  %v484_v17 = vld [vmem:[%s8085_s10 + $0x928] sm:$0xff]  ;;  %v261_v18 = vld [vmem:[%s8085_s10 + $0x230] sm:$0xff] }
  0x8d   : > { %7501 = vmatprep.mubr.msk.f32.mxu1 %vm643_vm1, %v453_v19  ;;  %v485_v19 = vld [vmem:[%s8085_s10 + $0x930] sm:$0xff] }
  0x8f   : > { %7166 = vmatmul.mubr.msk.f32.gmra.mrb[38].mxu0 %vm643_vm1, %v230_v20  ;;  %v262_v20 = vld [vmem:[%s8085_s10 + $0x238] sm:$0xff] }
  0x90   : > { %7502 = vmatmul.mubr.msk.f32.gmra.mrb[38].mxu1 %vm643_vm1, %v454_v21  ;;  %7168 = vmatprep.mubr.msk.f32.mxu0 %vm643_vm1, %v231_v22  ;;  %v486_v21 = vld [vmem:[%s8085_s10 + $0x938] sm:$0xff]  ;;  %v263_v22 = vld [vmem:[%s8085_s10 + $0x240] sm:$0xff] }
  0x91   : > { %7504 = vmatprep.mubr.msk.f32.mxu1 %vm643_vm1, %v455_v23  ;;  %v487_v23 = vld [vmem:[%s8085_s10 + $0x940] sm:$0xff] }
  0x93   : > { %7169 = vmatmul.mubr.msk.f32.gmra.mrb[40].mxu0 %vm643_vm1, %v232_v24  ;;  %v264_v24 = vld [vmem:[%s8085_s10 + $0x248] sm:$0xff] }
  0x94   : > { %7505 = vmatmul.mubr.msk.f32.gmra.mrb[40].mxu1 %vm643_vm1, %v456_v25  ;;  %7171 = vmatprep.mubr.msk.f32.mxu0 %vm643_vm1, %v233_v26  ;;  %v488_v25 = vld [vmem:[%s8085_s10 + $0x948] sm:$0xff]  ;;  %v265_v26 = vld [vmem:[%s8085_s10 + $0x250] sm:$0xff] }
  0x95   : > { %7507 = vmatprep.mubr.msk.f32.mxu1 %vm643_vm1, %v457_v27  ;;  %v489_v27 = vld [vmem:[%s8085_s10 + $0x950] sm:$0xff] }
  0x97   : > { %7172 = vmatmul.mubr.msk.f32.gmra.mrb[42].mxu0 %vm643_vm1, %v234_v28  ;;  %v266_v28 = vld [vmem:[%s8085_s10 + $0x258] sm:$0xff] }
  0x98   : > { %7508 = vmatmul.mubr.msk.f32.gmra.mrb[42].mxu1 %vm643_vm1, %v458_v29  ;;  %7174 = vmatprep.mubr.msk.f32.mxu0 %vm643_vm1, %v235_v30  ;;  %v490_v29 = vld [vmem:[%s8085_s10 + $0x958] sm:$0xff]  ;;  %v267_v30 = vld [vmem:[%s8085_s10 + $0x260] sm:$0xff] }
  0x99   : > { %7510 = vmatprep.mubr.msk.f32.mxu1 %vm643_vm1, %v459_v31  ;;  %v491_v31 = vld [vmem:[%s8085_s10 + $0x960] sm:$0xff] }
  0x9b   : > { %7175 = vmatmul.mubr.msk.f32.gmra.mrb[44].mxu0 %vm643_vm1, %v236_v32  ;;  %v268_v32 = vld [vmem:[%s8085_s10 + $0x268] sm:$0xff] }
  0x9c   : > { %7511 = vmatmul.mubr.msk.f32.gmra.mrb[44].mxu1 %vm643_vm1, %v460_v33  ;;  %7177 = vmatprep.mubr.msk.f32.mxu0 %vm643_vm1, %v237_v34  ;;  %v492_v33 = vld [vmem:[%s8085_s10 + $0x968] sm:$0xff]  ;;  %v269_v34 = vld [vmem:[%s8085_s10 + $0x270] sm:$0xff] }
  0x9d   : > { %7513 = vmatprep.mubr.msk.f32.mxu1 %vm643_vm1, %v461_v35  ;;  %v493_v35 = vld [vmem:[%s8085_s10 + $0x970] sm:$0xff] }
  0x9f   : > { %7178 = vmatmul.mubr.msk.f32.gmra.mrb[46].mxu0 %vm643_vm1, %v238_v36  ;;  %v270_v36 = vld [vmem:[%s8085_s10 + $0x278] sm:$0xff] }
  0xa0   : > { %7514 = vmatmul.mubr.msk.f32.gmra.mrb[46].mxu1 %vm643_vm1, %v462_v37  ;;  %7180 = vmatprep.mubr.msk.f32.mxu0 %vm643_vm1, %v239_v38  ;;  %v494_v37 = vld [vmem:[%s8085_s10 + $0x978] sm:$0xff]  ;;  %v271_v38 = vld [vmem:[%s8085_s10 + $0x280] sm:$0xff] }
  0xa1   : > { %7516 = vmatprep.mubr.msk.f32.mxu1 %vm643_vm1, %v463_v39  ;;  %v495_v39 = vld [vmem:[%s8085_s10 + $0x980] sm:$0xff] }
  0xa3   : > { %7181 = vmatmul.mubr.msk.f32.gmra.mrb[48].mxu0 %vm643_vm1, %v240_v40  ;;  %v272_v40 = vld [vmem:[%s8085_s10 + $0x288] sm:$0xff] }
  0xa4   : > { %7517 = vmatmul.mubr.msk.f32.gmra.mrb[48].mxu1 %vm643_vm1, %v464_v41  ;;  %7183 = vmatprep.mubr.msk.f32.mxu0 %vm643_vm1, %v241_v42  ;;  %v496_v41 = vld [vmem:[%s8085_s10 + $0x988] sm:$0xff]  ;;  %v273_v42 = vld [vmem:[%s8085_s10 + $0x290] sm:$0xff] }
  0xa5   : > { %7519 = vmatprep.mubr.msk.f32.mxu1 %vm643_vm1, %v465_v43  ;;  %v497_v43 = vld [vmem:[%s8085_s10 + $0x990] sm:$0xff] }
  0xa7   : > { %7184 = vmatmul.mubr.msk.f32.gmra.mrb[50].mxu0 %vm643_vm1, %v242_v44  ;;  %v274_v44 = vld [vmem:[%s8085_s10 + $0x298] sm:$0xff] }
  0xa8   : > { %7520 = vmatmul.mubr.msk.f32.gmra.mrb[50].mxu1 %vm643_vm1, %v466_v45  ;;  %7186 = vmatprep.mubr.msk.f32.mxu0 %vm643_vm1, %v243_v46  ;;  %v498_v45 = vld [vmem:[%s8085_s10 + $0x998] sm:$0xff]  ;;  %v275_v46 = vld [vmem:[%s8085_s10 + $0x2a0] sm:$0xff] }
  0xa9   : > { %7522 = vmatprep.mubr.msk.f32.mxu1 %vm643_vm1, %v467_v47  ;;  %v499_v47 = vld [vmem:[%s8085_s10 + $0x9a0] sm:$0xff] }
  0xab   : > { %7187 = vmatmul.mubr.msk.f32.gmra.mrb[52].mxu0 %vm643_vm1, %v244_v48  ;;  %v276_v48 = vld [vmem:[%s8085_s10 + $0x2a8] sm:$0xff] }
  0xac   : > { %7523 = vmatmul.mubr.msk.f32.gmra.mrb[52].mxu1 %vm643_vm1, %v468_v49  ;;  %7189 = vmatprep.mubr.msk.f32.mxu0 %vm643_vm1, %v245_v50  ;;  %v500_v49 = vld [vmem:[%s8085_s10 + $0x9a8] sm:$0xff]  ;;  %v277_v50 = vld [vmem:[%s8085_s10 + $0x2b0] sm:$0xff] }
  0xad   : > { %7525 = vmatprep.mubr.msk.f32.mxu1 %vm643_vm1, %v469_v51  ;;  %v501_v51 = vld [vmem:[%s8085_s10 + $0x9b0] sm:$0xff] }
  0xaf   : > { %7190 = vmatmul.mubr.msk.f32.gmra.mrb[54].mxu0 %vm643_vm1, %v246_v52  ;;  %v278_v52 = vld [vmem:[%s8085_s10 + $0x2b8] sm:$0xff] }
  0xb0   : > { %7526 = vmatmul.mubr.msk.f32.gmra.mrb[54].mxu1 %vm643_vm1, %v470_v53  ;;  %7192 = vmatprep.mubr.msk.f32.mxu0 %vm643_vm1, %v247_v54  ;;  %v502_v53 = vld [vmem:[%s8085_s10 + $0x9b8] sm:$0xff]  ;;  %v279_v54 = vld [vmem:[%s8085_s10 + $0x2c0] sm:$0xff] }
  0xb1   : > { %7528 = vmatprep.mubr.msk.f32.mxu1 %vm643_vm1, %v471_v55  ;;  %v503_v55 = vld [vmem:[%s8085_s10 + $0x9c0] sm:$0xff] }
  0xb3   : > { %7193 = vmatmul.mubr.msk.f32.gmra.mrb[56].mxu0 %vm643_vm1, %v248_v56  ;;  %v280_v56 = vld [vmem:[%s8085_s10 + $0x2c8] sm:$0xff] }
  0xb4   : > { %7529 = vmatmul.mubr.msk.f32.gmra.mrb[56].mxu1 %vm643_vm1, %v472_v57  ;;  %7195 = vmatprep.mubr.msk.f32.mxu0 %vm643_vm1, %v249_v58  ;;  %v504_v57 = vld [vmem:[%s8085_s10 + $0x9c8] sm:$0xff]  ;;  %v281_v58 = vld [vmem:[%s8085_s10 + $0x2d0] sm:$0xff] }
  0xb5   : > { %7531 = vmatprep.mubr.msk.f32.mxu1 %vm643_vm1, %v473_v59  ;;  %v505_v59 = vld [vmem:[%s8085_s10 + $0x9d0] sm:$0xff] }
  0xb7   : > { %7196 = vmatmul.mubr.msk.f32.gmra.mrb[58].mxu0 %vm643_vm1, %v250_v60  ;;  %v282_v60 = vld [vmem:[%s8085_s10 + $0x2d8] sm:$0xff] }
  0xb8   : > { %7532 = vmatmul.mubr.msk.f32.gmra.mrb[58].mxu1 %vm643_vm1, %v474_v61  ;;  %7198 = vmatprep.mubr.msk.f32.mxu0 %vm643_vm1, %v251_v62  ;;  %v506_v61 = vld [vmem:[%s8085_s10 + $0x9d8] sm:$0xff]  ;;  %v283_v62 = vld [vmem:[%s8085_s10 + $0x2e0] sm:$0xff] }
  0xb9   : > { %7534 = vmatprep.mubr.msk.f32.mxu1 %vm643_vm1, %v475_v63  ;;  %v507_v63 = vld [vmem:[%s8085_s10 + $0x9e0] sm:$0xff] }
  0xbb   : > { %7199 = vmatmul.mubr.msk.f32.gmra.mrb[60].mxu0 %vm643_vm1, %v252_v0  ;;  %v284_v0 = vld [vmem:[%s8085_s10 + $0x2e8] sm:$0xff] }
  0xbc   : > { %7535 = vmatmul.mubr.msk.f32.gmra.mrb[60].mxu1 %vm643_vm1, %v476_v1  ;;  %7201 = vmatprep.mubr.msk.f32.mxu0 %vm643_vm1, %v253_v2  ;;  %v508_v1 = vld [vmem:[%s8085_s10 + $0x9e8] sm:$0xff]  ;;  %v285_v2 = vld [vmem:[%s8085_s10 + $0x2f0] sm:$0xff] }
  0xbd   : > { %7537 = vmatprep.mubr.msk.f32.mxu1 %vm643_vm1, %v477_v3  ;;  %v509_v3 = vld [vmem:[%s8085_s10 + $0x9f0] sm:$0xff] }
  0xbf   : > { %7202 = vmatmul.mubr.msk.f32.gmra.mrb[62].mxu0 %vm643_vm1, %v254_v4  ;;  %v286_v4 = vld [vmem:[%s8085_s10 + $0x2f8] sm:$0xff] }
  0xc0   : > { %7538 = vmatmul.mubr.msk.f32.gmra.mrb[62].mxu1 %vm643_vm1, %v478_v5  ;;  %7204 = vmatprep.mubr.msk.f32.mxu0 %vm643_vm1, %v255_v6  ;;  %v510_v5 = vld [vmem:[%s8085_s10 + $0x9f8] sm:$0xff]  ;;  %v287_v6 = vld [vmem:[%s8085_s10 + $0x300] sm:$0xff] }
  0xc1   : > { %7540 = vmatprep.mubr.msk.f32.mxu1 %vm643_vm1, %v479_v7  ;;  %v511_v7 = vld [vmem:[%s8085_s10 + $0xa00] sm:$0xff] }
  0xc3   : > { %7205 = vmatmul.mubr.msk.f32.gmra.mrb[64].mxu0 %vm643_vm1, %v256_v8  ;;  %v288_v8 = vld [vmem:[%s8085_s10 + $0x308] sm:$0xff] }
  0xc4   : > { %7541 = vmatmul.mubr.msk.f32.gmra.mrb[64].mxu1 %vm643_vm1, %v480_v9  ;;  %7207 = vmatprep.mubr.msk.f32.mxu0 %vm643_vm1, %v257_v10  ;;  %v512_v9 = vld [vmem:[%s8085_s10 + $0xa08] sm:$0xff]  ;;  %v289_v10 = vld [vmem:[%s8085_s10 + $0x310] sm:$0xff] }
  0xc5   : > { %7543 = vmatprep.mubr.msk.f32.mxu1 %vm643_vm1, %v481_v11  ;;  %v513_v11 = vld [vmem:[%s8085_s10 + $0xa10] sm:$0xff] }
  0xc7   : > { %7208 = vmatmul.mubr.msk.f32.gmra.mrb[66].mxu0 %vm643_vm1, %v258_v12  ;;  %v290_v12 = vld [vmem:[%s8085_s10 + $0x318] sm:$0xff] }
  0xc8   : > { %7544 = vmatmul.mubr.msk.f32.gmra.mrb[66].mxu1 %vm643_vm1, %v482_v13  ;;  %7210 = vmatprep.mubr.msk.f32.mxu0 %vm643_vm1, %v259_v14  ;;  %v514_v13 = vld [vmem:[%s8085_s10 + $0xa18] sm:$0xff]  ;;  %v291_v14 = vld [vmem:[%s8085_s10 + $0x320] sm:$0xff] }
  0xc9   : > { %7546 = vmatprep.mubr.msk.f32.mxu1 %vm643_vm1, %v483_v15  ;;  %v515_v15 = vld [vmem:[%s8085_s10 + $0xa20] sm:$0xff] }
  0xcb   : > { %7211 = vmatmul.mubr.msk.f32.gmra.mrb[68].mxu0 %vm643_vm1, %v260_v16  ;;  %v292_v16 = vld [vmem:[%s8085_s10 + $0x328] sm:$0xff] }
  0xcc   : > { %7547 = vmatmul.mubr.msk.f32.gmra.mrb[68].mxu1 %vm643_vm1, %v484_v17  ;;  %7213 = vmatprep.mubr.msk.f32.mxu0 %vm643_vm1, %v261_v18  ;;  %v516_v17 = vld [vmem:[%s8085_s10 + $0xa28] sm:$0xff]  ;;  %v293_v18 = vld [vmem:[%s8085_s10 + $0x330] sm:$0xff] }
  0xcd   : > { %7549 = vmatprep.mubr.msk.f32.mxu1 %vm643_vm1, %v485_v19  ;;  %v517_v19 = vld [vmem:[%s8085_s10 + $0xa30] sm:$0xff] }
  0xcf   : > { %7214 = vmatmul.mubr.msk.f32.gmra.mrb[70].mxu0 %vm643_vm1, %v262_v20  ;;  %v294_v20 = vld [vmem:[%s8085_s10 + $0x338] sm:$0xff] }
  0xd0   : > { %7550 = vmatmul.mubr.msk.f32.gmra.mrb[70].mxu1 %vm643_vm1, %v486_v21  ;;  %7216 = vmatprep.mubr.msk.f32.mxu0 %vm643_vm1, %v263_v22  ;;  %v518_v21 = vld [vmem:[%s8085_s10 + $0xa38] sm:$0xff]  ;;  %v295_v22 = vld [vmem:[%s8085_s10 + $0x340] sm:$0xff] }
  0xd1   : > { %7552 = vmatprep.mubr.msk.f32.mxu1 %vm643_vm1, %v487_v23  ;;  %v519_v23 = vld [vmem:[%s8085_s10 + $0xa40] sm:$0xff] }
  0xd3   : > { %7217 = vmatmul.mubr.msk.f32.gmra.mrb[72].mxu0 %vm643_vm1, %v264_v24  ;;  %v296_v24 = vld [vmem:[%s8085_s10 + $0x348] sm:$0xff] }
  0xd4   : > { %7553 = vmatmul.mubr.msk.f32.gmra.mrb[72].mxu1 %vm643_vm1, %v488_v25  ;;  %7219 = vmatprep.mubr.msk.f32.mxu0 %vm643_vm1, %v265_v26  ;;  %v520_v25 = vld [vmem:[%s8085_s10 + $0xa48] sm:$0xff]  ;;  %v297_v26 = vld [vmem:[%s8085_s10 + $0x350] sm:$0xff] }
  0xd5   : > { %7555 = vmatprep.mubr.msk.f32.mxu1 %vm643_vm1, %v489_v27  ;;  %v521_v27 = vld [vmem:[%s8085_s10 + $0xa50] sm:$0xff] }
  0xd7   : > { %7220 = vmatmul.mubr.msk.f32.gmra.mrb[74].mxu0 %vm643_vm1, %v266_v28  ;;  %v8532_v28 = vld [vmem:[%s10907_s2] ss:$0 sm:$0xff] }
  0xd8   : > { %7556 = vmatmul.mubr.msk.f32.gmra.mrb[74].mxu1 %vm643_vm1, %v490_v29  ;;  %7222 = vmatprep.mubr.msk.f32.mxu0 %vm643_vm1, %v267_v30  ;;  %v298_v29 = vld [vmem:[%s8085_s10 + $0x358] sm:$0xff] }
  0xd9   : > { %7558 = vmatprep.mubr.msk.f32.mxu1 %vm643_vm1, %v491_v31  ;;  %v522_v30 = vld [vmem:[%s8085_s10 + $0xa58] sm:$0xff]  ;;  %v299_v31 = vld [vmem:[%s8085_s10 + $0x360] sm:$0xff] }
  0xdb   : > { %7223 = vmatmul.mubr.msk.f32.gmra.mrb[76].mxu0 %vm643_vm1, %v268_v32  ;;  %v523_v32 = vld [vmem:[%s8085_s10 + $0xa60] sm:$0xff] }
  0xdc   : > { %7559 = vmatmul.mubr.msk.f32.gmra.mrb[76].mxu1 %vm643_vm1, %v492_v33  ;;  %7225 = vmatprep.mubr.msk.f32.mxu0 %vm643_vm1, %v269_v34  ;;  %v8543_v34 = vld [vmem:[%s10907_s2 + $0x1] ss:$0 sm:$0xff] }
  0xdd   : > { %7561 = vmatprep.mubr.msk.f32.mxu1 %vm643_vm1, %v493_v35 }
  0xdf   : > { %7226 = vmatmul.mubr.msk.f32.gmra.mrb[78].mxu0 %vm643_vm1, %v270_v36 }
  0xe0   : > { %7562 = vmatmul.mubr.msk.f32.gmra.mrb[78].mxu1 %vm643_vm1, %v494_v37  ;;  %7228 = vmatprep.mubr.msk.f32.mxu0 %vm643_vm1, %v271_v38 }
  0xe1   : > { %7564 = vmatprep.mubr.msk.f32.mxu1 %vm643_vm1, %v495_v39 }
  0xe3   : > { %7229 = vmatmul.mubr.msk.f32.gmra.mrb[80].mxu0 %vm643_vm1, %v272_v40 }
  0xe4   : > { %7565 = vmatmul.mubr.msk.f32.gmra.mrb[80].mxu1 %vm643_vm1, %v496_v41  ;;  %7231 = vmatprep.mubr.msk.f32.mxu0 %vm643_vm1, %v273_v42  ;;  %v300_v42 = vld [vmem:[%s8085_s10 + $0x368] sm:$0xff] }
  0xe5   : > { %7567 = vmatprep.mubr.msk.f32.mxu1 %vm643_vm1, %v497_v43  ;;  %v524_v43 = vld [vmem:[%s8085_s10 + $0xa68] sm:$0xff] }
  0xe7   : > { %7232 = vmatmul.mubr.msk.f32.gmra.mrb[82].mxu0 %vm643_vm1, %v274_v44 }
  0xe8   : > { %7568 = vmatmul.mubr.msk.f32.gmra.mrb[82].mxu1 %vm643_vm1, %v498_v45  ;;  %7234 = vmatprep.mubr.msk.f32.mxu0 %vm643_vm1, %v275_v46  ;;  %v301_v46 = vld [vmem:[%s8085_s10 + $0x370] sm:$0xff] }
  0xe9   : > { %7570 = vmatprep.mubr.msk.f32.mxu1 %vm643_vm1, %v499_v47  ;;  %v525_v47 = vld [vmem:[%s8085_s10 + $0xa70] sm:$0xff] }
  0xeb   : > { %7235 = vmatmul.mubr.msk.f32.gmra.mrb[84].mxu0 %vm643_vm1, %v276_v48 }
  0xec   : > { %7571 = vmatmul.mubr.msk.f32.gmra.mrb[84].mxu1 %vm643_vm1, %v500_v49  ;;  %7237 = vmatprep.mubr.msk.f32.mxu0 %vm643_vm1, %v277_v50 }
  0xed   : > { %7573 = vmatprep.mubr.msk.f32.mxu1 %vm643_vm1, %v501_v51 }
  0xef   : > { %7238 = vmatmul.mubr.msk.f32.gmra.mrb[86].mxu0 %vm643_vm1, %v278_v52 }
  0xf0   : > { %7574 = vmatmul.mubr.msk.f32.gmra.mrb[86].mxu1 %vm643_vm1, %v502_v53  ;;  %7240 = vmatprep.mubr.msk.f32.mxu0 %vm643_vm1, %v279_v54 }
  0xf1   : > { %7576 = vmatprep.mubr.msk.f32.mxu1 %vm643_vm1, %v503_v55 }
  0xf3   : > { %7241 = vmatmul.mubr.msk.f32.gmra.mrb[88].mxu0 %vm643_vm1, %v280_v56 }
  0xf4   : > { %7577 = vmatmul.mubr.msk.f32.gmra.mrb[88].mxu1 %vm643_vm1, %v504_v57  ;;  %7243 = vmatprep.mubr.msk.f32.mxu0 %vm643_vm1, %v281_v58 }
  0xf5   : > { %7579 = vmatprep.mubr.msk.f32.mxu1 %vm643_vm1, %v505_v59 }
  0xf7   : > { %7244 = vmatmul.mubr.msk.f32.gmra.mrb[90].mxu0 %vm643_vm1, %v282_v60 }
  0xf8   : > { %7580 = vmatmul.mubr.msk.f32.gmra.mrb[90].mxu1 %vm643_vm1, %v506_v61  ;;  %7246 = vmatprep.mubr.msk.f32.mxu0 %vm643_vm1, %v283_v62  ;;  %v302_v62 = vld [vmem:[%s8085_s10 + $0x378] sm:$0xff] }
  0xf9   : > { %7582 = vmatprep.mubr.msk.f32.mxu1 %vm643_vm1, %v507_v63  ;;  %v526_v63 = vld [vmem:[%s8085_s10 + $0xa78] sm:$0xff] }
  0xfb   : > { %7247 = vmatmul.mubr.msk.f32.gmra.mrb[92].mxu0 %vm643_vm1, %v284_v0 }
  0xfc   : > { %7583 = vmatmul.mubr.msk.f32.gmra.mrb[92].mxu1 %vm643_vm1, %v508_v1  ;;  %7249 = vmatprep.mubr.msk.f32.mxu0 %vm643_vm1, %v285_v2  ;;  %v303_v2 = vld [vmem:[%s8085_s10 + $0x380] sm:$0xff] }
  0xfd   : > { %7585 = vmatprep.mubr.msk.f32.mxu1 %vm643_vm1, %v509_v3  ;;  %v527_v3 = vld [vmem:[%s8085_s10 + $0xa80] sm:$0xff] }
  0xff   : > { %7250 = vmatmul.mubr.msk.f32.gmra.mrb[94].mxu0 %vm643_vm1, %v286_v4 }
 0x100   : > { %7586 = vmatmul.mubr.msk.f32.gmra.mrb[94].mxu1 %vm643_vm1, %v510_v5  ;;  %7252 = vmatprep.mubr.msk.f32.mxu0 %vm643_vm1, %v287_v6 }
 0x101   : > { %7588 = vmatprep.mubr.msk.f32.mxu1 %vm643_vm1, %v511_v7 }
 0x103   : > { %7253 = vmatmul.mubr.msk.f32.gmra.mrb[96].mxu0 %vm643_vm1, %v288_v8 }
 0x104   : > { %7589 = vmatmul.mubr.msk.f32.gmra.mrb[96].mxu1 %vm643_vm1, %v512_v9  ;;  %7255 = vmatprep.mubr.msk.f32.mxu0 %vm643_vm1, %v289_v10 }
 0x105   : > { %7591 = vmatprep.mubr.msk.f32.mxu1 %vm643_vm1, %v513_v11 }
 0x107   : > { %7256 = vmatmul.mubr.msk.f32.gmra.mrb[98].mxu0 %vm643_vm1, %v290_v12 }
 0x108   : > { %7592 = vmatmul.mubr.msk.f32.gmra.mrb[98].mxu1 %vm643_vm1, %v514_v13  ;;  %7258 = vmatprep.mubr.msk.f32.mxu0 %vm643_vm1, %v291_v14 }
 0x109   : > { %7594 = vmatprep.mubr.msk.f32.mxu1 %vm643_vm1, %v515_v15 }
 0x10b   : > { %7259 = vmatmul.mubr.msk.f32.gmra.mrb[100].mxu0 %vm643_vm1, %v292_v16 }
 0x10c   : > { %7595 = vmatmul.mubr.msk.f32.gmra.mrb[100].mxu1 %vm643_vm1, %v516_v17  ;;  %7261 = vmatprep.mubr.msk.f32.mxu0 %vm643_vm1, %v293_v18  ;;  %v304_v18 = vld [vmem:[%s8085_s10 + $0x388] sm:$0xff] }
 0x10d   : > { %7597 = vmatprep.mubr.msk.f32.mxu1 %vm643_vm1, %v517_v19  ;;  %v528_v19 = vld [vmem:[%s8085_s10 + $0xa88] sm:$0xff] }
 0x10f   : > { %7262 = vmatmul.mubr.msk.f32.gmra.mrb[102].mxu0 %vm643_vm1, %v294_v20 }
 0x110   : > { %7598 = vmatmul.mubr.msk.f32.gmra.mrb[102].mxu1 %vm643_vm1, %v518_v21  ;;  %7264 = vmatprep.mubr.msk.f32.mxu0 %vm643_vm1, %v295_v22  ;;  %v305_v22 = vld [vmem:[%s8085_s10 + $0x390] sm:$0xff] }
 0x111   : > { %7600 = vmatprep.mubr.msk.f32.mxu1 %vm643_vm1, %v519_v23  ;;  %v529_v23 = vld [vmem:[%s8085_s10 + $0xa90] sm:$0xff] }
 0x113   : > { %7265 = vmatmul.mubr.msk.f32.gmra.mrb[104].mxu0 %vm643_vm1, %v296_v24 }
 0x114   : > { %7601 = vmatmul.mubr.msk.f32.gmra.mrb[104].mxu1 %vm643_vm1, %v520_v25  ;;  %7267 = vmatprep.mubr.msk.f32.mxu0 %vm643_vm1, %v297_v26 }
 0x115   : > { %7603 = vmatprep.mubr.msk.f32.mxu1 %vm643_vm1, %v521_v27 }
 0x116   : > { %v7110_v33 = vpop.f32.mrb[0].mxu0 }
 0x117   : > { %v7446_v35 = vpop.f32.mrb[0].mxu1  ;;  %v4303_v36 = vmul.f32 %v7110_v33, %v8532_v28  ;;  %v2058_v38 = vpop.f32.mrb[1].mxu0  ;;  %7268 = vmatmul.mubr.msk.f32.gmra.mrb[106].mxu0 %vm643_vm1, %v298_v29 }
 0x118   : > { %v4527_v37 = vmul.f32 %v7446_v35, %v8532_v28  ;;  %v3178_v39 = vpop.f32.mrb[1].mxu1  ;;  %7604 = vmatmul.mubr.msk.f32.gmra.mrb[106].mxu1 %vm643_vm1, %v522_v30  ;;  %v4302_v40 = vmul.f32 %v8532_v28, %v2058_v38  ;;  %7270 = vmatprep.mubr.msk.f32.mxu0 %vm643_vm1, %v299_v31 }
 0x119   : > { %v4526_v41 = vmul.f32 %v8532_v28, %v3178_v39  ;;  %7606 = vmatprep.mubr.msk.f32.mxu1 %vm643_vm1, %v523_v32  ;;  %v4756_v44 = vadd.f32 %v8543_v34, %v4303_v36 }
 0x11a   : > { %v4980_v45 = vadd.f32 %v8543_v34, %v4527_v37  ;;  %v4755_v48 = vadd.f32 %v8543_v34, %v4302_v40  ;;  %v7113_v50 = vpop.f32.mrb[2].mxu0  ;;  %v306_v40 = vld [vmem:[%s8085_s10 + $0x398] sm:$0xff] }
 0x11b   : > { %v4979_v49 = vadd.f32 %v8543_v34, %v4526_v41  ;;  %v7449_v51 = vpop.f32.mrb[2].mxu1  ;;  %v5204_v52 = vmax.f32 %v4756_v44, 0.0  ;;  %v4305_v54 = vmul.f32 %v7113_v50, %v8532_v28  ;;  %v2068_v56 = vpop.f32.mrb[3].mxu0  ;;  %7271 = vmatmul.mubr.msk.f32.gmra.mrb[108].mxu0 %vm643_vm1, %v300_v42  ;;  %v530_v41 = vld [vmem:[%s8085_s10 + $0xa98] sm:$0xff]  ;;  %v307_v44 = vld [vmem:[%s8085_s10 + $0x3a0] sm:$0xff] }
 0x11c   : > { %v5428_v53 = vmax.f32 %v4980_v45, 0.0  ;;  %v4529_v55 = vmul.f32 %v7449_v51, %v8532_v28  ;;  %v3188_v57 = vpop.f32.mrb[3].mxu1  ;;  %7607 = vmatmul.mubr.msk.f32.gmra.mrb[108].mxu1 %vm643_vm1, %v524_v43  ;;  %v5203_v58 = vmax.f32 %v4755_v48, 0.0  ;;  %v4304_v60 = vmul.f32 %v8532_v28, %v2068_v56  ;;  %7273 = vmatprep.mubr.msk.f32.mxu0 %vm643_vm1, %v301_v46  ;;  %v531_v45 = vld [vmem:[%s8085_s10 + $0xaa0] sm:$0xff] }
 0x11d   : > { %v5427_v59 = vmax.f32 %v4979_v49, 0.0  ;;  %v4528_v61 = vmul.f32 %v8532_v28, %v3188_v57  ;;  %7609 = vmatprep.mubr.msk.f32.mxu1 %vm643_vm1, %v525_v47  ;;  %5653 = vst.msk [vmem:[%s8573_s28 + $0x8] sm:$0xff] %vm5651_vm4, %v5204_v52  ;;  %v4758_v0 = vadd.f32 %v8543_v34, %v4305_v54 }
 0x11e   : > { %5877 = vst.msk [vmem:[%s8573_s28 + $0x708] sm:$0xff] %vm5651_vm4, %v5428_v53  ;;  %v4982_v1 = vadd.f32 %v8543_v34, %v4529_v55  ;;  %5652 = vst.msk [vmem:[%s8573_s28] sm:$0xff] %vm5651_vm4, %v5203_v58  ;;  %v4757_v4 = vadd.f32 %v8543_v34, %v4304_v60  ;;  %v7116_v6 = vpop.f32.mrb[4].mxu0  ;;  %v308_v60 = vld [vmem:[%s8085_s10 + $0x3a8] sm:$0xff] }
 0x11f   : > { %5876 = vst.msk [vmem:[%s8573_s28 + $0x700] sm:$0xff] %vm5651_vm4, %v5427_v59  ;;  %v4981_v5 = vadd.f32 %v8543_v34, %v4528_v61  ;;  %v7452_v7 = vpop.f32.mrb[4].mxu1  ;;  %v5206_v8 = vmax.f32 %v4758_v0, 0.0  ;;  %v4307_v10 = vmul.f32 %v7116_v6, %v8532_v28  ;;  %v2078_v12 = vpop.f32.mrb[5].mxu0  ;;  %7274 = vmatmul.mubr.msk.f32.gmra.mrb[110].mxu0 %vm643_vm1, %v302_v62  ;;  %v532_v61 = vld [vmem:[%s8085_s10 + $0xaa8] sm:$0xff]  ;;  %v309_v0 = vld [vmem:[%s8085_s10 + $0x3b0] sm:$0xff] }
 0x120   : > { %v5430_v9 = vmax.f32 %v4982_v1, 0.0  ;;  %v4531_v11 = vmul.f32 %v7452_v7, %v8532_v28  ;;  %v3198_v13 = vpop.f32.mrb[5].mxu1  ;;  %7610 = vmatmul.mubr.msk.f32.gmra.mrb[110].mxu1 %vm643_vm1, %v526_v63  ;;  %v5205_v14 = vmax.f32 %v4757_v4, 0.0  ;;  %v4306_v16 = vmul.f32 %v8532_v28, %v2078_v12  ;;  %7276 = vmatprep.mubr.msk.f32.mxu0 %vm643_vm1, %v303_v2  ;;  %v533_v1 = vld [vmem:[%s8085_s10 + $0xab0] sm:$0xff] }
 0x121   : > { %v5429_v15 = vmax.f32 %v4981_v5, 0.0  ;;  %v4530_v17 = vmul.f32 %v8532_v28, %v3198_v13  ;;  %7612 = vmatprep.mubr.msk.f32.mxu1 %vm643_vm1, %v527_v3  ;;  %5655 = vst.msk [vmem:[%s8573_s28 + $0x18] sm:$0xff] %vm5651_vm4, %v5206_v8  ;;  %v4760_v20 = vadd.f32 %v8543_v34, %v4307_v10 }
 0x122   : > { %5879 = vst.msk [vmem:[%s8573_s28 + $0x718] sm:$0xff] %vm5651_vm4, %v5430_v9  ;;  %v4984_v21 = vadd.f32 %v8543_v34, %v4531_v11  ;;  %5654 = vst.msk [vmem:[%s8573_s28 + $0x10] sm:$0xff] %vm5651_vm4, %v5205_v14  ;;  %v4759_v24 = vadd.f32 %v8543_v34, %v4306_v16  ;;  %v7119_v26 = vpop.f32.mrb[6].mxu0  ;;  %v310_v16 = vld [vmem:[%s8085_s10 + $0x3b8] sm:$0xff] }
 0x123   : > { %5878 = vst.msk [vmem:[%s8573_s28 + $0x710] sm:$0xff] %vm5651_vm4, %v5429_v15  ;;  %v4983_v25 = vadd.f32 %v8543_v34, %v4530_v17  ;;  %v7455_v27 = vpop.f32.mrb[6].mxu1  ;;  %v5208_v29 = vmax.f32 %v4760_v20, 0.0  ;;  %v4309_v31 = vmul.f32 %v7119_v26, %v8532_v28  ;;  %v2088_v33 = vpop.f32.mrb[7].mxu0  ;;  %7277 = vmatmul.mubr.msk.f32.gmra.mrb[112].mxu0 %vm643_vm1, %v304_v18  ;;  %v534_v17 = vld [vmem:[%s8085_s10 + $0xab8] sm:$0xff]  ;;  %v311_v20 = vld [vmem:[%s8085_s10 + $0x3c0] sm:$0xff] }
 0x124   : > { %v5432_v30 = vmax.f32 %v4984_v21, 0.0  ;;  %v4533_v32 = vmul.f32 %v7455_v27, %v8532_v28  ;;  %v3208_v35 = vpop.f32.mrb[7].mxu1  ;;  %7613 = vmatmul.mubr.msk.f32.gmra.mrb[112].mxu1 %vm643_vm1, %v528_v19  ;;  %v5207_v36 = vmax.f32 %v4759_v24, 0.0  ;;  %v4308_v38 = vmul.f32 %v8532_v28, %v2088_v33  ;;  %7279 = vmatprep.mubr.msk.f32.mxu0 %vm643_vm1, %v305_v22  ;;  %v535_v21 = vld [vmem:[%s8085_s10 + $0xac0] sm:$0xff] }
 0x125   : > { %v5431_v37 = vmax.f32 %v4983_v25, 0.0  ;;  %v4532_v39 = vmul.f32 %v8532_v28, %v3208_v35  ;;  %7615 = vmatprep.mubr.msk.f32.mxu1 %vm643_vm1, %v529_v23  ;;  %5657 = vst.msk [vmem:[%s8573_s28 + $0x28] sm:$0xff] %vm5651_vm4, %v5208_v29  ;;  %v4762_v42 = vadd.f32 %v8543_v34, %v4309_v31 }
 0x126   : > { %5881 = vst.msk [vmem:[%s8573_s28 + $0x728] sm:$0xff] %vm5651_vm4, %v5432_v30  ;;  %v4986_v43 = vadd.f32 %v8543_v34, %v4533_v32  ;;  %5656 = vst.msk [vmem:[%s8573_s28 + $0x20] sm:$0xff] %vm5651_vm4, %v5207_v36  ;;  %v4761_v46 = vadd.f32 %v8543_v34, %v4308_v38  ;;  %v7122_v48 = vpop.f32.mrb[8].mxu0  ;;  %v312_v38 = vld [vmem:[%s8085_s10 + $0x3c8] sm:$0xff] }
 0x127   : > { %5880 = vst.msk [vmem:[%s8573_s28 + $0x720] sm:$0xff] %vm5651_vm4, %v5431_v37  ;;  %v4985_v47 = vadd.f32 %v8543_v34, %v4532_v39  ;;  %v7458_v49 = vpop.f32.mrb[8].mxu1  ;;  %v5210_v50 = vmax.f32 %v4762_v42, 0.0  ;;  %v4311_v52 = vmul.f32 %v7122_v48, %v8532_v28  ;;  %v2098_v54 = vpop.f32.mrb[9].mxu0  ;;  %7280 = vmatmul.mubr.msk.f32.gmra.mrb[114].mxu0 %vm643_vm1, %v306_v40  ;;  %v536_v39 = vld [vmem:[%s8085_s10 + $0xac8] sm:$0xff]  ;;  %v313_v42 = vld [vmem:[%s8085_s10 + $0x3d0] sm:$0xff] }
 0x128   : > { %v5434_v51 = vmax.f32 %v4986_v43, 0.0  ;;  %v4535_v53 = vmul.f32 %v7458_v49, %v8532_v28  ;;  %v3218_v55 = vpop.f32.mrb[9].mxu1  ;;  %7616 = vmatmul.mubr.msk.f32.gmra.mrb[114].mxu1 %vm643_vm1, %v530_v41  ;;  %v5209_v56 = vmax.f32 %v4761_v46, 0.0  ;;  %v4310_v58 = vmul.f32 %v8532_v28, %v2098_v54  ;;  %7282 = vmatprep.mubr.msk.f32.mxu0 %vm643_vm1, %v307_v44  ;;  %v537_v43 = vld [vmem:[%s8085_s10 + $0xad0] sm:$0xff] }
 0x129   : > { %v5433_v57 = vmax.f32 %v4985_v47, 0.0  ;;  %v4534_v59 = vmul.f32 %v8532_v28, %v3218_v55  ;;  %7618 = vmatprep.mubr.msk.f32.mxu1 %vm643_vm1, %v531_v45  ;;  %5659 = vst.msk [vmem:[%s8573_s28 + $0x38] sm:$0xff] %vm5651_vm4, %v5210_v50  ;;  %v4764_v62 = vadd.f32 %v8543_v34, %v4311_v52 }
 0x12a   : > { %5883 = vst.msk [vmem:[%s8573_s28 + $0x738] sm:$0xff] %vm5651_vm4, %v5434_v51  ;;  %v4988_v63 = vadd.f32 %v8543_v34, %v4535_v53  ;;  %5658 = vst.msk [vmem:[%s8573_s28 + $0x30] sm:$0xff] %vm5651_vm4, %v5209_v56  ;;  %v4763_v2 = vadd.f32 %v8543_v34, %v4310_v58  ;;  %v7125_v4 = vpop.f32.mrb[10].mxu0  ;;  %v314_v58 = vld [vmem:[%s8085_s10 + $0x3d8] sm:$0xff] }
 0x12b   : > { %5882 = vst.msk [vmem:[%s8573_s28 + $0x730] sm:$0xff] %vm5651_vm4, %v5433_v57  ;;  %v4987_v3 = vadd.f32 %v8543_v34, %v4534_v59  ;;  %v7461_v5 = vpop.f32.mrb[10].mxu1  ;;  %v5212_v6 = vmax.f32 %v4764_v62, 0.0  ;;  %v4313_v8 = vmul.f32 %v7125_v4, %v8532_v28  ;;  %v2108_v10 = vpop.f32.mrb[11].mxu0  ;;  %7283 = vmatmul.mubr.msk.f32.gmra.mrb[116].mxu0 %vm643_vm1, %v308_v60  ;;  %v538_v59 = vld [vmem:[%s8085_s10 + $0xad8] sm:$0xff]  ;;  %v315_v62 = vld [vmem:[%s8085_s10 + $0x3e0] sm:$0xff] }
 0x12c   : > { %v5436_v7 = vmax.f32 %v4988_v63, 0.0  ;;  %v4537_v9 = vmul.f32 %v7461_v5, %v8532_v28  ;;  %v3228_v11 = vpop.f32.mrb[11].mxu1  ;;  %7619 = vmatmul.mubr.msk.f32.gmra.mrb[116].mxu1 %vm643_vm1, %v532_v61  ;;  %v5211_v12 = vmax.f32 %v4763_v2, 0.0  ;;  %v4312_v14 = vmul.f32 %v8532_v28, %v2108_v10  ;;  %7285 = vmatprep.mubr.msk.f32.mxu0 %vm643_vm1, %v309_v0  ;;  %v539_v63 = vld [vmem:[%s8085_s10 + $0xae0] sm:$0xff] }
 0x12d   : > { %v5435_v13 = vmax.f32 %v4987_v3, 0.0  ;;  %v4536_v15 = vmul.f32 %v8532_v28, %v3228_v11  ;;  %7621 = vmatprep.mubr.msk.f32.mxu1 %vm643_vm1, %v533_v1  ;;  %5661 = vst.msk [vmem:[%s8573_s28 + $0x48] sm:$0xff] %vm5651_vm4, %v5212_v6  ;;  %v4766_v18 = vadd.f32 %v8543_v34, %v4313_v8 }
 0x12e   : > { %5885 = vst.msk [vmem:[%s8573_s28 + $0x748] sm:$0xff] %vm5651_vm4, %v5436_v7  ;;  %v4990_v19 = vadd.f32 %v8543_v34, %v4537_v9  ;;  %5660 = vst.msk [vmem:[%s8573_s28 + $0x40] sm:$0xff] %vm5651_vm4, %v5211_v12  ;;  %v4765_v22 = vadd.f32 %v8543_v34, %v4312_v14  ;;  %v7128_v24 = vpop.f32.mrb[12].mxu0  ;;  %v316_v14 = vld [vmem:[%s8085_s10 + $0x3e8] sm:$0xff] }
 0x12f   : > { %5884 = vst.msk [vmem:[%s8573_s28 + $0x740] sm:$0xff] %vm5651_vm4, %v5435_v13  ;;  %v4989_v23 = vadd.f32 %v8543_v34, %v4536_v15  ;;  %v7464_v25 = vpop.f32.mrb[12].mxu1  ;;  %v5214_v26 = vmax.f32 %v4766_v18, 0.0  ;;  %v4315_v29 = vmul.f32 %v7128_v24, %v8532_v28  ;;  %v2118_v31 = vpop.f32.mrb[13].mxu0  ;;  %7286 = vmatmul.mubr.msk.f32.gmra.mrb[118].mxu0 %vm643_vm1, %v310_v16  ;;  %v540_v15 = vld [vmem:[%s8085_s10 + $0xae8] sm:$0xff]  ;;  %v317_v18 = vld [vmem:[%s8085_s10 + $0x3f0] sm:$0xff] }
 0x130   : > { %v5438_v27 = vmax.f32 %v4990_v19, 0.0  ;;  %v4539_v30 = vmul.f32 %v7464_v25, %v8532_v28  ;;  %v3238_v32 = vpop.f32.mrb[13].mxu1  ;;  %7622 = vmatmul.mubr.msk.f32.gmra.mrb[118].mxu1 %vm643_vm1, %v534_v17  ;;  %v5213_v33 = vmax.f32 %v4765_v22, 0.0  ;;  %v4314_v36 = vmul.f32 %v8532_v28, %v2118_v31  ;;  %7288 = vmatprep.mubr.msk.f32.mxu0 %vm643_vm1, %v311_v20  ;;  %v541_v19 = vld [vmem:[%s8085_s10 + $0xaf0] sm:$0xff] }
 0x131   : > { %v5437_v35 = vmax.f32 %v4989_v23, 0.0  ;;  %v4538_v37 = vmul.f32 %v8532_v28, %v3238_v32  ;;  %7624 = vmatprep.mubr.msk.f32.mxu1 %vm643_vm1, %v535_v21  ;;  %5663 = vst.msk [vmem:[%s8573_s28 + $0x58] sm:$0xff] %vm5651_vm4, %v5214_v26  ;;  %v4768_v40 = vadd.f32 %v8543_v34, %v4315_v29 }
 0x132   : > { %5887 = vst.msk [vmem:[%s8573_s28 + $0x758] sm:$0xff] %vm5651_vm4, %v5438_v27  ;;  %v4992_v41 = vadd.f32 %v8543_v34, %v4539_v30  ;;  %5662 = vst.msk [vmem:[%s8573_s28 + $0x50] sm:$0xff] %vm5651_vm4, %v5213_v33  ;;  %v4767_v44 = vadd.f32 %v8543_v34, %v4314_v36  ;;  %v7131_v46 = vpop.f32.mrb[14].mxu0  ;;  %v318_v36 = vld [vmem:[%s8085_s10 + $0x3f8] sm:$0xff] }
 0x133   : > { %5886 = vst.msk [vmem:[%s8573_s28 + $0x750] sm:$0xff] %vm5651_vm4, %v5437_v35  ;;  %v4991_v45 = vadd.f32 %v8543_v34, %v4538_v37  ;;  %v7467_v47 = vpop.f32.mrb[14].mxu1  ;;  %v5216_v48 = vmax.f32 %v4768_v40, 0.0  ;;  %v4317_v50 = vmul.f32 %v7131_v46, %v8532_v28  ;;  %v2128_v52 = vpop.f32.mrb[15].mxu0  ;;  %7289 = vmatmul.mubr.msk.f32.gmra.mrb[120].mxu0 %vm643_vm1, %v312_v38  ;;  %v542_v37 = vld [vmem:[%s8085_s10 + $0xaf8] sm:$0xff]  ;;  %v319_v40 = vld [vmem:[%s8085_s10 + $0x400] sm:$0xff] }
 0x134   : > { %v5440_v49 = vmax.f32 %v4992_v41, 0.0  ;;  %v4541_v51 = vmul.f32 %v7467_v47, %v8532_v28  ;;  %v3248_v53 = vpop.f32.mrb[15].mxu1  ;;  %7625 = vmatmul.mubr.msk.f32.gmra.mrb[120].mxu1 %vm643_vm1, %v536_v39  ;;  %v5215_v54 = vmax.f32 %v4767_v44, 0.0  ;;  %v4316_v56 = vmul.f32 %v8532_v28, %v2128_v52  ;;  %7291 = vmatprep.mubr.msk.f32.mxu0 %vm643_vm1, %v313_v42  ;;  %v543_v41 = vld [vmem:[%s8085_s10 + $0xb00] sm:$0xff] }
 0x135   : > { %v5439_v55 = vmax.f32 %v4991_v45, 0.0  ;;  %v4540_v57 = vmul.f32 %v8532_v28, %v3248_v53  ;;  %7627 = vmatprep.mubr.msk.f32.mxu1 %vm643_vm1, %v537_v43  ;;  %5665 = vst.msk [vmem:[%s8573_s28 + $0x68] sm:$0xff] %vm5651_vm4, %v5216_v48  ;;  %v4770_v60 = vadd.f32 %v8543_v34, %v4317_v50 }
 0x136   : > { %5889 = vst.msk [vmem:[%s8573_s28 + $0x768] sm:$0xff] %vm5651_vm4, %v5440_v49  ;;  %v4994_v61 = vadd.f32 %v8543_v34, %v4541_v51  ;;  %5664 = vst.msk [vmem:[%s8573_s28 + $0x60] sm:$0xff] %vm5651_vm4, %v5215_v54  ;;  %v4769_v0 = vadd.f32 %v8543_v34, %v4316_v56  ;;  %v7134_v2 = vpop.f32.mrb[16].mxu0  ;;  %v320_v56 = vld [vmem:[%s8085_s10 + $0x408] sm:$0xff] }
 0x137   : > { %5888 = vst.msk [vmem:[%s8573_s28 + $0x760] sm:$0xff] %vm5651_vm4, %v5439_v55  ;;  %v4993_v1 = vadd.f32 %v8543_v34, %v4540_v57  ;;  %v7470_v3 = vpop.f32.mrb[16].mxu1  ;;  %v5218_v4 = vmax.f32 %v4770_v60, 0.0  ;;  %v4319_v6 = vmul.f32 %v7134_v2, %v8532_v28  ;;  %v2138_v8 = vpop.f32.mrb[17].mxu0  ;;  %7292 = vmatmul.mubr.msk.f32.gmra.mrb[122].mxu0 %vm643_vm1, %v314_v58  ;;  %v544_v57 = vld [vmem:[%s8085_s10 + $0xb08] sm:$0xff]  ;;  %v321_v60 = vld [vmem:[%s8085_s10 + $0x410] sm:$0xff] }
 0x138   : > { %v5442_v5 = vmax.f32 %v4994_v61, 0.0  ;;  %v4543_v7 = vmul.f32 %v7470_v3, %v8532_v28  ;;  %v3258_v9 = vpop.f32.mrb[17].mxu1  ;;  %7628 = vmatmul.mubr.msk.f32.gmra.mrb[122].mxu1 %vm643_vm1, %v538_v59  ;;  %v5217_v10 = vmax.f32 %v4769_v0, 0.0  ;;  %v4318_v12 = vmul.f32 %v8532_v28, %v2138_v8  ;;  %7294 = vmatprep.mubr.msk.f32.mxu0 %vm643_vm1, %v315_v62  ;;  %v545_v61 = vld [vmem:[%s8085_s10 + $0xb10] sm:$0xff] }
 0x139   : > { %v5441_v11 = vmax.f32 %v4993_v1, 0.0  ;;  %v4542_v13 = vmul.f32 %v8532_v28, %v3258_v9  ;;  %7630 = vmatprep.mubr.msk.f32.mxu1 %vm643_vm1, %v539_v63  ;;  %5667 = vst.msk [vmem:[%s8573_s28 + $0x78] sm:$0xff] %vm5651_vm4, %v5218_v4  ;;  %v4772_v16 = vadd.f32 %v8543_v34, %v4319_v6 }
 0x13a   : > { %5891 = vst.msk [vmem:[%s8573_s28 + $0x778] sm:$0xff] %vm5651_vm4, %v5442_v5  ;;  %v4996_v17 = vadd.f32 %v8543_v34, %v4543_v7  ;;  %5666 = vst.msk [vmem:[%s8573_s28 + $0x70] sm:$0xff] %vm5651_vm4, %v5217_v10  ;;  %v4771_v20 = vadd.f32 %v8543_v34, %v4318_v12  ;;  %v7137_v22 = vpop.f32.mrb[18].mxu0  ;;  %v322_v12 = vld [vmem:[%s8085_s10 + $0x418] sm:$0xff] }
 0x13b   : > { %5890 = vst.msk [vmem:[%s8573_s28 + $0x770] sm:$0xff] %vm5651_vm4, %v5441_v11  ;;  %v4995_v21 = vadd.f32 %v8543_v34, %v4542_v13  ;;  %v7473_v23 = vpop.f32.mrb[18].mxu1  ;;  %v5220_v24 = vmax.f32 %v4772_v16, 0.0  ;;  %v4321_v26 = vmul.f32 %v7137_v22, %v8532_v28  ;;  %v2148_v29 = vpop.f32.mrb[19].mxu0  ;;  %7295 = vmatmul.mubr.msk.f32.gmra.mrb[124].mxu0 %vm643_vm1, %v316_v14  ;;  %v546_v13 = vld [vmem:[%s8085_s10 + $0xb18] sm:$0xff]  ;;  %v323_v16 = vld [vmem:[%s8085_s10 + $0x420] sm:$0xff] }
 0x13c   : > { %v5444_v25 = vmax.f32 %v4996_v17, 0.0  ;;  %v4545_v27 = vmul.f32 %v7473_v23, %v8532_v28  ;;  %v3268_v30 = vpop.f32.mrb[19].mxu1  ;;  %7631 = vmatmul.mubr.msk.f32.gmra.mrb[124].mxu1 %vm643_vm1, %v540_v15  ;;  %v5219_v31 = vmax.f32 %v4771_v20, 0.0  ;;  %v4320_v33 = vmul.f32 %v8532_v28, %v2148_v29  ;;  %7297 = vmatprep.mubr.msk.f32.mxu0 %vm643_vm1, %v317_v18  ;;  %v547_v17 = vld [vmem:[%s8085_s10 + $0xb20] sm:$0xff] }
 0x13d   : > { %v5443_v32 = vmax.f32 %v4995_v21, 0.0  ;;  %v4544_v35 = vmul.f32 %v8532_v28, %v3268_v30  ;;  %7633 = vmatprep.mubr.msk.f32.mxu1 %vm643_vm1, %v541_v19  ;;  %5669 = vst.msk [vmem:[%s8573_s28 + $0x88] sm:$0xff] %vm5651_vm4, %v5220_v24  ;;  %v4774_v38 = vadd.f32 %v8543_v34, %v4321_v26 }
 0x13e   : > { %5893 = vst.msk [vmem:[%s8573_s28 + $0x788] sm:$0xff] %vm5651_vm4, %v5444_v25  ;;  %v4998_v39 = vadd.f32 %v8543_v34, %v4545_v27  ;;  %5668 = vst.msk [vmem:[%s8573_s28 + $0x80] sm:$0xff] %vm5651_vm4, %v5219_v31  ;;  %v4773_v42 = vadd.f32 %v8543_v34, %v4320_v33  ;;  %v7140_v44 = vpop.f32.mrb[20].mxu0  ;;  %v324_v33 = vld [vmem:[%s8085_s10 + $0x428] sm:$0xff] }
 0x13f   : > { %5892 = vst.msk [vmem:[%s8573_s28 + $0x780] sm:$0xff] %vm5651_vm4, %v5443_v32  ;;  %v4997_v43 = vadd.f32 %v8543_v34, %v4544_v35  ;;  %v7476_v45 = vpop.f32.mrb[20].mxu1  ;;  %v5222_v46 = vmax.f32 %v4774_v38, 0.0  ;;  %v4323_v48 = vmul.f32 %v7140_v44, %v8532_v28  ;;  %v2158_v50 = vpop.f32.mrb[21].mxu0  ;;  %7298 = vmatmul.mubr.msk.f32.gmra.mrb[126].mxu0 %vm643_vm1, %v318_v36  ;;  %v548_v35 = vld [vmem:[%s8085_s10 + $0xb28] sm:$0xff]  ;;  %v325_v38 = vld [vmem:[%s8085_s10 + $0x430] sm:$0xff] }
 0x140   : > { %v5446_v47 = vmax.f32 %v4998_v39, 0.0  ;;  %v4547_v49 = vmul.f32 %v7476_v45, %v8532_v28  ;;  %v3278_v51 = vpop.f32.mrb[21].mxu1  ;;  %7634 = vmatmul.mubr.msk.f32.gmra.mrb[126].mxu1 %vm643_vm1, %v542_v37  ;;  %v5221_v52 = vmax.f32 %v4773_v42, 0.0  ;;  %v4322_v54 = vmul.f32 %v8532_v28, %v2158_v50  ;;  %7300 = vmatprep.mubr.msk.f32.mxu0 %vm643_vm1, %v319_v40  ;;  %v549_v39 = vld [vmem:[%s8085_s10 + $0xb30] sm:$0xff] }
 0x141   : > { %v5445_v53 = vmax.f32 %v4997_v43, 0.0  ;;  %v4546_v55 = vmul.f32 %v8532_v28, %v3278_v51  ;;  %7636 = vmatprep.mubr.msk.f32.mxu1 %vm643_vm1, %v543_v41  ;;  %5671 = vst.msk [vmem:[%s8573_s28 + $0x98] sm:$0xff] %vm5651_vm4, %v5222_v46  ;;  %v4776_v58 = vadd.f32 %v8543_v34, %v4323_v48 }
 0x142   : > { %5895 = vst.msk [vmem:[%s8573_s28 + $0x798] sm:$0xff] %vm5651_vm4, %v5446_v47  ;;  %v5000_v59 = vadd.f32 %v8543_v34, %v4547_v49  ;;  %5670 = vst.msk [vmem:[%s8573_s28 + $0x90] sm:$0xff] %vm5651_vm4, %v5221_v52  ;;  %v4775_v62 = vadd.f32 %v8543_v34, %v4322_v54  ;;  %v7143_v0 = vpop.f32.mrb[22].mxu0  ;;  %v326_v54 = vld [vmem:[%s8085_s10 + $0x438] sm:$0xff] }
 0x143   : > { %5894 = vst.msk [vmem:[%s8573_s28 + $0x790] sm:$0xff] %vm5651_vm4, %v5445_v53  ;;  %v4999_v63 = vadd.f32 %v8543_v34, %v4546_v55  ;;  %v7479_v1 = vpop.f32.mrb[22].mxu1  ;;  %v5224_v2 = vmax.f32 %v4776_v58, 0.0  ;;  %v4325_v4 = vmul.f32 %v7143_v0, %v8532_v28  ;;  %v2168_v6 = vpop.f32.mrb[23].mxu0  ;;  %7301 = vmatmul.mubr.msk.f32.gmra.mrb[128].mxu0 %vm643_vm1, %v320_v56  ;;  %v550_v55 = vld [vmem:[%s8085_s10 + $0xb38] sm:$0xff]  ;;  %v327_v58 = vld [vmem:[%s8085_s10 + $0x440] sm:$0xff] }
 0x144   : > { %v5448_v3 = vmax.f32 %v5000_v59, 0.0  ;;  %v4549_v5 = vmul.f32 %v7479_v1, %v8532_v28  ;;  %v3288_v7 = vpop.f32.mrb[23].mxu1  ;;  %7637 = vmatmul.mubr.msk.f32.gmra.mrb[128].mxu1 %vm643_vm1, %v544_v57  ;;  %v5223_v8 = vmax.f32 %v4775_v62, 0.0  ;;  %v4324_v10 = vmul.f32 %v8532_v28, %v2168_v6  ;;  %7303 = vmatprep.mubr.msk.f32.mxu0 %vm643_vm1, %v321_v60  ;;  %v551_v59 = vld [vmem:[%s8085_s10 + $0xb40] sm:$0xff] }
 0x145   : > { %v5447_v9 = vmax.f32 %v4999_v63, 0.0  ;;  %v4548_v11 = vmul.f32 %v8532_v28, %v3288_v7  ;;  %7639 = vmatprep.mubr.msk.f32.mxu1 %vm643_vm1, %v545_v61  ;;  %5673 = vst.msk [vmem:[%s8573_s28 + $0xa8] sm:$0xff] %vm5651_vm4, %v5224_v2  ;;  %v4778_v14 = vadd.f32 %v8543_v34, %v4325_v4 }
 0x146   : > { %5897 = vst.msk [vmem:[%s8573_s28 + $0x7a8] sm:$0xff] %vm5651_vm4, %v5448_v3  ;;  %v5002_v15 = vadd.f32 %v8543_v34, %v4549_v5  ;;  %5672 = vst.msk [vmem:[%s8573_s28 + $0xa0] sm:$0xff] %vm5651_vm4, %v5223_v8  ;;  %v4777_v18 = vadd.f32 %v8543_v34, %v4324_v10  ;;  %v7146_v20 = vpop.f32.mrb[24].mxu0  ;;  %v328_v10 = vld [vmem:[%s8085_s10 + $0x448] sm:$0xff] }
 0x147   : > { %5896 = vst.msk [vmem:[%s8573_s28 + $0x7a0] sm:$0xff] %vm5651_vm4, %v5447_v9  ;;  %v5001_v19 = vadd.f32 %v8543_v34, %v4548_v11  ;;  %v7482_v21 = vpop.f32.mrb[24].mxu1  ;;  %v5226_v22 = vmax.f32 %v4778_v14, 0.0  ;;  %v4327_v24 = vmul.f32 %v7146_v20, %v8532_v28  ;;  %v2178_v26 = vpop.f32.mrb[25].mxu0  ;;  %7304 = vmatmul.mubr.msk.f32.gmra.mrb[130].mxu0 %vm643_vm1, %v322_v12  ;;  %v552_v11 = vld [vmem:[%s8085_s10 + $0xb48] sm:$0xff]  ;;  %v329_v14 = vld [vmem:[%s8085_s10 + $0x450] sm:$0xff] }
 0x148   : > { %v5450_v23 = vmax.f32 %v5002_v15, 0.0  ;;  %v4551_v25 = vmul.f32 %v7482_v21, %v8532_v28  ;;  %v3298_v27 = vpop.f32.mrb[25].mxu1  ;;  %7640 = vmatmul.mubr.msk.f32.gmra.mrb[130].mxu1 %vm643_vm1, %v546_v13  ;;  %v5225_v29 = vmax.f32 %v4777_v18, 0.0  ;;  %v4326_v31 = vmul.f32 %v8532_v28, %v2178_v26  ;;  %7306 = vmatprep.mubr.msk.f32.mxu0 %vm643_vm1, %v323_v16  ;;  %v553_v15 = vld [vmem:[%s8085_s10 + $0xb50] sm:$0xff] }
 0x149   : > { %v5449_v30 = vmax.f32 %v5001_v19, 0.0  ;;  %v4550_v32 = vmul.f32 %v8532_v28, %v3298_v27  ;;  %7642 = vmatprep.mubr.msk.f32.mxu1 %vm643_vm1, %v547_v17  ;;  %5675 = vst.msk [vmem:[%s8573_s28 + $0xb8] sm:$0xff] %vm5651_vm4, %v5226_v22  ;;  %v4780_v36 = vadd.f32 %v8543_v34, %v4327_v24 }
 0x14a   : > { %5899 = vst.msk [vmem:[%s8573_s28 + $0x7b8] sm:$0xff] %vm5651_vm4, %v5450_v23  ;;  %v5004_v37 = vadd.f32 %v8543_v34, %v4551_v25  ;;  %5674 = vst.msk [vmem:[%s8573_s28 + $0xb0] sm:$0xff] %vm5651_vm4, %v5225_v29  ;;  %v4779_v40 = vadd.f32 %v8543_v34, %v4326_v31  ;;  %v7149_v42 = vpop.f32.mrb[26].mxu0  ;;  %v330_v31 = vld [vmem:[%s8085_s10 + $0x458] sm:$0xff] }
 0x14b   : > { %5898 = vst.msk [vmem:[%s8573_s28 + $0x7b0] sm:$0xff] %vm5651_vm4, %v5449_v30  ;;  %v5003_v41 = vadd.f32 %v8543_v34, %v4550_v32  ;;  %v7485_v43 = vpop.f32.mrb[26].mxu1  ;;  %v5228_v44 = vmax.f32 %v4780_v36, 0.0  ;;  %v4329_v46 = vmul.f32 %v7149_v42, %v8532_v28  ;;  %v2188_v48 = vpop.f32.mrb[27].mxu0  ;;  %7307 = vmatmul.mubr.msk.f32.gmra.mrb[132].mxu0 %vm643_vm1, %v324_v33  ;;  %v554_v32 = vld [vmem:[%s8085_s10 + $0xb58] sm:$0xff]  ;;  %v331_v36 = vld [vmem:[%s8085_s10 + $0x460] sm:$0xff] }
 0x14c   : > { %v5452_v45 = vmax.f32 %v5004_v37, 0.0  ;;  %v4553_v47 = vmul.f32 %v7485_v43, %v8532_v28  ;;  %v3308_v49 = vpop.f32.mrb[27].mxu1  ;;  %7643 = vmatmul.mubr.msk.f32.gmra.mrb[132].mxu1 %vm643_vm1, %v548_v35  ;;  %v5227_v50 = vmax.f32 %v4779_v40, 0.0  ;;  %v4328_v52 = vmul.f32 %v8532_v28, %v2188_v48  ;;  %7309 = vmatprep.mubr.msk.f32.mxu0 %vm643_vm1, %v325_v38  ;;  %v555_v37 = vld [vmem:[%s8085_s10 + $0xb60] sm:$0xff] }
 0x14d   : > { %v5451_v51 = vmax.f32 %v5003_v41, 0.0  ;;  %v4552_v53 = vmul.f32 %v8532_v28, %v3308_v49  ;;  %7645 = vmatprep.mubr.msk.f32.mxu1 %vm643_vm1, %v549_v39  ;;  %5677 = vst.msk [vmem:[%s8573_s28 + $0xc8] sm:$0xff] %vm5651_vm4, %v5228_v44  ;;  %v4782_v56 = vadd.f32 %v8543_v34, %v4329_v46 }
 0x14e   : > { %5901 = vst.msk [vmem:[%s8573_s28 + $0x7c8] sm:$0xff] %vm5651_vm4, %v5452_v45  ;;  %v5006_v57 = vadd.f32 %v8543_v34, %v4553_v47  ;;  %5676 = vst.msk [vmem:[%s8573_s28 + $0xc0] sm:$0xff] %vm5651_vm4, %v5227_v50  ;;  %v4781_v60 = vadd.f32 %v8543_v34, %v4328_v52  ;;  %v7152_v62 = vpop.f32.mrb[28].mxu0  ;;  %v332_v52 = vld [vmem:[%s8085_s10 + $0x468] sm:$0xff] }
 0x14f   : > { %5900 = vst.msk [vmem:[%s8573_s28 + $0x7c0] sm:$0xff] %vm5651_vm4, %v5451_v51  ;;  %v5005_v61 = vadd.f32 %v8543_v34, %v4552_v53  ;;  %v7488_v63 = vpop.f32.mrb[28].mxu1  ;;  %v5230_v0 = vmax.f32 %v4782_v56, 0.0  ;;  %v4331_v2 = vmul.f32 %v7152_v62, %v8532_v28  ;;  %v2198_v4 = vpop.f32.mrb[29].mxu0  ;;  %7310 = vmatmul.mubr.msk.f32.gmra.mrb[134].mxu0 %vm643_vm1, %v326_v54  ;;  %v556_v53 = vld [vmem:[%s8085_s10 + $0xb68] sm:$0xff]  ;;  %v333_v56 = vld [vmem:[%s8085_s10 + $0x470] sm:$0xff] }
 0x150   : > { %v5454_v1 = vmax.f32 %v5006_v57, 0.0  ;;  %v4555_v3 = vmul.f32 %v7488_v63, %v8532_v28  ;;  %v3318_v5 = vpop.f32.mrb[29].mxu1  ;;  %7646 = vmatmul.mubr.msk.f32.gmra.mrb[134].mxu1 %vm643_vm1, %v550_v55  ;;  %v5229_v6 = vmax.f32 %v4781_v60, 0.0  ;;  %v4330_v8 = vmul.f32 %v8532_v28, %v2198_v4  ;;  %7312 = vmatprep.mubr.msk.f32.mxu0 %vm643_vm1, %v327_v58  ;;  %v557_v57 = vld [vmem:[%s8085_s10 + $0xb70] sm:$0xff] }
 0x151   : > { %v5453_v7 = vmax.f32 %v5005_v61, 0.0  ;;  %v4554_v9 = vmul.f32 %v8532_v28, %v3318_v5  ;;  %7648 = vmatprep.mubr.msk.f32.mxu1 %vm643_vm1, %v551_v59  ;;  %5679 = vst.msk [vmem:[%s8573_s28 + $0xd8] sm:$0xff] %vm5651_vm4, %v5230_v0  ;;  %v4784_v12 = vadd.f32 %v8543_v34, %v4331_v2 }
 0x152   : > { %5903 = vst.msk [vmem:[%s8573_s28 + $0x7d8] sm:$0xff] %vm5651_vm4, %v5454_v1  ;;  %v5008_v13 = vadd.f32 %v8543_v34, %v4555_v3  ;;  %5678 = vst.msk [vmem:[%s8573_s28 + $0xd0] sm:$0xff] %vm5651_vm4, %v5229_v6  ;;  %v4783_v16 = vadd.f32 %v8543_v34, %v4330_v8  ;;  %v7155_v18 = vpop.f32.mrb[30].mxu0  ;;  %v334_v8 = vld [vmem:[%s8085_s10 + $0x478] sm:$0xff] }
 0x153   : > { %5902 = vst.msk [vmem:[%s8573_s28 + $0x7d0] sm:$0xff] %vm5651_vm4, %v5453_v7  ;;  %v5007_v17 = vadd.f32 %v8543_v34, %v4554_v9  ;;  %v7491_v19 = vpop.f32.mrb[30].mxu1  ;;  %v5232_v20 = vmax.f32 %v4784_v12, 0.0  ;;  %v4333_v22 = vmul.f32 %v7155_v18, %v8532_v28  ;;  %v2208_v24 = vpop.f32.mrb[31].mxu0  ;;  %7313 = vmatmul.mubr.msk.f32.gmra.mrb[136].mxu0 %vm643_vm1, %v328_v10  ;;  %v558_v9 = vld [vmem:[%s8085_s10 + $0xb78] sm:$0xff]  ;;  %v335_v12 = vld [vmem:[%s8085_s10 + $0x480] sm:$0xff] }
 0x154   : > { %v5456_v21 = vmax.f32 %v5008_v13, 0.0  ;;  %v4557_v23 = vmul.f32 %v7491_v19, %v8532_v28  ;;  %v3328_v25 = vpop.f32.mrb[31].mxu1  ;;  %7649 = vmatmul.mubr.msk.f32.gmra.mrb[136].mxu1 %vm643_vm1, %v552_v11  ;;  %v5231_v26 = vmax.f32 %v4783_v16, 0.0  ;;  %v4332_v29 = vmul.f32 %v8532_v28, %v2208_v24  ;;  %7315 = vmatprep.mubr.msk.f32.mxu0 %vm643_vm1, %v329_v14  ;;  %v559_v13 = vld [vmem:[%s8085_s10 + $0xb80] sm:$0xff] }
 0x155   : > { %v5455_v27 = vmax.f32 %v5007_v17, 0.0  ;;  %v4556_v30 = vmul.f32 %v8532_v28, %v3328_v25  ;;  %7651 = vmatprep.mubr.msk.f32.mxu1 %vm643_vm1, %v553_v15  ;;  %5681 = vst.msk [vmem:[%s8573_s28 + $0xe8] sm:$0xff] %vm5651_vm4, %v5232_v20  ;;  %v4786_v33 = vadd.f32 %v8543_v34, %v4333_v22  ;;  %v8980_v25 = vld [vmem:[%s10907_s2] ss:$0 sm:$0xff] }
 0x156   : > { %5905 = vst.msk [vmem:[%s8573_s28 + $0x7e8] sm:$0xff] %vm5651_vm4, %v5456_v21  ;;  %v5010_v35 = vadd.f32 %v8543_v34, %v4557_v23  ;;  %5680 = vst.msk [vmem:[%s8573_s28 + $0xe0] sm:$0xff] %vm5651_vm4, %v5231_v26  ;;  %v4785_v38 = vadd.f32 %v8543_v34, %v4332_v29  ;;  %v7158_v40 = vpop.f32.mrb[32].mxu0  ;;  %v560_v29 = vld [vmem:[%s8085_s10 + $0xb88] sm:$0xff] }
 0x157   : > { %5904 = vst.msk [vmem:[%s8573_s28 + $0x7e0] sm:$0xff] %vm5651_vm4, %v5455_v27  ;;  %v5009_v39 = vadd.f32 %v8543_v34, %v4556_v30  ;;  %v7494_v41 = vpop.f32.mrb[32].mxu1  ;;  %v5234_v42 = vmax.f32 %v4786_v33, 0.0  ;;  %v4335_v44 = vmul.f32 %v7158_v40, %v8532_v28  ;;  %v2218_v46 = vpop.f32.mrb[33].mxu0  ;;  %7316 = vmatmul.mubr.msk.f32.gmra.mrb[138].mxu0 %vm643_vm1, %v330_v31  ;;  %v336_v27 = vld [vmem:[%s8085_s10 + $0x488] sm:$0xff]  ;;  %v337_v33 = vld [vmem:[%s8085_s10 + $0x490] sm:$0xff] }
 0x158   : > { %v5458_v43 = vmax.f32 %v5010_v35, 0.0  ;;  %v4559_v45 = vmul.f32 %v7494_v41, %v8532_v28  ;;  %v3338_v47 = vpop.f32.mrb[33].mxu1  ;;  %7652 = vmatmul.mubr.msk.f32.gmra.mrb[138].mxu1 %vm643_vm1, %v554_v32  ;;  %v5233_v48 = vmax.f32 %v4785_v38, 0.0  ;;  %v4334_v50 = vmul.f32 %v8532_v28, %v2218_v46  ;;  %7318 = vmatprep.mubr.msk.f32.mxu0 %vm643_vm1, %v331_v36  ;;  %v8995_v30 = vld [vmem:[%s10907_s2 + $0x1] ss:$0 sm:$0xff]  ;;  %v561_v35 = vld [vmem:[%s8085_s10 + $0xb90] sm:$0xff] }
 0x159   : > { %v5457_v49 = vmax.f32 %v5009_v39, 0.0  ;;  %v4558_v51 = vmul.f32 %v8532_v28, %v3338_v47  ;;  %7654 = vmatprep.mubr.msk.f32.mxu1 %vm643_vm1, %v555_v37  ;;  %5683 = vst.msk [vmem:[%s8573_s28 + $0xf8] sm:$0xff] %vm5651_vm4, %v5234_v42  ;;  %v4788_v54 = vadd.f32 %v8543_v34, %v4335_v44 }
 0x15a   : > { %5907 = vst.msk [vmem:[%s8573_s28 + $0x7f8] sm:$0xff] %vm5651_vm4, %v5458_v43  ;;  %v5012_v55 = vadd.f32 %v8543_v34, %v4559_v45  ;;  %5682 = vst.msk [vmem:[%s8573_s28 + $0xf0] sm:$0xff] %vm5651_vm4, %v5233_v48  ;;  %v4787_v58 = vadd.f32 %v8543_v34, %v4334_v50  ;;  %v7161_v60 = vpop.f32.mrb[34].mxu0  ;;  %v338_v50 = vld [vmem:[%s8085_s10 + $0x498] sm:$0xff] }
 0x15b   : > { %5906 = vst.msk [vmem:[%s8573_s28 + $0x7f0] sm:$0xff] %vm5651_vm4, %v5457_v49  ;;  %v5011_v59 = vadd.f32 %v8543_v34, %v4558_v51  ;;  %v7497_v61 = vpop.f32.mrb[34].mxu1  ;;  %v5236_v62 = vmax.f32 %v4788_v54, 0.0  ;;  %v4337_v0 = vmul.f32 %v7161_v60, %v8532_v28  ;;  %v2228_v2 = vpop.f32.mrb[35].mxu0  ;;  %7319 = vmatmul.mubr.msk.f32.gmra.mrb[140].mxu0 %vm643_vm1, %v332_v52  ;;  %v562_v51 = vld [vmem:[%s8085_s10 + $0xb98] sm:$0xff]  ;;  %v339_v54 = vld [vmem:[%s8085_s10 + $0x4a0] sm:$0xff] }
 0x15c   : > { %v5460_v63 = vmax.f32 %v5012_v55, 0.0  ;;  %v4561_v1 = vmul.f32 %v7497_v61, %v8532_v28  ;;  %v3348_v3 = vpop.f32.mrb[35].mxu1  ;;  %7655 = vmatmul.mubr.msk.f32.gmra.mrb[140].mxu1 %vm643_vm1, %v556_v53  ;;  %v5235_v4 = vmax.f32 %v4787_v58, 0.0  ;;  %v4336_v6 = vmul.f32 %v8532_v28, %v2228_v2  ;;  %7321 = vmatprep.mubr.msk.f32.mxu0 %vm643_vm1, %v333_v56  ;;  %v563_v55 = vld [vmem:[%s8085_s10 + $0xba0] sm:$0xff] }
 0x15d   : > { %v5459_v5 = vmax.f32 %v5011_v59, 0.0  ;;  %v4560_v7 = vmul.f32 %v8532_v28, %v3348_v3  ;;  %7657 = vmatprep.mubr.msk.f32.mxu1 %vm643_vm1, %v557_v57  ;;  %5685 = vst.msk [vmem:[%s8573_s28 + $0x108] sm:$0xff] %vm5651_vm4, %v5236_v62  ;;  %v4790_v10 = vadd.f32 %v8543_v34, %v4337_v0 }
 0x15e   : > { %5909 = vst.msk [vmem:[%s8573_s28 + $0x808] sm:$0xff] %vm5651_vm4, %v5460_v63  ;;  %v5014_v11 = vadd.f32 %v8543_v34, %v4561_v1  ;;  %5684 = vst.msk [vmem:[%s8573_s28 + $0x100] sm:$0xff] %vm5651_vm4, %v5235_v4  ;;  %v4789_v14 = vadd.f32 %v8543_v34, %v4336_v6  ;;  %v7164_v16 = vpop.f32.mrb[36].mxu0  ;;  %v340_v6 = vld [vmem:[%s8085_s10 + $0x4a8] sm:$0xff] }
 0x15f   : > { %5908 = vst.msk [vmem:[%s8573_s28 + $0x800] sm:$0xff] %vm5651_vm4, %v5459_v5  ;;  %v5013_v15 = vadd.f32 %v8543_v34, %v4560_v7  ;;  %v7500_v17 = vpop.f32.mrb[36].mxu1  ;;  %v5238_v18 = vmax.f32 %v4790_v10, 0.0  ;;  %v4339_v20 = vmul.f32 %v7164_v16, %v8532_v28  ;;  %v2238_v22 = vpop.f32.mrb[37].mxu0  ;;  %7322 = vmatmul.mubr.msk.f32.gmra.mrb[142].mxu0 %vm643_vm1, %v334_v8  ;;  %v564_v7 = vld [vmem:[%s8085_s10 + $0xba8] sm:$0xff]  ;;  %v341_v10 = vld [vmem:[%s8085_s10 + $0x4b0] sm:$0xff] }
 0x160   : > { %v5462_v19 = vmax.f32 %v5014_v11, 0.0  ;;  %v4563_v21 = vmul.f32 %v7500_v17, %v8532_v28  ;;  %v3358_v23 = vpop.f32.mrb[37].mxu1  ;;  %7658 = vmatmul.mubr.msk.f32.gmra.mrb[142].mxu1 %vm643_vm1, %v558_v9  ;;  %v5237_v34 = vmax.f32 %v4789_v14, 0.0  ;;  %v4338_v26 = vmul.f32 %v8980_v25, %v2238_v22  ;;  %7324 = vmatprep.mubr.msk.f32.mxu0 %vm643_vm1, %v335_v12  ;;  %v565_v11 = vld [vmem:[%s8085_s10 + $0xbb0] sm:$0xff] }
 0x161   : > { %v5461_v24 = vmax.f32 %v5013_v15, 0.0  ;;  %v4562_v28 = vmul.f32 %v8980_v25, %v3358_v23  ;;  %7660 = vmatprep.mubr.msk.f32.mxu1 %vm643_vm1, %v559_v13  ;;  %5687 = vst.msk [vmem:[%s8573_s28 + $0x118] sm:$0xff] %vm5651_vm4, %v5238_v18  ;;  %v4792_v31 = vadd.f32 %v8995_v30, %v4339_v20 }
 0x162   : > { %5911 = vst.msk [vmem:[%s8573_s28 + $0x818] sm:$0xff] %vm5651_vm4, %v5462_v19  ;;  %v5016_v32 = vadd.f32 %v8995_v30, %v4563_v21  ;;  %5686 = vst.msk [vmem:[%s8573_s28 + $0x110] sm:$0xff] %vm5651_vm4, %v5237_v34  ;;  %v4791_v36 = vadd.f32 %v8995_v30, %v4338_v26  ;;  %v7167_v38 = vpop.f32.mrb[38].mxu0  ;;  %v342_v26 = vld [vmem:[%s8085_s10 + $0x4b8] sm:$0xff] }
 0x163   : > { %5910 = vst.msk [vmem:[%s8573_s28 + $0x810] sm:$0xff] %vm5651_vm4, %v5461_v24  ;;  %v5015_v37 = vadd.f32 %v8995_v30, %v4562_v28  ;;  %v7503_v39 = vpop.f32.mrb[38].mxu1  ;;  %v5240_v40 = vmax.f32 %v4792_v31, 0.0  ;;  %v4341_v42 = vmul.f32 %v8980_v25, %v7167_v38  ;;  %v2248_v44 = vpop.f32.mrb[39].mxu0  ;;  %7325 = vmatmul.mubr.msk.f32.gmra.mrb[144].mxu0 %vm643_vm1, %v336_v27  ;;  %v566_v28 = vld [vmem:[%s8085_s10 + $0xbb8] sm:$0xff]  ;;  %v343_v31 = vld [vmem:[%s8085_s10 + $0x4c0] sm:$0xff] }
 0x164   : > { %v5464_v41 = vmax.f32 %v5016_v32, 0.0  ;;  %v4565_v43 = vmul.f32 %v8980_v25, %v7503_v39  ;;  %v3368_v45 = vpop.f32.mrb[39].mxu1  ;;  %7661 = vmatmul.mubr.msk.f32.gmra.mrb[144].mxu1 %vm643_vm1, %v560_v29  ;;  %v5239_v46 = vmax.f32 %v4791_v36, 0.0  ;;  %v4340_v48 = vmul.f32 %v8980_v25, %v2248_v44  ;;  %7327 = vmatprep.mubr.msk.f32.mxu0 %vm643_vm1, %v337_v33  ;;  %v567_v32 = vld [vmem:[%s8085_s10 + $0xbc0] sm:$0xff] }
 0x165   : > { %v5463_v47 = vmax.f32 %v5015_v37, 0.0  ;;  %v4564_v49 = vmul.f32 %v8980_v25, %v3368_v45  ;;  %7663 = vmatprep.mubr.msk.f32.mxu1 %vm643_vm1, %v561_v35  ;;  %5689 = vst.msk [vmem:[%s8573_s28 + $0x128] sm:$0xff] %vm5651_vm4, %v5240_v40  ;;  %v4794_v52 = vadd.f32 %v8995_v30, %v4341_v42 }
 0x166   : > { %5913 = vst.msk [vmem:[%s8573_s28 + $0x828] sm:$0xff] %vm5651_vm4, %v5464_v41  ;;  %v5018_v53 = vadd.f32 %v8995_v30, %v4565_v43  ;;  %5688 = vst.msk [vmem:[%s8573_s28 + $0x120] sm:$0xff] %vm5651_vm4, %v5239_v46  ;;  %v4793_v56 = vadd.f32 %v8995_v30, %v4340_v48  ;;  %v7170_v58 = vpop.f32.mrb[40].mxu0  ;;  %v344_v48 = vld [vmem:[%s8085_s10 + $0x4c8] sm:$0xff] }
 0x167   : > { %5912 = vst.msk [vmem:[%s8573_s28 + $0x820] sm:$0xff] %vm5651_vm4, %v5463_v47  ;;  %v5017_v57 = vadd.f32 %v8995_v30, %v4564_v49  ;;  %v7506_v59 = vpop.f32.mrb[40].mxu1  ;;  %v5242_v60 = vmax.f32 %v4794_v52, 0.0  ;;  %v4343_v62 = vmul.f32 %v8980_v25, %v7170_v58  ;;  %v2258_v0 = vpop.f32.mrb[41].mxu0  ;;  %7328 = vmatmul.mubr.msk.f32.gmra.mrb[146].mxu0 %vm643_vm1, %v338_v50  ;;  %v568_v49 = vld [vmem:[%s8085_s10 + $0xbc8] sm:$0xff]  ;;  %v345_v52 = vld [vmem:[%s8085_s10 + $0x4d0] sm:$0xff] }
 0x168   : > { %v5466_v61 = vmax.f32 %v5018_v53, 0.0  ;;  %v4567_v63 = vmul.f32 %v8980_v25, %v7506_v59  ;;  %v3378_v1 = vpop.f32.mrb[41].mxu1  ;;  %7664 = vmatmul.mubr.msk.f32.gmra.mrb[146].mxu1 %vm643_vm1, %v562_v51  ;;  %v5241_v2 = vmax.f32 %v4793_v56, 0.0  ;;  %v4342_v4 = vmul.f32 %v8980_v25, %v2258_v0  ;;  %7330 = vmatprep.mubr.msk.f32.mxu0 %vm643_vm1, %v339_v54  ;;  %v569_v53 = vld [vmem:[%s8085_s10 + $0xbd0] sm:$0xff] }
 0x169   : > { %v5465_v3 = vmax.f32 %v5017_v57, 0.0  ;;  %v4566_v5 = vmul.f32 %v8980_v25, %v3378_v1  ;;  %7666 = vmatprep.mubr.msk.f32.mxu1 %vm643_vm1, %v563_v55  ;;  %5691 = vst.msk [vmem:[%s8573_s28 + $0x138] sm:$0xff] %vm5651_vm4, %v5242_v60  ;;  %v4796_v8 = vadd.f32 %v8995_v30, %v4343_v62 }
 0x16a   : > { %5915 = vst.msk [vmem:[%s8573_s28 + $0x838] sm:$0xff] %vm5651_vm4, %v5466_v61  ;;  %v5020_v9 = vadd.f32 %v8995_v30, %v4567_v63  ;;  %5690 = vst.msk [vmem:[%s8573_s28 + $0x130] sm:$0xff] %vm5651_vm4, %v5241_v2  ;;  %v4795_v12 = vadd.f32 %v8995_v30, %v4342_v4  ;;  %v7173_v14 = vpop.f32.mrb[42].mxu0  ;;  %v346_v4 = vld [vmem:[%s8085_s10 + $0x4d8] sm:$0xff] }
 0x16b   : > { %5914 = vst.msk [vmem:[%s8573_s28 + $0x830] sm:$0xff] %vm5651_vm4, %v5465_v3  ;;  %v5019_v13 = vadd.f32 %v8995_v30, %v4566_v5  ;;  %v7509_v15 = vpop.f32.mrb[42].mxu1  ;;  %v5244_v16 = vmax.f32 %v4796_v8, 0.0  ;;  %v4345_v18 = vmul.f32 %v8980_v25, %v7173_v14  ;;  %v2268_v20 = vpop.f32.mrb[43].mxu0  ;;  %7331 = vmatmul.mubr.msk.f32.gmra.mrb[148].mxu0 %vm643_vm1, %v340_v6  ;;  %v570_v5 = vld [vmem:[%s8085_s10 + $0xbd8] sm:$0xff]  ;;  %v347_v8 = vld [vmem:[%s8085_s10 + $0x4e0] sm:$0xff] }
 0x16c   : > { %v5468_v17 = vmax.f32 %v5020_v9, 0.0  ;;  %v4569_v19 = vmul.f32 %v8980_v25, %v7509_v15  ;;  %v3388_v21 = vpop.f32.mrb[43].mxu1  ;;  %7667 = vmatmul.mubr.msk.f32.gmra.mrb[148].mxu1 %vm643_vm1, %v564_v7  ;;  %v5243_v22 = vmax.f32 %v4795_v12, 0.0  ;;  %v4344_v34 = vmul.f32 %v8980_v25, %v2268_v20  ;;  %7333 = vmatprep.mubr.msk.f32.mxu0 %vm643_vm1, %v341_v10  ;;  %v571_v9 = vld [vmem:[%s8085_s10 + $0xbe0] sm:$0xff] }
 0x16d   : > { %v5467_v23 = vmax.f32 %v5019_v13, 0.0  ;;  %v4568_v24 = vmul.f32 %v8980_v25, %v3388_v21  ;;  %7669 = vmatprep.mubr.msk.f32.mxu1 %vm643_vm1, %v565_v11  ;;  %5693 = vst.msk [vmem:[%s8573_s28 + $0x148] sm:$0xff] %vm5651_vm4, %v5244_v16  ;;  %v4798_v27 = vadd.f32 %v8995_v30, %v4345_v18 }
 0x16e   : > { %5917 = vst.msk [vmem:[%s8573_s28 + $0x848] sm:$0xff] %vm5651_vm4, %v5468_v17  ;;  %v5022_v29 = vadd.f32 %v8995_v30, %v4569_v19  ;;  %5692 = vst.msk [vmem:[%s8573_s28 + $0x140] sm:$0xff] %vm5651_vm4, %v5243_v22  ;;  %v4797_v33 = vadd.f32 %v8995_v30, %v4344_v34  ;;  %v7176_v36 = vpop.f32.mrb[44].mxu0  ;;  %v348_v34 = vld [vmem:[%s8085_s10 + $0x4e8] sm:$0xff] }
 0x16f   : > { %5916 = vst.msk [vmem:[%s8573_s28 + $0x840] sm:$0xff] %vm5651_vm4, %v5467_v23  ;;  %v5021_v35 = vadd.f32 %v8995_v30, %v4568_v24  ;;  %v7512_v37 = vpop.f32.mrb[44].mxu1  ;;  %v5246_v38 = vmax.f32 %v4798_v27, 0.0  ;;  %v4347_v40 = vmul.f32 %v8980_v25, %v7176_v36  ;;  %v2278_v42 = vpop.f32.mrb[45].mxu0  ;;  %7334 = vmatmul.mubr.msk.f32.gmra.mrb[150].mxu0 %vm643_vm1, %v342_v26  ;;  %v572_v24 = vld [vmem:[%s8085_s10 + $0xbe8] sm:$0xff]  ;;  %v349_v27 = vld [vmem:[%s8085_s10 + $0x4f0] sm:$0xff] }
 0x170   : > { %v5470_v39 = vmax.f32 %v5022_v29, 0.0  ;;  %v4571_v41 = vmul.f32 %v8980_v25, %v7512_v37  ;;  %v3398_v43 = vpop.f32.mrb[45].mxu1  ;;  %7670 = vmatmul.mubr.msk.f32.gmra.mrb[150].mxu1 %vm643_vm1, %v566_v28  ;;  %v5245_v44 = vmax.f32 %v4797_v33, 0.0  ;;  %v4346_v46 = vmul.f32 %v8980_v25, %v2278_v42  ;;  %7336 = vmatprep.mubr.msk.f32.mxu0 %vm643_vm1, %v343_v31  ;;  %v573_v29 = vld [vmem:[%s8085_s10 + $0xbf0] sm:$0xff] }
 0x171   : > { %v5469_v45 = vmax.f32 %v5021_v35, 0.0  ;;  %v4570_v47 = vmul.f32 %v8980_v25, %v3398_v43  ;;  %7672 = vmatprep.mubr.msk.f32.mxu1 %vm643_vm1, %v567_v32  ;;  %5695 = vst.msk [vmem:[%s8573_s28 + $0x158] sm:$0xff] %vm5651_vm4, %v5246_v38  ;;  %v4800_v50 = vadd.f32 %v8995_v30, %v4347_v40 }
 0x172   : > { %5919 = vst.msk [vmem:[%s8573_s28 + $0x858] sm:$0xff] %vm5651_vm4, %v5470_v39  ;;  %v5024_v51 = vadd.f32 %v8995_v30, %v4571_v41  ;;  %5694 = vst.msk [vmem:[%s8573_s28 + $0x150] sm:$0xff] %vm5651_vm4, %v5245_v44  ;;  %v4799_v54 = vadd.f32 %v8995_v30, %v4346_v46  ;;  %v7179_v56 = vpop.f32.mrb[46].mxu0  ;;  %v350_v46 = vld [vmem:[%s8085_s10 + $0x4f8] sm:$0xff] }
 0x173   : > { %5918 = vst.msk [vmem:[%s8573_s28 + $0x850] sm:$0xff] %vm5651_vm4, %v5469_v45  ;;  %v5023_v55 = vadd.f32 %v8995_v30, %v4570_v47  ;;  %v7515_v57 = vpop.f32.mrb[46].mxu1  ;;  %v5248_v58 = vmax.f32 %v4800_v50, 0.0  ;;  %v4349_v60 = vmul.f32 %v8980_v25, %v7179_v56  ;;  %v2288_v62 = vpop.f32.mrb[47].mxu0  ;;  %7337 = vmatmul.mubr.msk.f32.gmra.mrb[152].mxu0 %vm643_vm1, %v344_v48  ;;  %v574_v47 = vld [vmem:[%s8085_s10 + $0xbf8] sm:$0xff]  ;;  %v351_v50 = vld [vmem:[%s8085_s10 + $0x500] sm:$0xff] }
 0x174   : > { %v5472_v59 = vmax.f32 %v5024_v51, 0.0  ;;  %v4573_v61 = vmul.f32 %v8980_v25, %v7515_v57  ;;  %v3408_v63 = vpop.f32.mrb[47].mxu1  ;;  %7673 = vmatmul.mubr.msk.f32.gmra.mrb[152].mxu1 %vm643_vm1, %v568_v49  ;;  %v5247_v0 = vmax.f32 %v4799_v54, 0.0  ;;  %v4348_v2 = vmul.f32 %v8980_v25, %v2288_v62  ;;  %7339 = vmatprep.mubr.msk.f32.mxu0 %vm643_vm1, %v345_v52  ;;  %v575_v51 = vld [vmem:[%s8085_s10 + $0xc00] sm:$0xff] }
 0x175   : > { %v5471_v1 = vmax.f32 %v5023_v55, 0.0  ;;  %v4572_v3 = vmul.f32 %v8980_v25, %v3408_v63  ;;  %7675 = vmatprep.mubr.msk.f32.mxu1 %vm643_vm1, %v569_v53  ;;  %5697 = vst.msk [vmem:[%s8573_s28 + $0x168] sm:$0xff] %vm5651_vm4, %v5248_v58  ;;  %v4802_v6 = vadd.f32 %v8995_v30, %v4349_v60 }
 0x176   : > { %5921 = vst.msk [vmem:[%s8573_s28 + $0x868] sm:$0xff] %vm5651_vm4, %v5472_v59  ;;  %v5026_v7 = vadd.f32 %v8995_v30, %v4573_v61  ;;  %5696 = vst.msk [vmem:[%s8573_s28 + $0x160] sm:$0xff] %vm5651_vm4, %v5247_v0  ;;  %v4801_v10 = vadd.f32 %v8995_v30, %v4348_v2  ;;  %v7182_v12 = vpop.f32.mrb[48].mxu0  ;;  %v352_v2 = vld [vmem:[%s8085_s10 + $0x508] sm:$0xff] }
 0x177   : > { %5920 = vst.msk [vmem:[%s8573_s28 + $0x860] sm:$0xff] %vm5651_vm4, %v5471_v1  ;;  %v5025_v11 = vadd.f32 %v8995_v30, %v4572_v3  ;;  %v7518_v13 = vpop.f32.mrb[48].mxu1  ;;  %v5250_v14 = vmax.f32 %v4802_v6, 0.0  ;;  %v4351_v16 = vmul.f32 %v8980_v25, %v7182_v12  ;;  %v2298_v18 = vpop.f32.mrb[49].mxu0  ;;  %7340 = vmatmul.mubr.msk.f32.gmra.mrb[154].mxu0 %vm643_vm1, %v346_v4  ;;  %v576_v3 = vld [vmem:[%s8085_s10 + $0xc08] sm:$0xff]  ;;  %v353_v6 = vld [vmem:[%s8085_s10 + $0x510] sm:$0xff] }
 0x178   : > { %v5474_v15 = vmax.f32 %v5026_v7, 0.0  ;;  %v4575_v17 = vmul.f32 %v8980_v25, %v7518_v13  ;;  %v3418_v19 = vpop.f32.mrb[49].mxu1  ;;  %7676 = vmatmul.mubr.msk.f32.gmra.mrb[154].mxu1 %vm643_vm1, %v570_v5  ;;  %v5249_v20 = vmax.f32 %v4801_v10, 0.0  ;;  %v4350_v22 = vmul.f32 %v8980_v25, %v2298_v18  ;;  %7342 = vmatprep.mubr.msk.f32.mxu0 %vm643_vm1, %v347_v8  ;;  %v577_v7 = vld [vmem:[%s8085_s10 + $0xc10] sm:$0xff] }
 0x179   : > { %v5473_v21 = vmax.f32 %v5025_v11, 0.0  ;;  %v4574_v23 = vmul.f32 %v8980_v25, %v3418_v19  ;;  %7678 = vmatprep.mubr.msk.f32.mxu1 %vm643_vm1, %v571_v9  ;;  %5699 = vst.msk [vmem:[%s8573_s28 + $0x178] sm:$0xff] %vm5651_vm4, %v5250_v14  ;;  %v4804_v26 = vadd.f32 %v8995_v30, %v4351_v16 }
 0x17a   : > { %5923 = vst.msk [vmem:[%s8573_s28 + $0x878] sm:$0xff] %vm5651_vm4, %v5474_v15  ;;  %v5028_v28 = vadd.f32 %v8995_v30, %v4575_v17  ;;  %5698 = vst.msk [vmem:[%s8573_s28 + $0x170] sm:$0xff] %vm5651_vm4, %v5249_v20  ;;  %v4803_v31 = vadd.f32 %v8995_v30, %v4350_v22  ;;  %v7185_v33 = vpop.f32.mrb[50].mxu0  ;;  %v354_v22 = vld [vmem:[%s8085_s10 + $0x518] sm:$0xff] }
 0x17b   : > { %5922 = vst.msk [vmem:[%s8573_s28 + $0x870] sm:$0xff] %vm5651_vm4, %v5473_v21  ;;  %v5027_v32 = vadd.f32 %v8995_v30, %v4574_v23  ;;  %v7521_v35 = vpop.f32.mrb[50].mxu1  ;;  %v5252_v36 = vmax.f32 %v4804_v26, 0.0  ;;  %v4353_v38 = vmul.f32 %v8980_v25, %v7185_v33  ;;  %v2308_v40 = vpop.f32.mrb[51].mxu0  ;;  %7343 = vmatmul.mubr.msk.f32.gmra.mrb[156].mxu0 %vm643_vm1, %v348_v34  ;;  %v578_v23 = vld [vmem:[%s8085_s10 + $0xc18] sm:$0xff]  ;;  %v355_v26 = vld [vmem:[%s8085_s10 + $0x520] sm:$0xff] }
 0x17c   : > { %v5476_v37 = vmax.f32 %v5028_v28, 0.0  ;;  %v4577_v39 = vmul.f32 %v8980_v25, %v7521_v35  ;;  %v3428_v41 = vpop.f32.mrb[51].mxu1  ;;  %7679 = vmatmul.mubr.msk.f32.gmra.mrb[156].mxu1 %vm643_vm1, %v572_v24  ;;  %v5251_v42 = vmax.f32 %v4803_v31, 0.0  ;;  %v4352_v44 = vmul.f32 %v8980_v25, %v2308_v40  ;;  %7345 = vmatprep.mubr.msk.f32.mxu0 %vm643_vm1, %v349_v27  ;;  %v579_v28 = vld [vmem:[%s8085_s10 + $0xc20] sm:$0xff] }
 0x17d   : > { %v5475_v43 = vmax.f32 %v5027_v32, 0.0  ;;  %v4576_v45 = vmul.f32 %v8980_v25, %v3428_v41  ;;  %7681 = vmatprep.mubr.msk.f32.mxu1 %vm643_vm1, %v573_v29  ;;  %5701 = vst.msk [vmem:[%s8573_s28 + $0x188] sm:$0xff] %vm5651_vm4, %v5252_v36  ;;  %v4806_v48 = vadd.f32 %v8995_v30, %v4353_v38 }
 0x17e   : > { %5925 = vst.msk [vmem:[%s8573_s28 + $0x888] sm:$0xff] %vm5651_vm4, %v5476_v37  ;;  %v5030_v49 = vadd.f32 %v8995_v30, %v4577_v39  ;;  %5700 = vst.msk [vmem:[%s8573_s28 + $0x180] sm:$0xff] %vm5651_vm4, %v5251_v42  ;;  %v4805_v52 = vadd.f32 %v8995_v30, %v4352_v44  ;;  %v7188_v54 = vpop.f32.mrb[52].mxu0  ;;  %v356_v44 = vld [vmem:[%s8085_s10 + $0x528] sm:$0xff] }
 0x17f   : > { %5924 = vst.msk [vmem:[%s8573_s28 + $0x880] sm:$0xff] %vm5651_vm4, %v5475_v43  ;;  %v5029_v53 = vadd.f32 %v8995_v30, %v4576_v45  ;;  %v7524_v55 = vpop.f32.mrb[52].mxu1  ;;  %v5254_v56 = vmax.f32 %v4806_v48, 0.0  ;;  %v4355_v58 = vmul.f32 %v8980_v25, %v7188_v54  ;;  %v2318_v60 = vpop.f32.mrb[53].mxu0  ;;  %7346 = vmatmul.mubr.msk.f32.gmra.mrb[158].mxu0 %vm643_vm1, %v350_v46  ;;  %v580_v45 = vld [vmem:[%s8085_s10 + $0xc28] sm:$0xff]  ;;  %v357_v48 = vld [vmem:[%s8085_s10 + $0x530] sm:$0xff] }
 0x180   : > { %v5478_v57 = vmax.f32 %v5030_v49, 0.0  ;;  %v4579_v59 = vmul.f32 %v8980_v25, %v7524_v55  ;;  %v3438_v61 = vpop.f32.mrb[53].mxu1  ;;  %7682 = vmatmul.mubr.msk.f32.gmra.mrb[158].mxu1 %vm643_vm1, %v574_v47  ;;  %v5253_v62 = vmax.f32 %v4805_v52, 0.0  ;;  %v4354_v0 = vmul.f32 %v8980_v25, %v2318_v60  ;;  %7348 = vmatprep.mubr.msk.f32.mxu0 %vm643_vm1, %v351_v50  ;;  %v581_v49 = vld [vmem:[%s8085_s10 + $0xc30] sm:$0xff] }
 0x181   : > { %v5477_v63 = vmax.f32 %v5029_v53, 0.0  ;;  %v4578_v1 = vmul.f32 %v8980_v25, %v3438_v61  ;;  %7684 = vmatprep.mubr.msk.f32.mxu1 %vm643_vm1, %v575_v51  ;;  %5703 = vst.msk [vmem:[%s8573_s28 + $0x198] sm:$0xff] %vm5651_vm4, %v5254_v56  ;;  %v4808_v4 = vadd.f32 %v8995_v30, %v4355_v58 }
 0x182   : > { %5927 = vst.msk [vmem:[%s8573_s28 + $0x898] sm:$0xff] %vm5651_vm4, %v5478_v57  ;;  %v5032_v5 = vadd.f32 %v8995_v30, %v4579_v59  ;;  %5702 = vst.msk [vmem:[%s8573_s28 + $0x190] sm:$0xff] %vm5651_vm4, %v5253_v62  ;;  %v4807_v8 = vadd.f32 %v8995_v30, %v4354_v0  ;;  %v7191_v10 = vpop.f32.mrb[54].mxu0  ;;  %v358_v0 = vld [vmem:[%s8085_s10 + $0x538] sm:$0xff] }
 0x183   : > { %5926 = vst.msk [vmem:[%s8573_s28 + $0x890] sm:$0xff] %vm5651_vm4, %v5477_v63  ;;  %v5031_v9 = vadd.f32 %v8995_v30, %v4578_v1  ;;  %v7527_v11 = vpop.f32.mrb[54].mxu1  ;;  %v5256_v12 = vmax.f32 %v4808_v4, 0.0  ;;  %v4357_v14 = vmul.f32 %v8980_v25, %v7191_v10  ;;  %v2328_v16 = vpop.f32.mrb[55].mxu0  ;;  %7349 = vmatmul.mubr.msk.f32.gmra.mrb[160].mxu0 %vm643_vm1, %v352_v2  ;;  %v582_v1 = vld [vmem:[%s8085_s10 + $0xc38] sm:$0xff]  ;;  %v359_v4 = vld [vmem:[%s8085_s10 + $0x540] sm:$0xff] }
 0x184   : > { %v5480_v13 = vmax.f32 %v5032_v5, 0.0  ;;  %v4581_v15 = vmul.f32 %v8980_v25, %v7527_v11  ;;  %v3448_v17 = vpop.f32.mrb[55].mxu1  ;;  %7685 = vmatmul.mubr.msk.f32.gmra.mrb[160].mxu1 %vm643_vm1, %v576_v3  ;;  %v5255_v18 = vmax.f32 %v4807_v8, 0.0  ;;  %v4356_v20 = vmul.f32 %v8980_v25, %v2328_v16  ;;  %7351 = vmatprep.mubr.msk.f32.mxu0 %vm643_vm1, %v353_v6  ;;  %v583_v5 = vld [vmem:[%s8085_s10 + $0xc40] sm:$0xff] }
 0x185   : > { %v5479_v19 = vmax.f32 %v5031_v9, 0.0  ;;  %v4580_v21 = vmul.f32 %v8980_v25, %v3448_v17  ;;  %7687 = vmatprep.mubr.msk.f32.mxu1 %vm643_vm1, %v577_v7  ;;  %5705 = vst.msk [vmem:[%s8573_s28 + $0x1a8] sm:$0xff] %vm5651_vm4, %v5256_v12  ;;  %v4810_v34 = vadd.f32 %v8995_v30, %v4357_v14 }
 0x186   : > { %5929 = vst.msk [vmem:[%s8573_s28 + $0x8a8] sm:$0xff] %vm5651_vm4, %v5480_v13  ;;  %v5034_v24 = vadd.f32 %v8995_v30, %v4581_v15  ;;  %5704 = vst.msk [vmem:[%s8573_s28 + $0x1a0] sm:$0xff] %vm5651_vm4, %v5255_v18  ;;  %v4809_v27 = vadd.f32 %v8995_v30, %v4356_v20  ;;  %v7194_v31 = vpop.f32.mrb[56].mxu0  ;;  %v360_v20 = vld [vmem:[%s8085_s10 + $0x548] sm:$0xff] }
 0x187   : > { %5928 = vst.msk [vmem:[%s8573_s28 + $0x8a0] sm:$0xff] %vm5651_vm4, %v5479_v19  ;;  %v5033_v29 = vadd.f32 %v8995_v30, %v4580_v21  ;;  %v7530_v32 = vpop.f32.mrb[56].mxu1  ;;  %v5258_v33 = vmax.f32 %v4810_v34, 0.0  ;;  %v4359_v36 = vmul.f32 %v8980_v25, %v7194_v31  ;;  %v2338_v38 = vpop.f32.mrb[57].mxu0  ;;  %7352 = vmatmul.mubr.msk.f32.gmra.mrb[162].mxu0 %vm643_vm1, %v354_v22  ;;  %v584_v21 = vld [vmem:[%s8085_s10 + $0xc48] sm:$0xff]  ;;  %v361_v34 = vld [vmem:[%s8085_s10 + $0x550] sm:$0xff] }
 0x188   : > { %v5482_v35 = vmax.f32 %v5034_v24, 0.0  ;;  %v4583_v37 = vmul.f32 %v8980_v25, %v7530_v32  ;;  %v3458_v39 = vpop.f32.mrb[57].mxu1  ;;  %7688 = vmatmul.mubr.msk.f32.gmra.mrb[162].mxu1 %vm643_vm1, %v578_v23  ;;  %v5257_v40 = vmax.f32 %v4809_v27, 0.0  ;;  %v4358_v42 = vmul.f32 %v8980_v25, %v2338_v38  ;;  %7354 = vmatprep.mubr.msk.f32.mxu0 %vm643_vm1, %v355_v26  ;;  %v585_v24 = vld [vmem:[%s8085_s10 + $0xc50] sm:$0xff] }
 0x189   : > { %v5481_v41 = vmax.f32 %v5033_v29, 0.0  ;;  %v4582_v43 = vmul.f32 %v8980_v25, %v3458_v39  ;;  %7690 = vmatprep.mubr.msk.f32.mxu1 %vm643_vm1, %v579_v28  ;;  %5707 = vst.msk [vmem:[%s8573_s28 + $0x1b8] sm:$0xff] %vm5651_vm4, %v5258_v33  ;;  %v4812_v46 = vadd.f32 %v8995_v30, %v4359_v36 }
 0x18a   : > { %5931 = vst.msk [vmem:[%s8573_s28 + $0x8b8] sm:$0xff] %vm5651_vm4, %v5482_v35  ;;  %v5036_v47 = vadd.f32 %v8995_v30, %v4583_v37  ;;  %5706 = vst.msk [vmem:[%s8573_s28 + $0x1b0] sm:$0xff] %vm5651_vm4, %v5257_v40  ;;  %v4811_v50 = vadd.f32 %v8995_v30, %v4358_v42  ;;  %v7197_v52 = vpop.f32.mrb[58].mxu0  ;;  %v362_v42 = vld [vmem:[%s8085_s10 + $0x558] sm:$0xff] }
 0x18b   : > { %5930 = vst.msk [vmem:[%s8573_s28 + $0x8b0] sm:$0xff] %vm5651_vm4, %v5481_v41  ;;  %v5035_v51 = vadd.f32 %v8995_v30, %v4582_v43  ;;  %v7533_v53 = vpop.f32.mrb[58].mxu1  ;;  %v5260_v54 = vmax.f32 %v4812_v46, 0.0  ;;  %v4361_v56 = vmul.f32 %v8980_v25, %v7197_v52  ;;  %v2348_v58 = vpop.f32.mrb[59].mxu0  ;;  %7355 = vmatmul.mubr.msk.f32.gmra.mrb[164].mxu0 %vm643_vm1, %v356_v44  ;;  %v586_v43 = vld [vmem:[%s8085_s10 + $0xc58] sm:$0xff]  ;;  %v363_v46 = vld [vmem:[%s8085_s10 + $0x560] sm:$0xff] }
 0x18c   : > { %v5484_v55 = vmax.f32 %v5036_v47, 0.0  ;;  %v4585_v57 = vmul.f32 %v8980_v25, %v7533_v53  ;;  %v3468_v59 = vpop.f32.mrb[59].mxu1  ;;  %7691 = vmatmul.mubr.msk.f32.gmra.mrb[164].mxu1 %vm643_vm1, %v580_v45  ;;  %v5259_v60 = vmax.f32 %v4811_v50, 0.0  ;;  %v4360_v62 = vmul.f32 %v8980_v25, %v2348_v58  ;;  %7357 = vmatprep.mubr.msk.f32.mxu0 %vm643_vm1, %v357_v48  ;;  %v587_v47 = vld [vmem:[%s8085_s10 + $0xc60] sm:$0xff] }
 0x18d   : > { %v5483_v61 = vmax.f32 %v5035_v51, 0.0  ;;  %v4584_v63 = vmul.f32 %v8980_v25, %v3468_v59  ;;  %7693 = vmatprep.mubr.msk.f32.mxu1 %vm643_vm1, %v581_v49  ;;  %5709 = vst.msk [vmem:[%s8573_s28 + $0x1c8] sm:$0xff] %vm5651_vm4, %v5260_v54  ;;  %v4814_v2 = vadd.f32 %v8995_v30, %v4361_v56 }
 0x18e   : > { %5933 = vst.msk [vmem:[%s8573_s28 + $0x8c8] sm:$0xff] %vm5651_vm4, %v5484_v55  ;;  %v5038_v3 = vadd.f32 %v8995_v30, %v4585_v57  ;;  %5708 = vst.msk [vmem:[%s8573_s28 + $0x1c0] sm:$0xff] %vm5651_vm4, %v5259_v60  ;;  %v4813_v6 = vadd.f32 %v8995_v30, %v4360_v62  ;;  %v7200_v8 = vpop.f32.mrb[60].mxu0  ;;  %v364_v62 = vld [vmem:[%s8085_s10 + $0x568] sm:$0xff] }
 0x18f   : > { %5932 = vst.msk [vmem:[%s8573_s28 + $0x8c0] sm:$0xff] %vm5651_vm4, %v5483_v61  ;;  %v5037_v7 = vadd.f32 %v8995_v30, %v4584_v63  ;;  %v7536_v9 = vpop.f32.mrb[60].mxu1  ;;  %v5262_v10 = vmax.f32 %v4814_v2, 0.0  ;;  %v4363_v12 = vmul.f32 %v8980_v25, %v7200_v8  ;;  %v2358_v14 = vpop.f32.mrb[61].mxu0  ;;  %7358 = vmatmul.mubr.msk.f32.gmra.mrb[166].mxu0 %vm643_vm1, %v358_v0  ;;  %v588_v63 = vld [vmem:[%s8085_s10 + $0xc68] sm:$0xff]  ;;  %v365_v2 = vld [vmem:[%s8085_s10 + $0x570] sm:$0xff] }
 0x190   : > { %v5486_v11 = vmax.f32 %v5038_v3, 0.0  ;;  %v4587_v13 = vmul.f32 %v8980_v25, %v7536_v9  ;;  %v3478_v15 = vpop.f32.mrb[61].mxu1  ;;  %7694 = vmatmul.mubr.msk.f32.gmra.mrb[166].mxu1 %vm643_vm1, %v582_v1  ;;  %v5261_v16 = vmax.f32 %v4813_v6, 0.0  ;;  %v4362_v18 = vmul.f32 %v8980_v25, %v2358_v14  ;;  %7360 = vmatprep.mubr.msk.f32.mxu0 %vm643_vm1, %v359_v4  ;;  %v589_v3 = vld [vmem:[%s8085_s10 + $0xc70] sm:$0xff] }
 0x191   : > { %v5485_v17 = vmax.f32 %v5037_v7, 0.0  ;;  %v4586_v19 = vmul.f32 %v8980_v25, %v3478_v15  ;;  %7696 = vmatprep.mubr.msk.f32.mxu1 %vm643_vm1, %v583_v5  ;;  %5711 = vst.msk [vmem:[%s8573_s28 + $0x1d8] sm:$0xff] %vm5651_vm4, %v5262_v10  ;;  %v4816_v22 = vadd.f32 %v8995_v30, %v4363_v12 }
 0x192   : > { %5935 = vst.msk [vmem:[%s8573_s28 + $0x8d8] sm:$0xff] %vm5651_vm4, %v5486_v11  ;;  %v5040_v23 = vadd.f32 %v8995_v30, %v4587_v13  ;;  %5710 = vst.msk [vmem:[%s8573_s28 + $0x1d0] sm:$0xff] %vm5651_vm4, %v5261_v16  ;;  %v4815_v26 = vadd.f32 %v8995_v30, %v4362_v18  ;;  %v7203_v27 = vpop.f32.mrb[62].mxu0  ;;  %v366_v18 = vld [vmem:[%s8085_s10 + $0x578] sm:$0xff] }
 0x193   : > { %5934 = vst.msk [vmem:[%s8573_s28 + $0x8d0] sm:$0xff] %vm5651_vm4, %v5485_v17  ;;  %v5039_v28 = vadd.f32 %v8995_v30, %v4586_v19  ;;  %v7539_v29 = vpop.f32.mrb[62].mxu1  ;;  %v5264_v31 = vmax.f32 %v4816_v22, 0.0  ;;  %v4365_v33 = vmul.f32 %v8980_v25, %v7203_v27  ;;  %v2368_v36 = vpop.f32.mrb[63].mxu0  ;;  %7361 = vmatmul.mubr.msk.f32.gmra.mrb[168].mxu0 %vm643_vm1, %v360_v20  ;;  %v590_v19 = vld [vmem:[%s8085_s10 + $0xc78] sm:$0xff]  ;;  %v367_v22 = vld [vmem:[%s8085_s10 + $0x580] sm:$0xff] }
 0x194   : > { %v5488_v32 = vmax.f32 %v5040_v23, 0.0  ;;  %v4589_v35 = vmul.f32 %v8980_v25, %v7539_v29  ;;  %v3488_v37 = vpop.f32.mrb[63].mxu1  ;;  %7697 = vmatmul.mubr.msk.f32.gmra.mrb[168].mxu1 %vm643_vm1, %v584_v21  ;;  %v5263_v38 = vmax.f32 %v4815_v26, 0.0  ;;  %v4364_v40 = vmul.f32 %v8980_v25, %v2368_v36  ;;  %7363 = vmatprep.mubr.msk.f32.mxu0 %vm643_vm1, %v361_v34  ;;  %v591_v23 = vld [vmem:[%s8085_s10 + $0xc80] sm:$0xff] }
 0x195   : > { %v5487_v39 = vmax.f32 %v5039_v28, 0.0  ;;  %v4588_v41 = vmul.f32 %v8980_v25, %v3488_v37  ;;  %7699 = vmatprep.mubr.msk.f32.mxu1 %vm643_vm1, %v585_v24  ;;  %5713 = vst.msk [vmem:[%s8573_s28 + $0x1e8] sm:$0xff] %vm5651_vm4, %v5264_v31  ;;  %v4818_v44 = vadd.f32 %v8995_v30, %v4365_v33 }
 0x196   : > { %5937 = vst.msk [vmem:[%s8573_s28 + $0x8e8] sm:$0xff] %vm5651_vm4, %v5488_v32  ;;  %v5042_v45 = vadd.f32 %v8995_v30, %v4589_v35  ;;  %5712 = vst.msk [vmem:[%s8573_s28 + $0x1e0] sm:$0xff] %vm5651_vm4, %v5263_v38  ;;  %v4817_v48 = vadd.f32 %v8995_v30, %v4364_v40  ;;  %v7206_v50 = vpop.f32.mrb[64].mxu0  ;;  %v368_v40 = vld [vmem:[%s8085_s10 + $0x588] sm:$0xff] }
 0x197   : > { %5936 = vst.msk [vmem:[%s8573_s28 + $0x8e0] sm:$0xff] %vm5651_vm4, %v5487_v39  ;;  %v5041_v49 = vadd.f32 %v8995_v30, %v4588_v41  ;;  %v7542_v51 = vpop.f32.mrb[64].mxu1  ;;  %v5266_v52 = vmax.f32 %v4818_v44, 0.0  ;;  %v4367_v54 = vmul.f32 %v8980_v25, %v7206_v50  ;;  %v2378_v56 = vpop.f32.mrb[65].mxu0  ;;  %7364 = vmatmul.mubr.msk.f32.gmra.mrb[170].mxu0 %vm643_vm1, %v362_v42  ;;  %v592_v41 = vld [vmem:[%s8085_s10 + $0xc88] sm:$0xff]  ;;  %v369_v44 = vld [vmem:[%s8085_s10 + $0x590] sm:$0xff] }
 0x198   : > { %v5490_v53 = vmax.f32 %v5042_v45, 0.0  ;;  %v4591_v55 = vmul.f32 %v8980_v25, %v7542_v51  ;;  %v3498_v57 = vpop.f32.mrb[65].mxu1  ;;  %7700 = vmatmul.mubr.msk.f32.gmra.mrb[170].mxu1 %vm643_vm1, %v586_v43  ;;  %v5265_v58 = vmax.f32 %v4817_v48, 0.0  ;;  %v4366_v60 = vmul.f32 %v8980_v25, %v2378_v56  ;;  %7366 = vmatprep.mubr.msk.f32.mxu0 %vm643_vm1, %v363_v46  ;;  %v593_v45 = vld [vmem:[%s8085_s10 + $0xc90] sm:$0xff] }
 0x199   : > { %v5489_v59 = vmax.f32 %v5041_v49, 0.0  ;;  %v4590_v61 = vmul.f32 %v8980_v25, %v3498_v57  ;;  %7702 = vmatprep.mubr.msk.f32.mxu1 %vm643_vm1, %v587_v47  ;;  %5715 = vst.msk [vmem:[%s8573_s28 + $0x1f8] sm:$0xff] %vm5651_vm4, %v5266_v52  ;;  %v4820_v0 = vadd.f32 %v8995_v30, %v4367_v54 }
 0x19a   : > { %5939 = vst.msk [vmem:[%s8573_s28 + $0x8f8] sm:$0xff] %vm5651_vm4, %v5490_v53  ;;  %v5044_v1 = vadd.f32 %v8995_v30, %v4591_v55  ;;  %5714 = vst.msk [vmem:[%s8573_s28 + $0x1f0] sm:$0xff] %vm5651_vm4, %v5265_v58  ;;  %v4819_v4 = vadd.f32 %v8995_v30, %v4366_v60  ;;  %v7209_v6 = vpop.f32.mrb[66].mxu0  ;;  %v370_v60 = vld [vmem:[%s8085_s10 + $0x598] sm:$0xff] }
 0x19b   : > { %5938 = vst.msk [vmem:[%s8573_s28 + $0x8f0] sm:$0xff] %vm5651_vm4, %v5489_v59  ;;  %v5043_v5 = vadd.f32 %v8995_v30, %v4590_v61  ;;  %v7545_v7 = vpop.f32.mrb[66].mxu1  ;;  %v5268_v8 = vmax.f32 %v4820_v0, 0.0  ;;  %v4369_v10 = vmul.f32 %v8980_v25, %v7209_v6  ;;  %v2388_v12 = vpop.f32.mrb[67].mxu0  ;;  %7367 = vmatmul.mubr.msk.f32.gmra.mrb[172].mxu0 %vm643_vm1, %v364_v62  ;;  %v594_v61 = vld [vmem:[%s8085_s10 + $0xc98] sm:$0xff]  ;;  %v371_v0 = vld [vmem:[%s8085_s10 + $0x5a0] sm:$0xff] }
 0x19c   : > { %v5492_v9 = vmax.f32 %v5044_v1, 0.0  ;;  %v4593_v11 = vmul.f32 %v8980_v25, %v7545_v7  ;;  %v3508_v13 = vpop.f32.mrb[67].mxu1  ;;  %7703 = vmatmul.mubr.msk.f32.gmra.mrb[172].mxu1 %vm643_vm1, %v588_v63  ;;  %v5267_v14 = vmax.f32 %v4819_v4, 0.0  ;;  %v4368_v16 = vmul.f32 %v8980_v25, %v2388_v12  ;;  %7369 = vmatprep.mubr.msk.f32.mxu0 %vm643_vm1, %v365_v2  ;;  %v595_v1 = vld [vmem:[%s8085_s10 + $0xca0] sm:$0xff] }
 0x19d   : > { %v5491_v15 = vmax.f32 %v5043_v5, 0.0  ;;  %v4592_v17 = vmul.f32 %v8980_v25, %v3508_v13  ;;  %7705 = vmatprep.mubr.msk.f32.mxu1 %vm643_vm1, %v589_v3  ;;  %5717 = vst.msk [vmem:[%s8573_s28 + $0x208] sm:$0xff] %vm5651_vm4, %v5268_v8  ;;  %v4822_v20 = vadd.f32 %v8995_v30, %v4369_v10 }
 0x19e   : > { %5941 = vst.msk [vmem:[%s8573_s28 + $0x908] sm:$0xff] %vm5651_vm4, %v5492_v9  ;;  %v5046_v21 = vadd.f32 %v8995_v30, %v4593_v11  ;;  %5716 = vst.msk [vmem:[%s8573_s28 + $0x200] sm:$0xff] %vm5651_vm4, %v5267_v14  ;;  %v4821_v34 = vadd.f32 %v8995_v30, %v4368_v16  ;;  %v7212_v26 = vpop.f32.mrb[68].mxu0  ;;  %v372_v16 = vld [vmem:[%s8085_s10 + $0x5a8] sm:$0xff] }
 0x19f   : > { %5940 = vst.msk [vmem:[%s8573_s28 + $0x900] sm:$0xff] %vm5651_vm4, %v5491_v15  ;;  %v5045_v24 = vadd.f32 %v8995_v30, %v4592_v17  ;;  %v7548_v28 = vpop.f32.mrb[68].mxu1  ;;  %v5270_v27 = vmax.f32 %v4822_v20, 0.0  ;;  %v4371_v31 = vmul.f32 %v8980_v25, %v7212_v26  ;;  %v2398_v33 = vpop.f32.mrb[69].mxu0  ;;  %7370 = vmatmul.mubr.msk.f32.gmra.mrb[174].mxu0 %vm643_vm1, %v366_v18  ;;  %v596_v17 = vld [vmem:[%s8085_s10 + $0xca8] sm:$0xff]  ;;  %v373_v20 = vld [vmem:[%s8085_s10 + $0x5b0] sm:$0xff] }
 0x1a0   : > { %v5494_v29 = vmax.f32 %v5046_v21, 0.0  ;;  %v4595_v32 = vmul.f32 %v8980_v25, %v7548_v28  ;;  %v3518_v35 = vpop.f32.mrb[69].mxu1  ;;  %7706 = vmatmul.mubr.msk.f32.gmra.mrb[174].mxu1 %vm643_vm1, %v590_v19  ;;  %v5269_v36 = vmax.f32 %v4821_v34, 0.0  ;;  %v4370_v38 = vmul.f32 %v8980_v25, %v2398_v33  ;;  %7372 = vmatprep.mubr.msk.f32.mxu0 %vm643_vm1, %v367_v22  ;;  %v597_v21 = vld [vmem:[%s8085_s10 + $0xcb0] sm:$0xff]  ;;  %v9442_v28 = vld [vmem:[%s10907_s2] ss:$0 sm:$0xff] }
 0x1a1   : > { %v5493_v37 = vmax.f32 %v5045_v24, 0.0  ;;  %v4594_v39 = vmul.f32 %v8980_v25, %v3518_v35  ;;  %7708 = vmatprep.mubr.msk.f32.mxu1 %vm643_vm1, %v591_v23  ;;  %5719 = vst.msk [vmem:[%s8573_s28 + $0x218] sm:$0xff] %vm5651_vm4, %v5270_v27  ;;  %v4824_v42 = vadd.f32 %v8995_v30, %v4371_v31 }
 0x1a2   : > { %5943 = vst.msk [vmem:[%s8573_s28 + $0x918] sm:$0xff] %vm5651_vm4, %v5494_v29  ;;  %v5048_v43 = vadd.f32 %v8995_v30, %v4595_v32  ;;  %5718 = vst.msk [vmem:[%s8573_s28 + $0x210] sm:$0xff] %vm5651_vm4, %v5269_v36  ;;  %v4823_v46 = vadd.f32 %v8995_v30, %v4370_v38  ;;  %v7215_v48 = vpop.f32.mrb[70].mxu0  ;;  %v598_v38 = vld [vmem:[%s8085_s10 + $0xcb8] sm:$0xff] }
 0x1a3   : > { %5942 = vst.msk [vmem:[%s8573_s28 + $0x910] sm:$0xff] %vm5651_vm4, %v5493_v37  ;;  %v5047_v47 = vadd.f32 %v8995_v30, %v4594_v39  ;;  %v7551_v49 = vpop.f32.mrb[70].mxu1  ;;  %v5272_v50 = vmax.f32 %v4824_v42, 0.0  ;;  %v4373_v52 = vmul.f32 %v8980_v25, %v7215_v48  ;;  %v2408_v54 = vpop.f32.mrb[71].mxu0  ;;  %7373 = vmatmul.mubr.msk.f32.gmra.mrb[176].mxu0 %vm643_vm1, %v368_v40  ;;  %v374_v37 = vld [vmem:[%s8085_s10 + $0x5b8] sm:$0xff]  ;;  %v375_v42 = vld [vmem:[%s8085_s10 + $0x5c0] sm:$0xff] }
 0x1a4   : > { %v5496_v51 = vmax.f32 %v5048_v43, 0.0  ;;  %v4597_v53 = vmul.f32 %v8980_v25, %v7551_v49  ;;  %v3528_v55 = vpop.f32.mrb[71].mxu1  ;;  %7709 = vmatmul.mubr.msk.f32.gmra.mrb[176].mxu1 %vm643_vm1, %v592_v41  ;;  %v5271_v56 = vmax.f32 %v4823_v46, 0.0  ;;  %v4372_v58 = vmul.f32 %v8980_v25, %v2408_v54  ;;  %7375 = vmatprep.mubr.msk.f32.mxu0 %vm643_vm1, %v369_v44  ;;  %v9461_v39 = vld [vmem:[%s10907_s2 + $0x1] ss:$0 sm:$0xff] }
 0x1a5   : > { %v5495_v57 = vmax.f32 %v5047_v47, 0.0  ;;  %v4596_v59 = vmul.f32 %v8980_v25, %v3528_v55  ;;  %7711 = vmatprep.mubr.msk.f32.mxu1 %vm643_vm1, %v593_v45  ;;  %5721 = vst.msk [vmem:[%s8573_s28 + $0x228] sm:$0xff] %vm5651_vm4, %v5272_v50  ;;  %v4826_v62 = vadd.f32 %v8995_v30, %v4373_v52  ;;  %v599_v43 = vld [vmem:[%s8085_s10 + $0xcc0] sm:$0xff] }
 0x1a6   : > { %5945 = vst.msk [vmem:[%s8573_s28 + $0x928] sm:$0xff] %vm5651_vm4, %v5496_v51  ;;  %v5050_v63 = vadd.f32 %v8995_v30, %v4597_v53  ;;  %5720 = vst.msk [vmem:[%s8573_s28 + $0x220] sm:$0xff] %vm5651_vm4, %v5271_v56  ;;  %v4825_v2 = vadd.f32 %v8995_v30, %v4372_v58  ;;  %v7218_v4 = vpop.f32.mrb[72].mxu0  ;;  %v376_v58 = vld [vmem:[%s8085_s10 + $0x5c8] sm:$0xff] }
 0x1a7   : > { %5944 = vst.msk [vmem:[%s8573_s28 + $0x920] sm:$0xff] %vm5651_vm4, %v5495_v57  ;;  %v5049_v3 = vadd.f32 %v8995_v30, %v4596_v59  ;;  %v7554_v5 = vpop.f32.mrb[72].mxu1  ;;  %v5274_v6 = vmax.f32 %v4826_v62, 0.0  ;;  %v4375_v8 = vmul.f32 %v8980_v25, %v7218_v4  ;;  %v2418_v10 = vpop.f32.mrb[73].mxu0  ;;  %7376 = vmatmul.mubr.msk.f32.gmra.mrb[178].mxu0 %vm643_vm1, %v370_v60  ;;  %v600_v59 = vld [vmem:[%s8085_s10 + $0xcc8] sm:$0xff]  ;;  %v377_v62 = vld [vmem:[%s8085_s10 + $0x5d0] sm:$0xff] }
 0x1a8   : > { %v5498_v7 = vmax.f32 %v5050_v63, 0.0  ;;  %v4599_v9 = vmul.f32 %v8980_v25, %v7554_v5  ;;  %v3538_v11 = vpop.f32.mrb[73].mxu1  ;;  %7712 = vmatmul.mubr.msk.f32.gmra.mrb[178].mxu1 %vm643_vm1, %v594_v61  ;;  %v5273_v12 = vmax.f32 %v4825_v2, 0.0  ;;  %v4374_v14 = vmul.f32 %v8980_v25, %v2418_v10  ;;  %7378 = vmatprep.mubr.msk.f32.mxu0 %vm643_vm1, %v371_v0  ;;  %v601_v63 = vld [vmem:[%s8085_s10 + $0xcd0] sm:$0xff] }
 0x1a9   : > { %v5497_v13 = vmax.f32 %v5049_v3, 0.0  ;;  %v4598_v15 = vmul.f32 %v8980_v25, %v3538_v11  ;;  %7714 = vmatprep.mubr.msk.f32.mxu1 %vm643_vm1, %v595_v1  ;;  %5723 = vst.msk [vmem:[%s8573_s28 + $0x238] sm:$0xff] %vm5651_vm4, %v5274_v6  ;;  %v4828_v18 = vadd.f32 %v8995_v30, %v4375_v8 }
 0x1aa   : > { %5947 = vst.msk [vmem:[%s8573_s28 + $0x938] sm:$0xff] %vm5651_vm4, %v5498_v7  ;;  %v5052_v19 = vadd.f32 %v8995_v30, %v4599_v9  ;;  %5722 = vst.msk [vmem:[%s8573_s28 + $0x230] sm:$0xff] %vm5651_vm4, %v5273_v12  ;;  %v4827_v25 = vadd.f32 %v8995_v30, %v4374_v14  ;;  %v7221_v23 = vpop.f32.mrb[74].mxu0  ;;  %v378_v14 = vld [vmem:[%s8085_s10 + $0x5d8] sm:$0xff] }
 0x1ab   : > { %5946 = vst.msk [vmem:[%s8573_s28 + $0x930] sm:$0xff] %vm5651_vm4, %v5497_v13  ;;  %v5051_v22 = vadd.f32 %v8995_v30, %v4598_v15  ;;  %v7557_v34 = vpop.f32.mrb[74].mxu1  ;;  %v5276_v24 = vmax.f32 %v4828_v18, 0.0  ;;  %v4377_v27 = vmul.f32 %v9442_v28, %v7221_v23  ;;  %v2428_v31 = vpop.f32.mrb[75].mxu0  ;;  %7379 = vmatmul.mubr.msk.f32.gmra.mrb[180].mxu0 %vm643_vm1, %v372_v16  ;;  %v602_v15 = vld [vmem:[%s8085_s10 + $0xcd8] sm:$0xff]  ;;  %v379_v18 = vld [vmem:[%s8085_s10 + $0x5e0] sm:$0xff] }
 0x1ac   : > { %v5500_v26 = vmax.f32 %v5052_v19, 0.0  ;;  %v4601_v29 = vmul.f32 %v9442_v28, %v7557_v34  ;;  %v3548_v30 = vpop.f32.mrb[75].mxu1  ;;  %7715 = vmatmul.mubr.msk.f32.gmra.mrb[180].mxu1 %vm643_vm1, %v596_v17  ;;  %v5275_v32 = vmax.f32 %v4827_v25, 0.0  ;;  %v4376_v35 = vmul.f32 %v9442_v28, %v2428_v31  ;;  %7381 = vmatprep.mubr.msk.f32.mxu0 %vm643_vm1, %v373_v20  ;;  %v603_v19 = vld [vmem:[%s8085_s10 + $0xce0] sm:$0xff] }
 0x1ad   : > { %v5499_v33 = vmax.f32 %v5051_v22, 0.0  ;;  %v4600_v36 = vmul.f32 %v9442_v28, %v3548_v30  ;;  %7717 = vmatprep.mubr.msk.f32.mxu1 %vm643_vm1, %v597_v21  ;;  %5725 = vst.msk [vmem:[%s8573_s28 + $0x248] sm:$0xff] %vm5651_vm4, %v5276_v24  ;;  %v4830_v40 = vadd.f32 %v9461_v39, %v4377_v27 }
 0x1ae   : > { %5949 = vst.msk [vmem:[%s8573_s28 + $0x948] sm:$0xff] %vm5651_vm4, %v5500_v26  ;;  %v5054_v41 = vadd.f32 %v9461_v39, %v4601_v29  ;;  %5724 = vst.msk [vmem:[%s8573_s28 + $0x240] sm:$0xff] %vm5651_vm4, %v5275_v32  ;;  %v4829_v44 = vadd.f32 %v9461_v39, %v4376_v35  ;;  %v7224_v46 = vpop.f32.mrb[76].mxu0  ;;  %v380_v35 = vld [vmem:[%s8085_s10 + $0x5e8] sm:$0xff] }
 0x1af   : > { %5948 = vst.msk [vmem:[%s8573_s28 + $0x940] sm:$0xff] %vm5651_vm4, %v5499_v33  ;;  %v5053_v45 = vadd.f32 %v9461_v39, %v4600_v36  ;;  %v7560_v47 = vpop.f32.mrb[76].mxu1  ;;  %v5278_v48 = vmax.f32 %v4830_v40, 0.0  ;;  %v4379_v50 = vmul.f32 %v9442_v28, %v7224_v46  ;;  %v2438_v52 = vpop.f32.mrb[77].mxu0  ;;  %7382 = vmatmul.mubr.msk.f32.gmra.mrb[182].mxu0 %vm643_vm1, %v374_v37  ;;  %v604_v36 = vld [vmem:[%s8085_s10 + $0xce8] sm:$0xff]  ;;  %v381_v40 = vld [vmem:[%s8085_s10 + $0x5f0] sm:$0xff] }
 0x1b0   : > { %v5502_v49 = vmax.f32 %v5054_v41, 0.0  ;;  %v4603_v51 = vmul.f32 %v9442_v28, %v7560_v47  ;;  %v3558_v53 = vpop.f32.mrb[77].mxu1  ;;  %7718 = vmatmul.mubr.msk.f32.gmra.mrb[182].mxu1 %vm643_vm1, %v598_v38  ;;  %v5277_v54 = vmax.f32 %v4829_v44, 0.0  ;;  %v4378_v56 = vmul.f32 %v9442_v28, %v2438_v52  ;;  %7384 = vmatprep.mubr.msk.f32.mxu0 %vm643_vm1, %v375_v42  ;;  %v605_v41 = vld [vmem:[%s8085_s10 + $0xcf0] sm:$0xff] }
 0x1b1   : > { %v5501_v55 = vmax.f32 %v5053_v45, 0.0  ;;  %v4602_v57 = vmul.f32 %v9442_v28, %v3558_v53  ;;  %7720 = vmatprep.mubr.msk.f32.mxu1 %vm643_vm1, %v599_v43  ;;  %5727 = vst.msk [vmem:[%s8573_s28 + $0x258] sm:$0xff] %vm5651_vm4, %v5278_v48  ;;  %v4832_v60 = vadd.f32 %v9461_v39, %v4379_v50 }
 0x1b2   : > { %5951 = vst.msk [vmem:[%s8573_s28 + $0x958] sm:$0xff] %vm5651_vm4, %v5502_v49  ;;  %v5056_v61 = vadd.f32 %v9461_v39, %v4603_v51  ;;  %5726 = vst.msk [vmem:[%s8573_s28 + $0x250] sm:$0xff] %vm5651_vm4, %v5277_v54  ;;  %v4831_v0 = vadd.f32 %v9461_v39, %v4378_v56  ;;  %v7227_v2 = vpop.f32.mrb[78].mxu0  ;;  %v382_v56 = vld [vmem:[%s8085_s10 + $0x5f8] sm:$0xff] }
 0x1b3   : > { %5950 = vst.msk [vmem:[%s8573_s28 + $0x950] sm:$0xff] %vm5651_vm4, %v5501_v55  ;;  %v5055_v1 = vadd.f32 %v9461_v39, %v4602_v57  ;;  %v7563_v3 = vpop.f32.mrb[78].mxu1  ;;  %v5280_v4 = vmax.f32 %v4832_v60, 0.0  ;;  %v4381_v6 = vmul.f32 %v9442_v28, %v7227_v2  ;;  %v2448_v8 = vpop.f32.mrb[79].mxu0  ;;  %7385 = vmatmul.mubr.msk.f32.gmra.mrb[184].mxu0 %vm643_vm1, %v376_v58  ;;  %v606_v57 = vld [vmem:[%s8085_s10 + $0xcf8] sm:$0xff]  ;;  %v383_v60 = vld [vmem:[%s8085_s10 + $0x600] sm:$0xff] }
 0x1b4   : > { %v5504_v5 = vmax.f32 %v5056_v61, 0.0  ;;  %v4605_v7 = vmul.f32 %v9442_v28, %v7563_v3  ;;  %v3568_v9 = vpop.f32.mrb[79].mxu1  ;;  %7721 = vmatmul.mubr.msk.f32.gmra.mrb[184].mxu1 %vm643_vm1, %v600_v59  ;;  %v5279_v10 = vmax.f32 %v4831_v0, 0.0  ;;  %v4380_v12 = vmul.f32 %v9442_v28, %v2448_v8  ;;  %7387 = vmatprep.mubr.msk.f32.mxu0 %vm643_vm1, %v377_v62  ;;  %v607_v61 = vld [vmem:[%s8085_s10 + $0xd00] sm:$0xff] }
 0x1b5   : > { %v5503_v11 = vmax.f32 %v5055_v1, 0.0  ;;  %v4604_v13 = vmul.f32 %v9442_v28, %v3568_v9  ;;  %7723 = vmatprep.mubr.msk.f32.mxu1 %vm643_vm1, %v601_v63  ;;  %5729 = vst.msk [vmem:[%s8573_s28 + $0x268] sm:$0xff] %vm5651_vm4, %v5280_v4  ;;  %v4834_v16 = vadd.f32 %v9461_v39, %v4381_v6 }
 0x1b6   : > { %5953 = vst.msk [vmem:[%s8573_s28 + $0x968] sm:$0xff] %vm5651_vm4, %v5504_v5  ;;  %v5058_v17 = vadd.f32 %v9461_v39, %v4605_v7  ;;  %5728 = vst.msk [vmem:[%s8573_s28 + $0x260] sm:$0xff] %vm5651_vm4, %v5279_v10  ;;  %v4833_v20 = vadd.f32 %v9461_v39, %v4380_v12  ;;  %v7230_v25 = vpop.f32.mrb[80].mxu0  ;;  %v384_v12 = vld [vmem:[%s8085_s10 + $0x608] sm:$0xff] }
 0x1b7   : > { %5952 = vst.msk [vmem:[%s8573_s28 + $0x960] sm:$0xff] %vm5651_vm4, %v5503_v11  ;;  %v5057_v21 = vadd.f32 %v9461_v39, %v4604_v13  ;;  %v7566_v22 = vpop.f32.mrb[80].mxu1  ;;  %v5282_v23 = vmax.f32 %v4834_v16, 0.0  ;;  %v4383_v24 = vmul.f32 %v9442_v28, %v7230_v25  ;;  %v2458_v27 = vpop.f32.mrb[81].mxu0  ;;  %7388 = vmatmul.mubr.msk.f32.gmra.mrb[186].mxu0 %vm643_vm1, %v378_v14  ;;  %v608_v13 = vld [vmem:[%s8085_s10 + $0xd08] sm:$0xff]  ;;  %v385_v16 = vld [vmem:[%s8085_s10 + $0x610] sm:$0xff] }
 0x1b8   : > { %v5506_v34 = vmax.f32 %v5058_v17, 0.0  ;;  %v4607_v26 = vmul.f32 %v9442_v28, %v7566_v22  ;;  %v3578_v29 = vpop.f32.mrb[81].mxu1  ;;  %7724 = vmatmul.mubr.msk.f32.gmra.mrb[186].mxu1 %vm643_vm1, %v602_v15  ;;  %v5281_v31 = vmax.f32 %v4833_v20, 0.0  ;;  %v4382_v32 = vmul.f32 %v9442_v28, %v2458_v27  ;;  %7390 = vmatprep.mubr.msk.f32.mxu0 %vm643_vm1, %v379_v18  ;;  %v609_v17 = vld [vmem:[%s8085_s10 + $0xd10] sm:$0xff] }
 0x1b9   : > { %v5505_v30 = vmax.f32 %v5057_v21, 0.0  ;;  %v4606_v33 = vmul.f32 %v9442_v28, %v3578_v29  ;;  %7726 = vmatprep.mubr.msk.f32.mxu1 %vm643_vm1, %v603_v19  ;;  %5731 = vst.msk [vmem:[%s8573_s28 + $0x278] sm:$0xff] %vm5651_vm4, %v5282_v23  ;;  %v4836_v37 = vadd.f32 %v9461_v39, %v4383_v24 }
 0x1ba   : > { %5955 = vst.msk [vmem:[%s8573_s28 + $0x978] sm:$0xff] %vm5651_vm4, %v5506_v34  ;;  %v5060_v38 = vadd.f32 %v9461_v39, %v4607_v26  ;;  %5730 = vst.msk [vmem:[%s8573_s28 + $0x270] sm:$0xff] %vm5651_vm4, %v5281_v31  ;;  %v4835_v42 = vadd.f32 %v9461_v39, %v4382_v32  ;;  %v7233_v44 = vpop.f32.mrb[82].mxu0  ;;  %v386_v32 = vld [vmem:[%s8085_s10 + $0x618] sm:$0xff] }
 0x1bb   : > { %5954 = vst.msk [vmem:[%s8573_s28 + $0x970] sm:$0xff] %vm5651_vm4, %v5505_v30  ;;  %v5059_v43 = vadd.f32 %v9461_v39, %v4606_v33  ;;  %v7569_v45 = vpop.f32.mrb[82].mxu1  ;;  %v5284_v46 = vmax.f32 %v4836_v37, 0.0  ;;  %v4385_v48 = vmul.f32 %v9442_v28, %v7233_v44  ;;  %v2468_v50 = vpop.f32.mrb[83].mxu0  ;;  %7391 = vmatmul.mubr.msk.f32.gmra.mrb[188].mxu0 %vm643_vm1, %v380_v35  ;;  %v610_v33 = vld [vmem:[%s8085_s10 + $0xd18] sm:$0xff]  ;;  %v387_v37 = vld [vmem:[%s8085_s10 + $0x620] sm:$0xff] }
 0x1bc   : > { %v5508_v47 = vmax.f32 %v5060_v38, 0.0  ;;  %v4609_v49 = vmul.f32 %v9442_v28, %v7569_v45  ;;  %v3588_v51 = vpop.f32.mrb[83].mxu1  ;;  %7727 = vmatmul.mubr.msk.f32.gmra.mrb[188].mxu1 %vm643_vm1, %v604_v36  ;;  %v5283_v52 = vmax.f32 %v4835_v42, 0.0  ;;  %v4384_v54 = vmul.f32 %v9442_v28, %v2468_v50  ;;  %7393 = vmatprep.mubr.msk.f32.mxu0 %vm643_vm1, %v381_v40  ;;  %v611_v38 = vld [vmem:[%s8085_s10 + $0xd20] sm:$0xff] }
 0x1bd   : > { %v5507_v53 = vmax.f32 %v5059_v43, 0.0  ;;  %v4608_v55 = vmul.f32 %v9442_v28, %v3588_v51  ;;  %7729 = vmatprep.mubr.msk.f32.mxu1 %vm643_vm1, %v605_v41  ;;  %5733 = vst.msk [vmem:[%s8573_s28 + $0x288] sm:$0xff] %vm5651_vm4, %v5284_v46  ;;  %v4838_v58 = vadd.f32 %v9461_v39, %v4385_v48 }
 0x1be   : > { %5957 = vst.msk [vmem:[%s8573_s28 + $0x988] sm:$0xff] %vm5651_vm4, %v5508_v47  ;;  %v5062_v59 = vadd.f32 %v9461_v39, %v4609_v49  ;;  %5732 = vst.msk [vmem:[%s8573_s28 + $0x280] sm:$0xff] %vm5651_vm4, %v5283_v52  ;;  %v4837_v62 = vadd.f32 %v9461_v39, %v4384_v54  ;;  %v7236_v0 = vpop.f32.mrb[84].mxu0  ;;  %v388_v54 = vld [vmem:[%s8085_s10 + $0x628] sm:$0xff] }
 0x1bf   : > { %5956 = vst.msk [vmem:[%s8573_s28 + $0x980] sm:$0xff] %vm5651_vm4, %v5507_v53  ;;  %v5061_v63 = vadd.f32 %v9461_v39, %v4608_v55  ;;  %v7572_v1 = vpop.f32.mrb[84].mxu1  ;;  %v5286_v2 = vmax.f32 %v4838_v58, 0.0  ;;  %v4387_v4 = vmul.f32 %v9442_v28, %v7236_v0  ;;  %v2478_v6 = vpop.f32.mrb[85].mxu0  ;;  %7394 = vmatmul.mubr.msk.f32.gmra.mrb[190].mxu0 %vm643_vm1, %v382_v56  ;;  %v612_v55 = vld [vmem:[%s8085_s10 + $0xd28] sm:$0xff]  ;;  %v389_v58 = vld [vmem:[%s8085_s10 + $0x630] sm:$0xff] }
 0x1c0   : > { %v5510_v3 = vmax.f32 %v5062_v59, 0.0  ;;  %v4611_v5 = vmul.f32 %v9442_v28, %v7572_v1  ;;  %v3598_v7 = vpop.f32.mrb[85].mxu1  ;;  %7730 = vmatmul.mubr.msk.f32.gmra.mrb[190].mxu1 %vm643_vm1, %v606_v57  ;;  %v5285_v8 = vmax.f32 %v4837_v62, 0.0  ;;  %v4386_v10 = vmul.f32 %v9442_v28, %v2478_v6  ;;  %7396 = vmatprep.mubr.msk.f32.mxu0 %vm643_vm1, %v383_v60  ;;  %v613_v59 = vld [vmem:[%s8085_s10 + $0xd30] sm:$0xff] }
 0x1c1   : > { %v5509_v9 = vmax.f32 %v5061_v63, 0.0  ;;  %v4610_v11 = vmul.f32 %v9442_v28, %v3598_v7  ;;  %7732 = vmatprep.mubr.msk.f32.mxu1 %vm643_vm1, %v607_v61  ;;  %5735 = vst.msk [vmem:[%s8573_s28 + $0x298] sm:$0xff] %vm5651_vm4, %v5286_v2  ;;  %v4840_v14 = vadd.f32 %v9461_v39, %v4387_v4 }
 0x1c2   : > { %5959 = vst.msk [vmem:[%s8573_s28 + $0x998] sm:$0xff] %vm5651_vm4, %v5510_v3  ;;  %v5064_v15 = vadd.f32 %v9461_v39, %v4611_v5  ;;  %5734 = vst.msk [vmem:[%s8573_s28 + $0x290] sm:$0xff] %vm5651_vm4, %v5285_v8  ;;  %v4839_v18 = vadd.f32 %v9461_v39, %v4386_v10  ;;  %v7239_v20 = vpop.f32.mrb[86].mxu0  ;;  %v390_v10 = vld [vmem:[%s8085_s10 + $0x638] sm:$0xff] }
 0x1c3   : > { %5958 = vst.msk [vmem:[%s8573_s28 + $0x990] sm:$0xff] %vm5651_vm4, %v5509_v9  ;;  %v5063_v19 = vadd.f32 %v9461_v39, %v4610_v11  ;;  %v7575_v21 = vpop.f32.mrb[86].mxu1  ;;  %v5288_v25 = vmax.f32 %v4840_v14, 0.0  ;;  %v4389_v23 = vmul.f32 %v9442_v28, %v7239_v20  ;;  %v2488_v24 = vpop.f32.mrb[87].mxu0  ;;  %7397 = vmatmul.mubr.msk.f32.gmra.mrb[192].mxu0 %vm643_vm1, %v384_v12  ;;  %v614_v11 = vld [vmem:[%s8085_s10 + $0xd38] sm:$0xff]  ;;  %v391_v14 = vld [vmem:[%s8085_s10 + $0x640] sm:$0xff] }
 0x1c4   : > { %v5512_v22 = vmax.f32 %v5064_v15, 0.0  ;;  %v4613_v34 = vmul.f32 %v9442_v28, %v7575_v21  ;;  %v3608_v26 = vpop.f32.mrb[87].mxu1  ;;  %7733 = vmatmul.mubr.msk.f32.gmra.mrb[192].mxu1 %vm643_vm1, %v608_v13  ;;  %v5287_v27 = vmax.f32 %v4839_v18, 0.0  ;;  %v4388_v31 = vmul.f32 %v9442_v28, %v2488_v24  ;;  %7399 = vmatprep.mubr.msk.f32.mxu0 %vm643_vm1, %v385_v16  ;;  %v615_v15 = vld [vmem:[%s8085_s10 + $0xd40] sm:$0xff] }
 0x1c5   : > { %v5511_v29 = vmax.f32 %v5063_v19, 0.0  ;;  %v4612_v30 = vmul.f32 %v9442_v28, %v3608_v26  ;;  %7735 = vmatprep.mubr.msk.f32.mxu1 %vm643_vm1, %v609_v17  ;;  %5737 = vst.msk [vmem:[%s8573_s28 + $0x2a8] sm:$0xff] %vm5651_vm4, %v5288_v25  ;;  %v4842_v35 = vadd.f32 %v9461_v39, %v4389_v23 }
 0x1c6   : > { %5961 = vst.msk [vmem:[%s8573_s28 + $0x9a8] sm:$0xff] %vm5651_vm4, %v5512_v22  ;;  %v5066_v36 = vadd.f32 %v9461_v39, %v4613_v34  ;;  %5736 = vst.msk [vmem:[%s8573_s28 + $0x2a0] sm:$0xff] %vm5651_vm4, %v5287_v27  ;;  %v4841_v40 = vadd.f32 %v9461_v39, %v4388_v31  ;;  %v7242_v42 = vpop.f32.mrb[88].mxu0  ;;  %v392_v31 = vld [vmem:[%s8085_s10 + $0x648] sm:$0xff] }
 0x1c7   : > { %5960 = vst.msk [vmem:[%s8573_s28 + $0x9a0] sm:$0xff] %vm5651_vm4, %v5511_v29  ;;  %v5065_v41 = vadd.f32 %v9461_v39, %v4612_v30  ;;  %v7578_v43 = vpop.f32.mrb[88].mxu1  ;;  %v5290_v44 = vmax.f32 %v4842_v35, 0.0  ;;  %v4391_v46 = vmul.f32 %v9442_v28, %v7242_v42  ;;  %v2498_v48 = vpop.f32.mrb[89].mxu0  ;;  %7400 = vmatmul.mubr.msk.f32.gmra.mrb[194].mxu0 %vm643_vm1, %v386_v32  ;;  %v616_v30 = vld [vmem:[%s8085_s10 + $0xd48] sm:$0xff]  ;;  %v393_v35 = vld [vmem:[%s8085_s10 + $0x650] sm:$0xff] }
 0x1c8   : > { %v5514_v45 = vmax.f32 %v5066_v36, 0.0  ;;  %v4615_v47 = vmul.f32 %v9442_v28, %v7578_v43  ;;  %v3618_v49 = vpop.f32.mrb[89].mxu1  ;;  %7736 = vmatmul.mubr.msk.f32.gmra.mrb[194].mxu1 %vm643_vm1, %v610_v33  ;;  %v5289_v50 = vmax.f32 %v4841_v40, 0.0  ;;  %v4390_v52 = vmul.f32 %v9442_v28, %v2498_v48  ;;  %7402 = vmatprep.mubr.msk.f32.mxu0 %vm643_vm1, %v387_v37  ;;  %v617_v36 = vld [vmem:[%s8085_s10 + $0xd50] sm:$0xff] }
 0x1c9   : > { %v5513_v51 = vmax.f32 %v5065_v41, 0.0  ;;  %v4614_v53 = vmul.f32 %v9442_v28, %v3618_v49  ;;  %7738 = vmatprep.mubr.msk.f32.mxu1 %vm643_vm1, %v611_v38  ;;  %5739 = vst.msk [vmem:[%s8573_s28 + $0x2b8] sm:$0xff] %vm5651_vm4, %v5290_v44  ;;  %v4844_v56 = vadd.f32 %v9461_v39, %v4391_v46 }
 0x1ca   : > { %5963 = vst.msk [vmem:[%s8573_s28 + $0x9b8] sm:$0xff] %vm5651_vm4, %v5514_v45  ;;  %v5068_v57 = vadd.f32 %v9461_v39, %v4615_v47  ;;  %5738 = vst.msk [vmem:[%s8573_s28 + $0x2b0] sm:$0xff] %vm5651_vm4, %v5289_v50  ;;  %v4843_v60 = vadd.f32 %v9461_v39, %v4390_v52  ;;  %v7245_v62 = vpop.f32.mrb[90].mxu0  ;;  %v394_v52 = vld [vmem:[%s8085_s10 + $0x658] sm:$0xff] }
 0x1cb   : > { %5962 = vst.msk [vmem:[%s8573_s28 + $0x9b0] sm:$0xff] %vm5651_vm4, %v5513_v51  ;;  %v5067_v61 = vadd.f32 %v9461_v39, %v4614_v53  ;;  %v7581_v63 = vpop.f32.mrb[90].mxu1  ;;  %v5292_v0 = vmax.f32 %v4844_v56, 0.0  ;;  %v4393_v2 = vmul.f32 %v9442_v28, %v7245_v62  ;;  %v2508_v4 = vpop.f32.mrb[91].mxu0  ;;  %7403 = vmatmul.mubr.msk.f32.gmra.mrb[196].mxu0 %vm643_vm1, %v388_v54  ;;  %v618_v53 = vld [vmem:[%s8085_s10 + $0xd58] sm:$0xff]  ;;  %v395_v56 = vld [vmem:[%s8085_s10 + $0x660] sm:$0xff] }
 0x1cc   : > { %v5516_v1 = vmax.f32 %v5068_v57, 0.0  ;;  %v4617_v3 = vmul.f32 %v9442_v28, %v7581_v63  ;;  %v3628_v5 = vpop.f32.mrb[91].mxu1  ;;  %7739 = vmatmul.mubr.msk.f32.gmra.mrb[196].mxu1 %vm643_vm1, %v612_v55  ;;  %v5291_v6 = vmax.f32 %v4843_v60, 0.0  ;;  %v4392_v8 = vmul.f32 %v9442_v28, %v2508_v4  ;;  %7405 = vmatprep.mubr.msk.f32.mxu0 %vm643_vm1, %v389_v58  ;;  %v619_v57 = vld [vmem:[%s8085_s10 + $0xd60] sm:$0xff] }
 0x1cd   : > { %v5515_v7 = vmax.f32 %v5067_v61, 0.0  ;;  %v4616_v9 = vmul.f32 %v9442_v28, %v3628_v5  ;;  %7741 = vmatprep.mubr.msk.f32.mxu1 %vm643_vm1, %v613_v59  ;;  %5741 = vst.msk [vmem:[%s8573_s28 + $0x2c8] sm:$0xff] %vm5651_vm4, %v5292_v0  ;;  %v4846_v12 = vadd.f32 %v9461_v39, %v4393_v2 }
 0x1ce   : > { %5965 = vst.msk [vmem:[%s8573_s28 + $0x9c8] sm:$0xff] %vm5651_vm4, %v5516_v1  ;;  %v5070_v13 = vadd.f32 %v9461_v39, %v4617_v3  ;;  %5740 = vst.msk [vmem:[%s8573_s28 + $0x2c0] sm:$0xff] %vm5651_vm4, %v5291_v6  ;;  %v4845_v16 = vadd.f32 %v9461_v39, %v4392_v8  ;;  %v7248_v18 = vpop.f32.mrb[92].mxu0  ;;  %v396_v8 = vld [vmem:[%s8085_s10 + $0x668] sm:$0xff] }
 0x1cf   : > { %5964 = vst.msk [vmem:[%s8573_s28 + $0x9c0] sm:$0xff] %vm5651_vm4, %v5515_v7  ;;  %v5069_v17 = vadd.f32 %v9461_v39, %v4616_v9  ;;  %v7584_v19 = vpop.f32.mrb[92].mxu1  ;;  %v5294_v20 = vmax.f32 %v4846_v12, 0.0  ;;  %v4395_v25 = vmul.f32 %v9442_v28, %v7248_v18  ;;  %v2518_v23 = vpop.f32.mrb[93].mxu0  ;;  %7406 = vmatmul.mubr.msk.f32.gmra.mrb[198].mxu0 %vm643_vm1, %v390_v10  ;;  %v620_v9 = vld [vmem:[%s8085_s10 + $0xd68] sm:$0xff]  ;;  %v397_v12 = vld [vmem:[%s8085_s10 + $0x670] sm:$0xff] }
 0x1d0   : > { %v5518_v21 = vmax.f32 %v5070_v13, 0.0  ;;  %v4619_v22 = vmul.f32 %v9442_v28, %v7584_v19  ;;  %v3638_v34 = vpop.f32.mrb[93].mxu1  ;;  %7742 = vmatmul.mubr.msk.f32.gmra.mrb[198].mxu1 %vm643_vm1, %v614_v11  ;;  %v5293_v24 = vmax.f32 %v4845_v16, 0.0  ;;  %v4394_v27 = vmul.f32 %v9442_v28, %v2518_v23  ;;  %7408 = vmatprep.mubr.msk.f32.mxu0 %vm643_vm1, %v391_v14  ;;  %v621_v13 = vld [vmem:[%s8085_s10 + $0xd70] sm:$0xff] }
 0x1d1   : > { %v5517_v26 = vmax.f32 %v5069_v17, 0.0  ;;  %v4618_v29 = vmul.f32 %v9442_v28, %v3638_v34  ;;  %7744 = vmatprep.mubr.msk.f32.mxu1 %vm643_vm1, %v615_v15  ;;  %5743 = vst.msk [vmem:[%s8573_s28 + $0x2d8] sm:$0xff] %vm5651_vm4, %v5294_v20  ;;  %v4848_v32 = vadd.f32 %v9461_v39, %v4395_v25 }
 0x1d2   : > { %5967 = vst.msk [vmem:[%s8573_s28 + $0x9d8] sm:$0xff] %vm5651_vm4, %v5518_v21  ;;  %v5072_v33 = vadd.f32 %v9461_v39, %v4619_v22  ;;  %5742 = vst.msk [vmem:[%s8573_s28 + $0x2d0] sm:$0xff] %vm5651_vm4, %v5293_v24  ;;  %v4847_v37 = vadd.f32 %v9461_v39, %v4394_v27  ;;  %v7251_v40 = vpop.f32.mrb[94].mxu0  ;;  %v398_v27 = vld [vmem:[%s8085_s10 + $0x678] sm:$0xff] }
 0x1d3   : > { %5966 = vst.msk [vmem:[%s8573_s28 + $0x9d0] sm:$0xff] %vm5651_vm4, %v5517_v26  ;;  %v5071_v38 = vadd.f32 %v9461_v39, %v4618_v29  ;;  %v7587_v41 = vpop.f32.mrb[94].mxu1  ;;  %v5296_v42 = vmax.f32 %v4848_v32, 0.0  ;;  %v4397_v44 = vmul.f32 %v9442_v28, %v7251_v40  ;;  %v2528_v46 = vpop.f32.mrb[95].mxu0  ;;  %7409 = vmatmul.mubr.msk.f32.gmra.mrb[200].mxu0 %vm643_vm1, %v392_v31  ;;  %v622_v29 = vld [vmem:[%s8085_s10 + $0xd78] sm:$0xff]  ;;  %v399_v32 = vld [vmem:[%s8085_s10 + $0x680] sm:$0xff] }
 0x1d4   : > { %v5520_v43 = vmax.f32 %v5072_v33, 0.0  ;;  %v4621_v45 = vmul.f32 %v9442_v28, %v7587_v41  ;;  %v3648_v47 = vpop.f32.mrb[95].mxu1  ;;  %7745 = vmatmul.mubr.msk.f32.gmra.mrb[200].mxu1 %vm643_vm1, %v616_v30  ;;  %v5295_v48 = vmax.f32 %v4847_v37, 0.0  ;;  %v4396_v50 = vmul.f32 %v9442_v28, %v2528_v46  ;;  %7411 = vmatprep.mubr.msk.f32.mxu0 %vm643_vm1, %v393_v35  ;;  %v623_v33 = vld [vmem:[%s8085_s10 + $0xd80] sm:$0xff] }
 0x1d5   : > { %v5519_v49 = vmax.f32 %v5071_v38, 0.0  ;;  %v4620_v51 = vmul.f32 %v9442_v28, %v3648_v47  ;;  %7747 = vmatprep.mubr.msk.f32.mxu1 %vm643_vm1, %v617_v36  ;;  %5745 = vst.msk [vmem:[%s8573_s28 + $0x2e8] sm:$0xff] %vm5651_vm4, %v5296_v42  ;;  %v4850_v54 = vadd.f32 %v9461_v39, %v4397_v44 }
 0x1d6   : > { %5969 = vst.msk [vmem:[%s8573_s28 + $0x9e8] sm:$0xff] %vm5651_vm4, %v5520_v43  ;;  %v5074_v55 = vadd.f32 %v9461_v39, %v4621_v45  ;;  %5744 = vst.msk [vmem:[%s8573_s28 + $0x2e0] sm:$0xff] %vm5651_vm4, %v5295_v48  ;;  %v4849_v58 = vadd.f32 %v9461_v39, %v4396_v50  ;;  %v7254_v60 = vpop.f32.mrb[96].mxu0  ;;  %v400_v50 = vld [vmem:[%s8085_s10 + $0x688] sm:$0xff] }
 0x1d7   : > { %5968 = vst.msk [vmem:[%s8573_s28 + $0x9e0] sm:$0xff] %vm5651_vm4, %v5519_v49  ;;  %v5073_v59 = vadd.f32 %v9461_v39, %v4620_v51  ;;  %v7590_v61 = vpop.f32.mrb[96].mxu1  ;;  %v5298_v62 = vmax.f32 %v4850_v54, 0.0  ;;  %v4399_v0 = vmul.f32 %v9442_v28, %v7254_v60  ;;  %v2538_v2 = vpop.f32.mrb[97].mxu0  ;;  %7412 = vmatmul.mubr.msk.f32.gmra.mrb[202].mxu0 %vm643_vm1, %v394_v52  ;;  %v624_v51 = vld [vmem:[%s8085_s10 + $0xd88] sm:$0xff]  ;;  %v401_v54 = vld [vmem:[%s8085_s10 + $0x690] sm:$0xff] }
 0x1d8   : > { %v5522_v63 = vmax.f32 %v5074_v55, 0.0  ;;  %v4623_v1 = vmul.f32 %v9442_v28, %v7590_v61  ;;  %v3658_v3 = vpop.f32.mrb[97].mxu1  ;;  %7748 = vmatmul.mubr.msk.f32.gmra.mrb[202].mxu1 %vm643_vm1, %v618_v53  ;;  %v5297_v4 = vmax.f32 %v4849_v58, 0.0  ;;  %v4398_v6 = vmul.f32 %v9442_v28, %v2538_v2  ;;  %7414 = vmatprep.mubr.msk.f32.mxu0 %vm643_vm1, %v395_v56  ;;  %v625_v55 = vld [vmem:[%s8085_s10 + $0xd90] sm:$0xff] }
 0x1d9   : > { %v5521_v5 = vmax.f32 %v5073_v59, 0.0  ;;  %v4622_v7 = vmul.f32 %v9442_v28, %v3658_v3  ;;  %7750 = vmatprep.mubr.msk.f32.mxu1 %vm643_vm1, %v619_v57  ;;  %5747 = vst.msk [vmem:[%s8573_s28 + $0x2f8] sm:$0xff] %vm5651_vm4, %v5298_v62  ;;  %v4852_v10 = vadd.f32 %v9461_v39, %v4399_v0 }
 0x1da   : > { %5971 = vst.msk [vmem:[%s8573_s28 + $0x9f8] sm:$0xff] %vm5651_vm4, %v5522_v63  ;;  %v5076_v11 = vadd.f32 %v9461_v39, %v4623_v1  ;;  %5746 = vst.msk [vmem:[%s8573_s28 + $0x2f0] sm:$0xff] %vm5651_vm4, %v5297_v4  ;;  %v4851_v14 = vadd.f32 %v9461_v39, %v4398_v6  ;;  %v7257_v16 = vpop.f32.mrb[98].mxu0  ;;  %v402_v6 = vld [vmem:[%s8085_s10 + $0x698] sm:$0xff] }
 0x1db   : > { %5970 = vst.msk [vmem:[%s8573_s28 + $0x9f0] sm:$0xff] %vm5651_vm4, %v5521_v5  ;;  %v5075_v15 = vadd.f32 %v9461_v39, %v4622_v7  ;;  %v7593_v17 = vpop.f32.mrb[98].mxu1  ;;  %v5300_v18 = vmax.f32 %v4852_v10, 0.0  ;;  %v4401_v20 = vmul.f32 %v9442_v28, %v7257_v16  ;;  %v2548_v25 = vpop.f32.mrb[99].mxu0  ;;  %7415 = vmatmul.mubr.msk.f32.gmra.mrb[204].mxu0 %vm643_vm1, %v396_v8  ;;  %v626_v7 = vld [vmem:[%s8085_s10 + $0xd98] sm:$0xff]  ;;  %v403_v10 = vld [vmem:[%s8085_s10 + $0x6a0] sm:$0xff] }
 0x1dc   : > { %v5524_v19 = vmax.f32 %v5076_v11, 0.0  ;;  %v4625_v21 = vmul.f32 %v9442_v28, %v7593_v17  ;;  %v3668_v22 = vpop.f32.mrb[99].mxu1  ;;  %7751 = vmatmul.mubr.msk.f32.gmra.mrb[204].mxu1 %vm643_vm1, %v620_v9  ;;  %v5299_v23 = vmax.f32 %v4851_v14, 0.0  ;;  %v4400_v24 = vmul.f32 %v9442_v28, %v2548_v25  ;;  %7417 = vmatprep.mubr.msk.f32.mxu0 %vm643_vm1, %v397_v12  ;;  %v627_v11 = vld [vmem:[%s8085_s10 + $0xda0] sm:$0xff] }
 0x1dd   : > { %v5523_v34 = vmax.f32 %v5075_v15, 0.0  ;;  %v4624_v26 = vmul.f32 %v9442_v28, %v3668_v22  ;;  %7753 = vmatprep.mubr.msk.f32.mxu1 %vm643_vm1, %v621_v13  ;;  %5749 = vst.msk [vmem:[%s8573_s28 + $0x308] sm:$0xff] %vm5651_vm4, %v5300_v18  ;;  %v4854_v31 = vadd.f32 %v9461_v39, %v4401_v20 }
 0x1de   : > { %5973 = vst.msk [vmem:[%s8573_s28 + $0xa08] sm:$0xff] %vm5651_vm4, %v5524_v19  ;;  %v5078_v30 = vadd.f32 %v9461_v39, %v4625_v21  ;;  %5748 = vst.msk [vmem:[%s8573_s28 + $0x300] sm:$0xff] %vm5651_vm4, %v5299_v23  ;;  %v4853_v35 = vadd.f32 %v9461_v39, %v4400_v24  ;;  %v7260_v37 = vpop.f32.mrb[100].mxu0  ;;  %v404_v24 = vld [vmem:[%s8085_s10 + $0x6a8] sm:$0xff] }
 0x1df   : > { %5972 = vst.msk [vmem:[%s8573_s28 + $0xa00] sm:$0xff] %vm5651_vm4, %v5523_v34  ;;  %v5077_v36 = vadd.f32 %v9461_v39, %v4624_v26  ;;  %v7596_v38 = vpop.f32.mrb[100].mxu1  ;;  %v5302_v40 = vmax.f32 %v4854_v31, 0.0  ;;  %v4403_v42 = vmul.f32 %v9442_v28, %v7260_v37  ;;  %v2558_v44 = vpop.f32.mrb[101].mxu0  ;;  %7418 = vmatmul.mubr.msk.f32.gmra.mrb[206].mxu0 %vm643_vm1, %v398_v27  ;;  %v628_v26 = vld [vmem:[%s8085_s10 + $0xda8] sm:$0xff]  ;;  %v405_v31 = vld [vmem:[%s8085_s10 + $0x6b0] sm:$0xff] }
 0x1e0   : > { %v5526_v41 = vmax.f32 %v5078_v30, 0.0  ;;  %v4627_v43 = vmul.f32 %v9442_v28, %v7596_v38  ;;  %v3678_v45 = vpop.f32.mrb[101].mxu1  ;;  %7754 = vmatmul.mubr.msk.f32.gmra.mrb[206].mxu1 %vm643_vm1, %v622_v29  ;;  %v5301_v46 = vmax.f32 %v4853_v35, 0.0  ;;  %v4402_v48 = vmul.f32 %v9442_v28, %v2558_v44  ;;  %7420 = vmatprep.mubr.msk.f32.mxu0 %vm643_vm1, %v399_v32  ;;  %v629_v30 = vld [vmem:[%s8085_s10 + $0xdb0] sm:$0xff] }
 0x1e1   : > { %v5525_v47 = vmax.f32 %v5077_v36, 0.0  ;;  %v4626_v49 = vmul.f32 %v9442_v28, %v3678_v45  ;;  %7756 = vmatprep.mubr.msk.f32.mxu1 %vm643_vm1, %v623_v33  ;;  %5751 = vst.msk [vmem:[%s8573_s28 + $0x318] sm:$0xff] %vm5651_vm4, %v5302_v40  ;;  %v4856_v52 = vadd.f32 %v9461_v39, %v4403_v42 }
 0x1e2   : > { %5975 = vst.msk [vmem:[%s8573_s28 + $0xa18] sm:$0xff] %vm5651_vm4, %v5526_v41  ;;  %v5080_v53 = vadd.f32 %v9461_v39, %v4627_v43  ;;  %5750 = vst.msk [vmem:[%s8573_s28 + $0x310] sm:$0xff] %vm5651_vm4, %v5301_v46  ;;  %v4855_v56 = vadd.f32 %v9461_v39, %v4402_v48  ;;  %v7263_v58 = vpop.f32.mrb[102].mxu0  ;;  %v406_v48 = vld [vmem:[%s8085_s10 + $0x6b8] sm:$0xff] }
 0x1e3   : > { %5974 = vst.msk [vmem:[%s8573_s28 + $0xa10] sm:$0xff] %vm5651_vm4, %v5525_v47  ;;  %v5079_v57 = vadd.f32 %v9461_v39, %v4626_v49  ;;  %v7599_v59 = vpop.f32.mrb[102].mxu1  ;;  %v5304_v60 = vmax.f32 %v4856_v52, 0.0  ;;  %v4405_v62 = vmul.f32 %v9442_v28, %v7263_v58  ;;  %v2568_v0 = vpop.f32.mrb[103].mxu0  ;;  %7421 = vmatmul.mubr.msk.f32.gmra.mrb[208].mxu0 %vm643_vm1, %v400_v50  ;;  %v630_v49 = vld [vmem:[%s8085_s10 + $0xdb8] sm:$0xff]  ;;  %v407_v52 = vld [vmem:[%s8085_s10 + $0x6c0] sm:$0xff] }
 0x1e4   : > { %v5528_v61 = vmax.f32 %v5080_v53, 0.0  ;;  %v4629_v63 = vmul.f32 %v9442_v28, %v7599_v59  ;;  %v3688_v1 = vpop.f32.mrb[103].mxu1  ;;  %7757 = vmatmul.mubr.msk.f32.gmra.mrb[208].mxu1 %vm643_vm1, %v624_v51  ;;  %v5303_v2 = vmax.f32 %v4855_v56, 0.0  ;;  %v4404_v4 = vmul.f32 %v9442_v28, %v2568_v0  ;;  %7423 = vmatprep.mubr.msk.f32.mxu0 %vm643_vm1, %v401_v54  ;;  %v631_v53 = vld [vmem:[%s8085_s10 + $0xdc0] sm:$0xff] }
 0x1e5   : > { %v5527_v3 = vmax.f32 %v5079_v57, 0.0  ;;  %v4628_v5 = vmul.f32 %v9442_v28, %v3688_v1  ;;  %7759 = vmatprep.mubr.msk.f32.mxu1 %vm643_vm1, %v625_v55  ;;  %5753 = vst.msk [vmem:[%s8573_s28 + $0x328] sm:$0xff] %vm5651_vm4, %v5304_v60  ;;  %v4858_v8 = vadd.f32 %v9461_v39, %v4405_v62 }
 0x1e6   : > { %5977 = vst.msk [vmem:[%s8573_s28 + $0xa28] sm:$0xff] %vm5651_vm4, %v5528_v61  ;;  %v5082_v9 = vadd.f32 %v9461_v39, %v4629_v63  ;;  %5752 = vst.msk [vmem:[%s8573_s28 + $0x320] sm:$0xff] %vm5651_vm4, %v5303_v2  ;;  %v4857_v12 = vadd.f32 %v9461_v39, %v4404_v4  ;;  %v7266_v14 = vpop.f32.mrb[104].mxu0  ;;  %v408_v4 = vld [vmem:[%s8085_s10 + $0x6c8] sm:$0xff] }
 0x1e7   : > { %5976 = vst.msk [vmem:[%s8573_s28 + $0xa20] sm:$0xff] %vm5651_vm4, %v5527_v3  ;;  %v5081_v13 = vadd.f32 %v9461_v39, %v4628_v5  ;;  %v7602_v15 = vpop.f32.mrb[104].mxu1  ;;  %v5306_v16 = vmax.f32 %v4858_v8, 0.0  ;;  %v4407_v18 = vmul.f32 %v9442_v28, %v7266_v14  ;;  %v2578_v20 = vpop.f32.mrb[105].mxu0  ;;  %7424 = vmatmul.mubr.msk.f32.gmra.mrb[210].mxu0 %vm643_vm1, %v402_v6  ;;  %v632_v5 = vld [vmem:[%s8085_s10 + $0xdc8] sm:$0xff]  ;;  %v409_v8 = vld [vmem:[%s8085_s10 + $0x6d0] sm:$0xff] }
 0x1e8   : > { %v5530_v17 = vmax.f32 %v5082_v9, 0.0  ;;  %v4631_v19 = vmul.f32 %v9442_v28, %v7602_v15  ;;  %v3698_v21 = vpop.f32.mrb[105].mxu1  ;;  %7760 = vmatmul.mubr.msk.f32.gmra.mrb[210].mxu1 %vm643_vm1, %v626_v7  ;;  %v5305_v25 = vmax.f32 %v4857_v12, 0.0  ;;  %v4406_v23 = vmul.f32 %v9442_v28, %v2578_v20  ;;  %7426 = vmatprep.mubr.msk.f32.mxu0 %vm643_vm1, %v403_v10  ;;  %v633_v9 = vld [vmem:[%s8085_s10 + $0xdd0] sm:$0xff] }
 0x1e9   : > { %v5529_v22 = vmax.f32 %v5081_v13, 0.0  ;;  %v4630_v34 = vmul.f32 %v9442_v28, %v3698_v21  ;;  %7762 = vmatprep.mubr.msk.f32.mxu1 %vm643_vm1, %v627_v11  ;;  %5755 = vst.msk [vmem:[%s8573_s28 + $0x338] sm:$0xff] %vm5651_vm4, %v5306_v16  ;;  %v4860_v27 = vadd.f32 %v9461_v39, %v4407_v18 }
 0x1ea   : > { %5979 = vst.msk [vmem:[%s8573_s28 + $0xa38] sm:$0xff] %vm5651_vm4, %v5530_v17  ;;  %v5084_v29 = vadd.f32 %v9461_v39, %v4631_v19  ;;  %5754 = vst.msk [vmem:[%s8573_s28 + $0x330] sm:$0xff] %vm5651_vm4, %v5305_v25  ;;  %v4859_v32 = vadd.f32 %v9461_v39, %v4406_v23  ;;  %v7269_v35 = vpop.f32.mrb[106].mxu0  ;;  %v9888_v25 = vld [vmem:[%s10907_s2] ss:$0 sm:$0xff]  ;;  %v410_v23 = vld [vmem:[%s8085_s10 + $0x6d8] sm:$0xff] }
 0x1eb   : > { %5978 = vst.msk [vmem:[%s8573_s28 + $0xa30] sm:$0xff] %vm5651_vm4, %v5529_v22  ;;  %v5083_v33 = vadd.f32 %v9461_v39, %v4630_v34  ;;  %v7605_v36 = vpop.f32.mrb[106].mxu1  ;;  %v5308_v37 = vmax.f32 %v4860_v27, 0.0  ;;  %v4409_v40 = vmul.f32 %v9442_v28, %v7269_v35  ;;  %v2588_v42 = vpop.f32.mrb[107].mxu0  ;;  %7427 = vmatmul.mubr.msk.f32.gmra.mrb[212].mxu0 %vm643_vm1, %v404_v24  ;;  %v634_v34 = vld [vmem:[%s8085_s10 + $0xdd8] sm:$0xff]  ;;  %v411_v27 = vld [vmem:[%s8085_s10 + $0x6e0] sm:$0xff] }
 0x1ec   : > { %v5532_v38 = vmax.f32 %v5084_v29, 0.0  ;;  %v4633_v41 = vmul.f32 %v9442_v28, %v7605_v36  ;;  %v3708_v43 = vpop.f32.mrb[107].mxu1  ;;  %7763 = vmatmul.mubr.msk.f32.gmra.mrb[212].mxu1 %vm643_vm1, %v628_v26  ;;  %v5307_v44 = vmax.f32 %v4859_v32, 0.0  ;;  %v4408_v46 = vmul.f32 %v9442_v28, %v2588_v42  ;;  %7429 = vmatprep.mubr.msk.f32.mxu0 %vm643_vm1, %v405_v31  ;;  %v635_v29 = vld [vmem:[%s8085_s10 + $0xde0] sm:$0xff] }
 0x1ed   : > { %v5531_v45 = vmax.f32 %v5083_v33, 0.0  ;;  %v4632_v47 = vmul.f32 %v9442_v28, %v3708_v43  ;;  %7765 = vmatprep.mubr.msk.f32.mxu1 %vm643_vm1, %v629_v30  ;;  %5757 = vst.msk [vmem:[%s8573_s28 + $0x348] sm:$0xff] %vm5651_vm4, %v5308_v37  ;;  %v4862_v50 = vadd.f32 %v9461_v39, %v4409_v40 }
 0x1ee   : > { %5981 = vst.msk [vmem:[%s8573_s28 + $0xa48] sm:$0xff] %vm5651_vm4, %v5532_v38  ;;  %v5086_v51 = vadd.f32 %v9461_v39, %v4633_v41  ;;  %5756 = vst.msk [vmem:[%s8573_s28 + $0x340] sm:$0xff] %vm5651_vm4, %v5307_v44  ;;  %v4861_v54 = vadd.f32 %v9461_v39, %v4408_v46  ;;  %v7272_v56 = vpop.f32.mrb[108].mxu0  ;;  %v636_v46 = vld [vmem:[%s8085_s10 + $0xde8] sm:$0xff] }
 0x1ef   : > { %5980 = vst.msk [vmem:[%s8573_s28 + $0xa40] sm:$0xff] %vm5651_vm4, %v5531_v45  ;;  %v5085_v55 = vadd.f32 %v9461_v39, %v4632_v47  ;;  %v7608_v57 = vpop.f32.mrb[108].mxu1  ;;  %v5310_v58 = vmax.f32 %v4862_v50, 0.0  ;;  %v4411_v60 = vmul.f32 %v9442_v28, %v7272_v56  ;;  %v2598_v62 = vpop.f32.mrb[109].mxu0  ;;  %7430 = vmatmul.mubr.msk.f32.gmra.mrb[214].mxu0 %vm643_vm1, %v406_v48  ;;  %v412_v45 = vld [vmem:[%s8085_s10 + $0x6e8] sm:$0xff]  ;;  %v413_v50 = vld [vmem:[%s8085_s10 + $0x6f0] sm:$0xff] }
 0x1f0   : > { %v5534_v59 = vmax.f32 %v5086_v51, 0.0  ;;  %v4635_v61 = vmul.f32 %v9442_v28, %v7608_v57  ;;  %v3718_v63 = vpop.f32.mrb[109].mxu1  ;;  %7766 = vmatmul.mubr.msk.f32.gmra.mrb[214].mxu1 %vm643_vm1, %v630_v49  ;;  %v5309_v0 = vmax.f32 %v4861_v54, 0.0  ;;  %v4410_v2 = vmul.f32 %v9442_v28, %v2598_v62  ;;  %7432 = vmatprep.mubr.msk.f32.mxu0 %vm643_vm1, %v407_v52  ;;  %v9927_v47 = vld [vmem:[%s10907_s2 + $0x1] ss:$0 sm:$0xff]  ;;  %v637_v51 = vld [vmem:[%s8085_s10 + $0xdf0] sm:$0xff] }
 0x1f1   : > { %v5533_v1 = vmax.f32 %v5085_v55, 0.0  ;;  %v4634_v3 = vmul.f32 %v9442_v28, %v3718_v63  ;;  %7768 = vmatprep.mubr.msk.f32.mxu1 %vm643_vm1, %v631_v53  ;;  %5759 = vst.msk [vmem:[%s8573_s28 + $0x358] sm:$0xff] %vm5651_vm4, %v5310_v58  ;;  %v4864_v6 = vadd.f32 %v9461_v39, %v4411_v60 }
 0x1f2   : > { %5983 = vst.msk [vmem:[%s8573_s28 + $0xa58] sm:$0xff] %vm5651_vm4, %v5534_v59  ;;  %v5088_v7 = vadd.f32 %v9461_v39, %v4635_v61  ;;  %5758 = vst.msk [vmem:[%s8573_s28 + $0x350] sm:$0xff] %vm5651_vm4, %v5309_v0  ;;  %v4863_v10 = vadd.f32 %v9461_v39, %v4410_v2  ;;  %v7275_v12 = vpop.f32.mrb[110].mxu0  ;;  %v414_v2 = vld [vmem:[%s8085_s10 + $0x6f8] sm:$0xff] }
 0x1f3   : > { %5982 = vst.msk [vmem:[%s8573_s28 + $0xa50] sm:$0xff] %vm5651_vm4, %v5533_v1  ;;  %v5087_v11 = vadd.f32 %v9461_v39, %v4634_v3  ;;  %v7611_v13 = vpop.f32.mrb[110].mxu1  ;;  %v5312_v14 = vmax.f32 %v4864_v6, 0.0  ;;  %v4413_v16 = vmul.f32 %v9442_v28, %v7275_v12  ;;  %v2608_v18 = vpop.f32.mrb[111].mxu0  ;;  %7433 = vmatmul.mubr.msk.f32.gmra.mrb[216].mxu0 %vm643_vm1, %v408_v4  ;;  %v638_v3 = vld [vmem:[%s8085_s10 + $0xdf8] sm:$0xff]  ;;  %s7893_s10 = scalar_lea.vmem %s7892_s20, 114688 }
 0x1f4   : > { %v5536_v15 = vmax.f32 %v5088_v7, 0.0  ;;  %v4637_v17 = vmul.f32 %v9442_v28, %v7611_v13  ;;  %v3728_v19 = vpop.f32.mrb[111].mxu1  ;;  %7769 = vmatmul.mubr.msk.f32.gmra.mrb[216].mxu1 %vm643_vm1, %v632_v5  ;;  %v5311_v20 = vmax.f32 %v4863_v10, 0.0  ;;  %v4412_v22 = vmul.f32 %v9888_v25, %v2608_v18  ;;  %7435 = vmatprep.mubr.msk.f32.mxu0 %vm643_vm1, %v409_v8  ;;  %p7895_p9 = scmp.lt.s32.totalorder %s7893_s10, %s7887_s19 }
 0x1f5   : > { %v5535_v21 = vmax.f32 %v5087_v11, 0.0  ;;  %v4636_v28 = vmul.f32 %v9888_v25, %v3728_v19  ;;  %7771 = vmatprep.mubr.msk.f32.mxu1 %vm643_vm1, %v633_v9  ;;  %5761 = vst.msk [vmem:[%s8573_s28 + $0x368] sm:$0xff] %vm5651_vm4, %v5312_v14  ;;  %v4866_v24 = vadd.f32 %v9461_v39, %v4413_v16 }
 0x1f6   : > { %5985 = vst.msk [vmem:[%s8573_s28 + $0xa68] sm:$0xff] %vm5651_vm4, %v5536_v15  ;;  %v5090_v26 = vadd.f32 %v9461_v39, %v4637_v17  ;;  %5760 = vst.msk [vmem:[%s8573_s28 + $0x360] sm:$0xff] %vm5651_vm4, %v5311_v20  ;;  %v4865_v31 = vadd.f32 %v9461_v39, %v4412_v22  ;;  %v7278_v32 = vpop.f32.mrb[112].mxu0  ;;  %p7896_p13 = por %p7895_p9, %p7894_p8 }
 0x1f7   : > { %5984 = vst.msk [vmem:[%s8573_s28 + $0xa60] sm:$0xff] %vm5651_vm4, %v5535_v21  ;;  %v5089_v30 = vadd.f32 %v9461_v39, %v4636_v28  ;;  %v7614_v33 = vpop.f32.mrb[112].mxu1  ;;  %v5314_v35 = vmax.f32 %v4866_v24, 0.0  ;;  %v4415_v37 = vmul.f32 %v9888_v25, %v7278_v32  ;;  %v2618_v40 = vpop.f32.mrb[113].mxu0  ;;  %7436 = vmatmul.mubr.msk.f32.gmra.mrb[218].mxu0 %vm643_vm1, %v410_v23 }
 0x1f8   : > { %v5538_v36 = vmax.f32 %v5090_v26, 0.0  ;;  %v4639_v38 = vmul.f32 %v9888_v25, %v7614_v33  ;;  %v3738_v41 = vpop.f32.mrb[113].mxu1  ;;  %7772 = vmatmul.mubr.msk.f32.gmra.mrb[218].mxu1 %vm643_vm1, %v634_v34  ;;  %v5313_v39 = vmax.f32 %v4865_v31, 0.0  ;;  %v4414_v43 = vmul.f32 %v9888_v25, %v2618_v40  ;;  %7438 = vmatprep.mubr.msk.f32.mxu0 %vm643_vm1, %v411_v27  ;;  %p7897_p1 = pnand %p7896_p13, %p7890_p12 }
 0x1f9   : > { %v5537_v42 = vmax.f32 %v5089_v30, 0.0  ;;  %v4638_v44 = vmul.f32 %v9888_v25, %v3738_v41  ;;  %7774 = vmatprep.mubr.msk.f32.mxu1 %vm643_vm1, %v635_v29  ;;  %5763 = vst.msk [vmem:[%s8573_s28 + $0x378] sm:$0xff] %vm5651_vm4, %v5314_v35  ;;  %v4868_v48 = vadd.f32 %v9927_v47, %v4415_v37 }
 0x1fa   : > { %5987 = vst.msk [vmem:[%s8573_s28 + $0xa78] sm:$0xff] %vm5651_vm4, %v5538_v36  ;;  %v5092_v49 = vadd.f32 %v9927_v47, %v4639_v38  ;;  %5762 = vst.msk [vmem:[%s8573_s28 + $0x370] sm:$0xff] %vm5651_vm4, %v5313_v39  ;;  %v4867_v52 = vadd.f32 %v9927_v47, %v4414_v43  ;;  %v7281_v54 = vpop.f32.mrb[114].mxu0 }
 0x1fb   : > { %5986 = vst.msk [vmem:[%s8573_s28 + $0xa70] sm:$0xff] %vm5651_vm4, %v5537_v42  ;;  %v5091_v53 = vadd.f32 %v9927_v47, %v4638_v44  ;;  %v7617_v55 = vpop.f32.mrb[114].mxu1  ;;  %v5316_v56 = vmax.f32 %v4868_v48, 0.0  ;;  %v4417_v58 = vmul.f32 %v9888_v25, %v7281_v54  ;;  %v2628_v60 = vpop.f32.mrb[115].mxu0  ;;  %7439 = vmatmul.mubr.msk.f32.gmra.mrb[220].mxu0 %vm643_vm1, %v412_v45 }
 0x1fc   : > { %v5540_v57 = vmax.f32 %v5092_v49, 0.0  ;;  %v4641_v59 = vmul.f32 %v9888_v25, %v7617_v55  ;;  %v3748_v61 = vpop.f32.mrb[115].mxu1  ;;  %7775 = vmatmul.mubr.msk.f32.gmra.mrb[220].mxu1 %vm643_vm1, %v636_v46  ;;  %v5315_v62 = vmax.f32 %v4867_v52, 0.0  ;;  %v4416_v0 = vmul.f32 %v9888_v25, %v2628_v60  ;;  %7441 = vmatprep.mubr.msk.f32.mxu0 %vm643_vm1, %v413_v50 }
 0x1fd   : > { %v5539_v63 = vmax.f32 %v5091_v53, 0.0  ;;  %v4640_v1 = vmul.f32 %v9888_v25, %v3748_v61  ;;  %7777 = vmatprep.mubr.msk.f32.mxu1 %vm643_vm1, %v637_v51  ;;  %5765 = vst.msk [vmem:[%s8573_s28 + $0x388] sm:$0xff] %vm5651_vm4, %v5316_v56  ;;  %v4870_v4 = vadd.f32 %v9927_v47, %v4417_v58 }
 0x1fe   : > { %5989 = vst.msk [vmem:[%s8573_s28 + $0xa88] sm:$0xff] %vm5651_vm4, %v5540_v57  ;;  %v5094_v5 = vadd.f32 %v9927_v47, %v4641_v59  ;;  %5764 = vst.msk [vmem:[%s8573_s28 + $0x380] sm:$0xff] %vm5651_vm4, %v5315_v62  ;;  %v4869_v6 = vadd.f32 %v9927_v47, %v4416_v0  ;;  %v7284_v8 = vpop.f32.mrb[116].mxu0 }
 0x1ff   : > { %5988 = vst.msk [vmem:[%s8573_s28 + $0xa80] sm:$0xff] %vm5651_vm4, %v5539_v63  ;;  %v5093_v7 = vadd.f32 %v9927_v47, %v4640_v1  ;;  %v7620_v9 = vpop.f32.mrb[116].mxu1  ;;  %v5318_v10 = vmax.f32 %v4870_v4, 0.0  ;;  %v4419_v12 = vmul.f32 %v9888_v25, %v7284_v8  ;;  %v2638_v14 = vpop.f32.mrb[117].mxu0  ;;  %7442 = vmatmul.mubr.msk.f32.gmra.mrb[222].mxu0 %vm643_vm1, %v414_v2 }
 0x200   : > { %v5542_v11 = vmax.f32 %v5094_v5, 0.0  ;;  %v4643_v13 = vmul.f32 %v9888_v25, %v7620_v9  ;;  %v3758_v15 = vpop.f32.mrb[117].mxu1  ;;  %7778 = vmatmul.mubr.msk.f32.gmra.mrb[222].mxu1 %vm643_vm1, %v638_v3  ;;  %v5317_v16 = vmax.f32 %v4869_v6, 0.0  ;;  %v4418_v18 = vmul.f32 %v9888_v25, %v2638_v14 }
 0x201   : > { %v5541_v17 = vmax.f32 %v5093_v7, 0.0  ;;  %v4642_v19 = vmul.f32 %v9888_v25, %v3758_v15  ;;  %5767 = vst.msk [vmem:[%s8573_s28 + $0x398] sm:$0xff] %vm5651_vm4, %v5318_v10  ;;  %v4872_v20 = vadd.f32 %v9927_v47, %v4419_v12 }
 0x202   : > { %5991 = vst.msk [vmem:[%s8573_s28 + $0xa98] sm:$0xff] %vm5651_vm4, %v5542_v11  ;;  %v5096_v21 = vadd.f32 %v9927_v47, %v4643_v13  ;;  %5766 = vst.msk [vmem:[%s8573_s28 + $0x390] sm:$0xff] %vm5651_vm4, %v5317_v16  ;;  %v4871_v22 = vadd.f32 %v9927_v47, %v4418_v18  ;;  %v7287_v23 = vpop.f32.mrb[118].mxu0 }
 0x203   : > { %5990 = vst.msk [vmem:[%s8573_s28 + $0xa90] sm:$0xff] %vm5651_vm4, %v5541_v17  ;;  %v5095_v28 = vadd.f32 %v9927_v47, %v4642_v19  ;;  %v7623_v34 = vpop.f32.mrb[118].mxu1  ;;  %v5320_v24 = vmax.f32 %v4872_v20, 0.0  ;;  %v4421_v27 = vmul.f32 %v9888_v25, %v7287_v23  ;;  %v2648_v31 = vpop.f32.mrb[119].mxu0 }
 0x204   : > { %v5544_v26 = vmax.f32 %v5096_v21, 0.0  ;;  %v4645_v29 = vmul.f32 %v9888_v25, %v7623_v34  ;;  %v3768_v30 = vpop.f32.mrb[119].mxu1  ;;  %v5319_v32 = vmax.f32 %v4871_v22, 0.0  ;;  %v4420_v35 = vmul.f32 %v9888_v25, %v2648_v31 }
 0x205   : > { %v5543_v33 = vmax.f32 %v5095_v28, 0.0  ;;  %v4644_v36 = vmul.f32 %v9888_v25, %v3768_v30  ;;  %5769 = vst.msk [vmem:[%s8573_s28 + $0x3a8] sm:$0xff] %vm5651_vm4, %v5320_v24  ;;  %v4874_v37 = vadd.f32 %v9927_v47, %v4421_v27 }
 0x206   : > { %5993 = vst.msk [vmem:[%s8573_s28 + $0xaa8] sm:$0xff] %vm5651_vm4, %v5544_v26  ;;  %v5098_v38 = vadd.f32 %v9927_v47, %v4645_v29  ;;  %5768 = vst.msk [vmem:[%s8573_s28 + $0x3a0] sm:$0xff] %vm5651_vm4, %v5319_v32  ;;  %v4873_v40 = vadd.f32 %v9927_v47, %v4420_v35  ;;  %v7290_v39 = vpop.f32.mrb[120].mxu0 }
 0x207   : > { %5992 = vst.msk [vmem:[%s8573_s28 + $0xaa0] sm:$0xff] %vm5651_vm4, %v5543_v33  ;;  %v5097_v41 = vadd.f32 %v9927_v47, %v4644_v36  ;;  %v7626_v42 = vpop.f32.mrb[120].mxu1  ;;  %v5322_v43 = vmax.f32 %v4874_v37, 0.0  ;;  %v4423_v45 = vmul.f32 %v9888_v25, %v7290_v39  ;;  %v2658_v48 = vpop.f32.mrb[121].mxu0 }
 0x208   : > { %v5546_v44 = vmax.f32 %v5098_v38, 0.0  ;;  %v4647_v46 = vmul.f32 %v9888_v25, %v7626_v42  ;;  %v3778_v49 = vpop.f32.mrb[121].mxu1  ;;  %v5321_v50 = vmax.f32 %v4873_v40, 0.0  ;;  %v4422_v52 = vmul.f32 %v9888_v25, %v2658_v48 }
 0x209   : > { %v5545_v51 = vmax.f32 %v5097_v41, 0.0  ;;  %v4646_v53 = vmul.f32 %v9888_v25, %v3778_v49  ;;  %5771 = vst.msk [vmem:[%s8573_s28 + $0x3b8] sm:$0xff] %vm5651_vm4, %v5322_v43  ;;  %v4876_v54 = vadd.f32 %v9927_v47, %v4423_v45 }
 0x20a   : > { %5995 = vst.msk [vmem:[%s8573_s28 + $0xab8] sm:$0xff] %vm5651_vm4, %v5546_v44  ;;  %v5100_v55 = vadd.f32 %v9927_v47, %v4647_v46  ;;  %5770 = vst.msk [vmem:[%s8573_s28 + $0x3b0] sm:$0xff] %vm5651_vm4, %v5321_v50  ;;  %v4875_v56 = vadd.f32 %v9927_v47, %v4422_v52  ;;  %v7293_v58 = vpop.f32.mrb[122].mxu0 }
 0x20b   : > { %5994 = vst.msk [vmem:[%s8573_s28 + $0xab0] sm:$0xff] %vm5651_vm4, %v5545_v51  ;;  %v5099_v57 = vadd.f32 %v9927_v47, %v4646_v53  ;;  %v7629_v59 = vpop.f32.mrb[122].mxu1  ;;  %v5324_v60 = vmax.f32 %v4876_v54, 0.0  ;;  %v4425_v62 = vmul.f32 %v9888_v25, %v7293_v58  ;;  %v2668_v0 = vpop.f32.mrb[123].mxu0 }
 0x20c   : > { %v5548_v61 = vmax.f32 %v5100_v55, 0.0  ;;  %v4649_v63 = vmul.f32 %v9888_v25, %v7629_v59  ;;  %v3788_v1 = vpop.f32.mrb[123].mxu1  ;;  %v5323_v2 = vmax.f32 %v4875_v56, 0.0  ;;  %v4424_v4 = vmul.f32 %v9888_v25, %v2668_v0 }
 0x20d   : > { %v5547_v3 = vmax.f32 %v5099_v57, 0.0  ;;  %v4648_v5 = vmul.f32 %v9888_v25, %v3788_v1  ;;  %5773 = vst.msk [vmem:[%s8573_s28 + $0x3c8] sm:$0xff] %vm5651_vm4, %v5324_v60  ;;  %v4878_v6 = vadd.f32 %v9927_v47, %v4425_v62 }
 0x20e   : > { %5997 = vst.msk [vmem:[%s8573_s28 + $0xac8] sm:$0xff] %vm5651_vm4, %v5548_v61  ;;  %v5102_v7 = vadd.f32 %v9927_v47, %v4649_v63  ;;  %5772 = vst.msk [vmem:[%s8573_s28 + $0x3c0] sm:$0xff] %vm5651_vm4, %v5323_v2  ;;  %v4877_v8 = vadd.f32 %v9927_v47, %v4424_v4  ;;  %v7296_v10 = vpop.f32.mrb[124].mxu0 }
 0x20f   : > { %5996 = vst.msk [vmem:[%s8573_s28 + $0xac0] sm:$0xff] %vm5651_vm4, %v5547_v3  ;;  %v5101_v9 = vadd.f32 %v9927_v47, %v4648_v5  ;;  %v7632_v11 = vpop.f32.mrb[124].mxu1  ;;  %v5326_v12 = vmax.f32 %v4878_v6, 0.0  ;;  %v4427_v14 = vmul.f32 %v9888_v25, %v7296_v10  ;;  %v2678_v16 = vpop.f32.mrb[125].mxu0 }
 0x210   : > { %v5550_v13 = vmax.f32 %v5102_v7, 0.0  ;;  %v4651_v15 = vmul.f32 %v9888_v25, %v7632_v11  ;;  %v3798_v17 = vpop.f32.mrb[125].mxu1  ;;  %v5325_v18 = vmax.f32 %v4877_v8, 0.0  ;;  %v4426_v20 = vmul.f32 %v9888_v25, %v2678_v16 }
 0x211   : > { %v5549_v19 = vmax.f32 %v5101_v9, 0.0  ;;  %v4650_v21 = vmul.f32 %v9888_v25, %v3798_v17  ;;  %5775 = vst.msk [vmem:[%s8573_s28 + $0x3d8] sm:$0xff] %vm5651_vm4, %v5326_v12  ;;  %v4880_v22 = vadd.f32 %v9927_v47, %v4427_v14 }
 0x212   : > { %5999 = vst.msk [vmem:[%s8573_s28 + $0xad8] sm:$0xff] %vm5651_vm4, %v5550_v13  ;;  %v5104_v28 = vadd.f32 %v9927_v47, %v4651_v15  ;;  %5774 = vst.msk [vmem:[%s8573_s28 + $0x3d0] sm:$0xff] %vm5651_vm4, %v5325_v18  ;;  %v4879_v23 = vadd.f32 %v9927_v47, %v4426_v20  ;;  %v7299_v24 = vpop.f32.mrb[126].mxu0 }
 0x213   : > { %5998 = vst.msk [vmem:[%s8573_s28 + $0xad0] sm:$0xff] %vm5651_vm4, %v5549_v19  ;;  %v5103_v34 = vadd.f32 %v9927_v47, %v4650_v21  ;;  %v7635_v26 = vpop.f32.mrb[126].mxu1  ;;  %v5328_v27 = vmax.f32 %v4880_v22, 0.0  ;;  %v4429_v31 = vmul.f32 %v9888_v25, %v7299_v24  ;;  %v2688_v32 = vpop.f32.mrb[127].mxu0 }
 0x214   : > { %v5552_v29 = vmax.f32 %v5104_v28, 0.0  ;;  %v4653_v30 = vmul.f32 %v9888_v25, %v7635_v26  ;;  %v3808_v33 = vpop.f32.mrb[127].mxu1  ;;  %v5327_v35 = vmax.f32 %v4879_v23, 0.0  ;;  %v4428_v37 = vmul.f32 %v9888_v25, %v2688_v32 }
 0x215   : > { %v5551_v36 = vmax.f32 %v5103_v34, 0.0  ;;  %v4652_v38 = vmul.f32 %v9888_v25, %v3808_v33  ;;  %5777 = vst.msk [vmem:[%s8573_s28 + $0x3e8] sm:$0xff] %vm5651_vm4, %v5328_v27  ;;  %v4882_v40 = vadd.f32 %v9927_v47, %v4429_v31 }
 0x216   : > { %6001 = vst.msk [vmem:[%s8573_s28 + $0xae8] sm:$0xff] %vm5651_vm4, %v5552_v29  ;;  %v5106_v41 = vadd.f32 %v9927_v47, %v4653_v30  ;;  %5776 = vst.msk [vmem:[%s8573_s28 + $0x3e0] sm:$0xff] %vm5651_vm4, %v5327_v35  ;;  %v4881_v39 = vadd.f32 %v9927_v47, %v4428_v37  ;;  %v7302_v43 = vpop.f32.mrb[128].mxu0 }
 0x217   : > { %6000 = vst.msk [vmem:[%s8573_s28 + $0xae0] sm:$0xff] %vm5651_vm4, %v5551_v36  ;;  %v5105_v42 = vadd.f32 %v9927_v47, %v4652_v38  ;;  %v7638_v44 = vpop.f32.mrb[128].mxu1  ;;  %v5330_v45 = vmax.f32 %v4882_v40, 0.0  ;;  %v4431_v48 = vmul.f32 %v9888_v25, %v7302_v43  ;;  %v2698_v50 = vpop.f32.mrb[129].mxu0 }
 0x218   : > { %v5554_v46 = vmax.f32 %v5106_v41, 0.0  ;;  %v4655_v49 = vmul.f32 %v9888_v25, %v7638_v44  ;;  %v3818_v51 = vpop.f32.mrb[129].mxu1  ;;  %v5329_v52 = vmax.f32 %v4881_v39, 0.0  ;;  %v4430_v54 = vmul.f32 %v9888_v25, %v2698_v50 }
 0x219   : > { %v5553_v53 = vmax.f32 %v5105_v42, 0.0  ;;  %v4654_v55 = vmul.f32 %v9888_v25, %v3818_v51  ;;  %5779 = vst.msk [vmem:[%s8573_s28 + $0x3f8] sm:$0xff] %vm5651_vm4, %v5330_v45  ;;  %v4884_v56 = vadd.f32 %v9927_v47, %v4431_v48 }
 0x21a   : > { %6003 = vst.msk [vmem:[%s8573_s28 + $0xaf8] sm:$0xff] %vm5651_vm4, %v5554_v46  ;;  %v5108_v57 = vadd.f32 %v9927_v47, %v4655_v49  ;;  %5778 = vst.msk [vmem:[%s8573_s28 + $0x3f0] sm:$0xff] %vm5651_vm4, %v5329_v52  ;;  %v4883_v58 = vadd.f32 %v9927_v47, %v4430_v54  ;;  %v7305_v60 = vpop.f32.mrb[130].mxu0 }
 0x21b   : > { %6002 = vst.msk [vmem:[%s8573_s28 + $0xaf0] sm:$0xff] %vm5651_vm4, %v5553_v53  ;;  %v5107_v59 = vadd.f32 %v9927_v47, %v4654_v55  ;;  %v7641_v61 = vpop.f32.mrb[130].mxu1  ;;  %v5332_v62 = vmax.f32 %v4884_v56, 0.0  ;;  %v4433_v0 = vmul.f32 %v9888_v25, %v7305_v60  ;;  %v2708_v2 = vpop.f32.mrb[131].mxu0 }
 0x21c   : > { %v5556_v63 = vmax.f32 %v5108_v57, 0.0  ;;  %v4657_v1 = vmul.f32 %v9888_v25, %v7641_v61  ;;  %v3828_v3 = vpop.f32.mrb[131].mxu1  ;;  %v5331_v4 = vmax.f32 %v4883_v58, 0.0  ;;  %v4432_v6 = vmul.f32 %v9888_v25, %v2708_v2 }
 0x21d   : > { %v5555_v5 = vmax.f32 %v5107_v59, 0.0  ;;  %v4656_v7 = vmul.f32 %v9888_v25, %v3828_v3  ;;  %5781 = vst.msk [vmem:[%s8573_s28 + $0x408] sm:$0xff] %vm5651_vm4, %v5332_v62  ;;  %v4886_v8 = vadd.f32 %v9927_v47, %v4433_v0 }
 0x21e   : > { %6005 = vst.msk [vmem:[%s8573_s28 + $0xb08] sm:$0xff] %vm5651_vm4, %v5556_v63  ;;  %v5110_v9 = vadd.f32 %v9927_v47, %v4657_v1  ;;  %5780 = vst.msk [vmem:[%s8573_s28 + $0x400] sm:$0xff] %vm5651_vm4, %v5331_v4  ;;  %v4885_v10 = vadd.f32 %v9927_v47, %v4432_v6  ;;  %v7308_v12 = vpop.f32.mrb[132].mxu0 }
 0x21f   : > { %6004 = vst.msk [vmem:[%s8573_s28 + $0xb00] sm:$0xff] %vm5651_vm4, %v5555_v5  ;;  %v5109_v11 = vadd.f32 %v9927_v47, %v4656_v7  ;;  %v7644_v13 = vpop.f32.mrb[132].mxu1  ;;  %v5334_v14 = vmax.f32 %v4886_v8, 0.0  ;;  %v4435_v16 = vmul.f32 %v9888_v25, %v7308_v12  ;;  %v2718_v18 = vpop.f32.mrb[133].mxu0 }
 0x220   : > { %v5558_v15 = vmax.f32 %v5110_v9, 0.0  ;;  %v4659_v17 = vmul.f32 %v9888_v25, %v7644_v13  ;;  %v3838_v19 = vpop.f32.mrb[133].mxu1  ;;  %v5333_v20 = vmax.f32 %v4885_v10, 0.0  ;;  %v4434_v22 = vmul.f32 %v9888_v25, %v2718_v18 }
 0x221   : > { %v5557_v21 = vmax.f32 %v5109_v11, 0.0  ;;  %v4658_v28 = vmul.f32 %v9888_v25, %v3838_v19  ;;  %5783 = vst.msk [vmem:[%s8573_s28 + $0x418] sm:$0xff] %vm5651_vm4, %v5334_v14  ;;  %v4888_v23 = vadd.f32 %v9927_v47, %v4435_v16 }
 0x222   : > { %6007 = vst.msk [vmem:[%s8573_s28 + $0xb18] sm:$0xff] %vm5651_vm4, %v5558_v15  ;;  %v5112_v34 = vadd.f32 %v9927_v47, %v4659_v17  ;;  %5782 = vst.msk [vmem:[%s8573_s28 + $0x410] sm:$0xff] %vm5651_vm4, %v5333_v20  ;;  %v4887_v24 = vadd.f32 %v9927_v47, %v4434_v22  ;;  %v7311_v27 = vpop.f32.mrb[134].mxu0 }
 0x223   : > { %6006 = vst.msk [vmem:[%s8573_s28 + $0xb10] sm:$0xff] %vm5651_vm4, %v5557_v21  ;;  %v5111_v26 = vadd.f32 %v9927_v47, %v4658_v28  ;;  %v7647_v29 = vpop.f32.mrb[134].mxu1  ;;  %v5336_v31 = vmax.f32 %v4888_v23, 0.0  ;;  %v4437_v32 = vmul.f32 %v9888_v25, %v7311_v27  ;;  %v2728_v35 = vpop.f32.mrb[135].mxu0 }
 0x224   : > { %v5560_v30 = vmax.f32 %v5112_v34, 0.0  ;;  %v4661_v33 = vmul.f32 %v9888_v25, %v7647_v29  ;;  %v3848_v36 = vpop.f32.mrb[135].mxu1  ;;  %v5335_v37 = vmax.f32 %v4887_v24, 0.0  ;;  %v4436_v40 = vmul.f32 %v9888_v25, %v2728_v35 }
 0x225   : > { %v5559_v38 = vmax.f32 %v5111_v26, 0.0  ;;  %v4660_v41 = vmul.f32 %v9888_v25, %v3848_v36  ;;  %5785 = vst.msk [vmem:[%s8573_s28 + $0x428] sm:$0xff] %vm5651_vm4, %v5336_v31  ;;  %v4890_v39 = vadd.f32 %v9927_v47, %v4437_v32 }
 0x226   : > { %6009 = vst.msk [vmem:[%s8573_s28 + $0xb28] sm:$0xff] %vm5651_vm4, %v5560_v30  ;;  %v5114_v42 = vadd.f32 %v9927_v47, %v4661_v33  ;;  %5784 = vst.msk [vmem:[%s8573_s28 + $0x420] sm:$0xff] %vm5651_vm4, %v5335_v37  ;;  %v4889_v43 = vadd.f32 %v9927_v47, %v4436_v40  ;;  %v7314_v45 = vpop.f32.mrb[136].mxu0 }
 0x227   : > { %6008 = vst.msk [vmem:[%s8573_s28 + $0xb20] sm:$0xff] %vm5651_vm4, %v5559_v38  ;;  %v5113_v44 = vadd.f32 %v9927_v47, %v4660_v41  ;;  %v7650_v46 = vpop.f32.mrb[136].mxu1  ;;  %v5338_v48 = vmax.f32 %v4890_v39, 0.0  ;;  %v4439_v50 = vmul.f32 %v9888_v25, %v7314_v45  ;;  %v2738_v52 = vpop.f32.mrb[137].mxu0 }
 0x228   : > { %v5562_v49 = vmax.f32 %v5114_v42, 0.0  ;;  %v4663_v51 = vmul.f32 %v9888_v25, %v7650_v46  ;;  %v3858_v53 = vpop.f32.mrb[137].mxu1  ;;  %v5337_v54 = vmax.f32 %v4889_v43, 0.0  ;;  %v4438_v56 = vmul.f32 %v9888_v25, %v2738_v52 }
 0x229   : > { %v5561_v55 = vmax.f32 %v5113_v44, 0.0  ;;  %v4662_v57 = vmul.f32 %v9888_v25, %v3858_v53  ;;  %5787 = vst.msk [vmem:[%s8573_s28 + $0x438] sm:$0xff] %vm5651_vm4, %v5338_v48  ;;  %v4892_v58 = vadd.f32 %v9927_v47, %v4439_v50 }
 0x22a   : > { %6011 = vst.msk [vmem:[%s8573_s28 + $0xb38] sm:$0xff] %vm5651_vm4, %v5562_v49  ;;  %v5116_v59 = vadd.f32 %v9927_v47, %v4663_v51  ;;  %5786 = vst.msk [vmem:[%s8573_s28 + $0x430] sm:$0xff] %vm5651_vm4, %v5337_v54  ;;  %v4891_v60 = vadd.f32 %v9927_v47, %v4438_v56  ;;  %v7317_v62 = vpop.f32.mrb[138].mxu0 }
 0x22b   : > { %6010 = vst.msk [vmem:[%s8573_s28 + $0xb30] sm:$0xff] %vm5651_vm4, %v5561_v55  ;;  %v5115_v61 = vadd.f32 %v9927_v47, %v4662_v57  ;;  %v7653_v63 = vpop.f32.mrb[138].mxu1  ;;  %v5340_v0 = vmax.f32 %v4892_v58, 0.0  ;;  %v4441_v2 = vmul.f32 %v9888_v25, %v7317_v62  ;;  %v2748_v4 = vpop.f32.mrb[139].mxu0 }
 0x22c   : > { %v5564_v1 = vmax.f32 %v5116_v59, 0.0  ;;  %v4665_v3 = vmul.f32 %v9888_v25, %v7653_v63  ;;  %v3868_v5 = vpop.f32.mrb[139].mxu1  ;;  %v5339_v6 = vmax.f32 %v4891_v60, 0.0  ;;  %v4440_v8 = vmul.f32 %v9888_v25, %v2748_v4 }
 0x22d   : > { %v5563_v7 = vmax.f32 %v5115_v61, 0.0  ;;  %v4664_v9 = vmul.f32 %v9888_v25, %v3868_v5  ;;  %5789 = vst.msk [vmem:[%s8573_s28 + $0x448] sm:$0xff] %vm5651_vm4, %v5340_v0  ;;  %v4894_v10 = vadd.f32 %v9927_v47, %v4441_v2 }
 0x22e   : > { %6013 = vst.msk [vmem:[%s8573_s28 + $0xb48] sm:$0xff] %vm5651_vm4, %v5564_v1  ;;  %v5118_v11 = vadd.f32 %v9927_v47, %v4665_v3  ;;  %5788 = vst.msk [vmem:[%s8573_s28 + $0x440] sm:$0xff] %vm5651_vm4, %v5339_v6  ;;  %v4893_v12 = vadd.f32 %v9927_v47, %v4440_v8  ;;  %v7320_v14 = vpop.f32.mrb[140].mxu0 }
 0x22f   : > { %6012 = vst.msk [vmem:[%s8573_s28 + $0xb40] sm:$0xff] %vm5651_vm4, %v5563_v7  ;;  %v5117_v13 = vadd.f32 %v9927_v47, %v4664_v9  ;;  %v7656_v15 = vpop.f32.mrb[140].mxu1  ;;  %v5342_v16 = vmax.f32 %v4894_v10, 0.0  ;;  %v4443_v18 = vmul.f32 %v9888_v25, %v7320_v14  ;;  %v2758_v20 = vpop.f32.mrb[141].mxu0 }
 0x230   : > { %v5566_v17 = vmax.f32 %v5118_v11, 0.0  ;;  %v4667_v19 = vmul.f32 %v9888_v25, %v7656_v15  ;;  %v3878_v21 = vpop.f32.mrb[141].mxu1  ;;  %v5341_v22 = vmax.f32 %v4893_v12, 0.0  ;;  %v4442_v23 = vmul.f32 %v9888_v25, %v2758_v20 }
 0x231   : > { %v5565_v28 = vmax.f32 %v5117_v13, 0.0  ;;  %v4666_v34 = vmul.f32 %v9888_v25, %v3878_v21  ;;  %5791 = vst.msk [vmem:[%s8573_s28 + $0x458] sm:$0xff] %vm5651_vm4, %v5342_v16  ;;  %v4896_v24 = vadd.f32 %v9927_v47, %v4443_v18 }
 0x232   : > { %6015 = vst.msk [vmem:[%s8573_s28 + $0xb58] sm:$0xff] %vm5651_vm4, %v5566_v17  ;;  %v5120_v26 = vadd.f32 %v9927_v47, %v4667_v19  ;;  %5790 = vst.msk [vmem:[%s8573_s28 + $0x450] sm:$0xff] %vm5651_vm4, %v5341_v22  ;;  %v4895_v27 = vadd.f32 %v9927_v47, %v4442_v23  ;;  %v7323_v31 = vpop.f32.mrb[142].mxu0 }
 0x233   : > { %6014 = vst.msk [vmem:[%s8573_s28 + $0xb50] sm:$0xff] %vm5651_vm4, %v5565_v28  ;;  %v5119_v29 = vadd.f32 %v9927_v47, %v4666_v34  ;;  %v7659_v30 = vpop.f32.mrb[142].mxu1  ;;  %v5344_v32 = vmax.f32 %v4896_v24, 0.0  ;;  %v4445_v35 = vmul.f32 %v9888_v25, %v7323_v31  ;;  %v2768_v37 = vpop.f32.mrb[143].mxu0 }
 0x234   : > { %v5568_v33 = vmax.f32 %v5120_v26, 0.0  ;;  %v4669_v36 = vmul.f32 %v9888_v25, %v7659_v30  ;;  %v3888_v38 = vpop.f32.mrb[143].mxu1  ;;  %v5343_v40 = vmax.f32 %v4895_v27, 0.0  ;;  %v4444_v39 = vmul.f32 %v9888_v25, %v2768_v37 }
 0x235   : > { %v5567_v41 = vmax.f32 %v5119_v29, 0.0  ;;  %v4668_v42 = vmul.f32 %v9888_v25, %v3888_v38  ;;  %5793 = vst.msk [vmem:[%s8573_s28 + $0x468] sm:$0xff] %vm5651_vm4, %v5344_v32  ;;  %v4898_v43 = vadd.f32 %v9927_v47, %v4445_v35 }
 0x236   : > { %6017 = vst.msk [vmem:[%s8573_s28 + $0xb68] sm:$0xff] %vm5651_vm4, %v5568_v33  ;;  %v5122_v44 = vadd.f32 %v9927_v47, %v4669_v36  ;;  %5792 = vst.msk [vmem:[%s8573_s28 + $0x460] sm:$0xff] %vm5651_vm4, %v5343_v40  ;;  %v4897_v45 = vadd.f32 %v9927_v47, %v4444_v39  ;;  %v7326_v48 = vpop.f32.mrb[144].mxu0 }
 0x237   : > { %6016 = vst.msk [vmem:[%s8573_s28 + $0xb60] sm:$0xff] %vm5651_vm4, %v5567_v41  ;;  %v5121_v46 = vadd.f32 %v9927_v47, %v4668_v42  ;;  %v7662_v49 = vpop.f32.mrb[144].mxu1  ;;  %v5346_v50 = vmax.f32 %v4898_v43, 0.0  ;;  %v4447_v52 = vmul.f32 %v9888_v25, %v7326_v48  ;;  %v2778_v54 = vpop.f32.mrb[145].mxu0 }
 0x238   : > { %v5570_v51 = vmax.f32 %v5122_v44, 0.0  ;;  %v4671_v53 = vmul.f32 %v9888_v25, %v7662_v49  ;;  %v3898_v55 = vpop.f32.mrb[145].mxu1  ;;  %v5345_v56 = vmax.f32 %v4897_v45, 0.0  ;;  %v4446_v58 = vmul.f32 %v9888_v25, %v2778_v54 }
 0x239   : > { %v5569_v57 = vmax.f32 %v5121_v46, 0.0  ;;  %v4670_v59 = vmul.f32 %v9888_v25, %v3898_v55  ;;  %5795 = vst.msk [vmem:[%s8573_s28 + $0x478] sm:$0xff] %vm5651_vm4, %v5346_v50  ;;  %v4900_v60 = vadd.f32 %v9927_v47, %v4447_v52 }
 0x23a   : > { %6019 = vst.msk [vmem:[%s8573_s28 + $0xb78] sm:$0xff] %vm5651_vm4, %v5570_v51  ;;  %v5124_v61 = vadd.f32 %v9927_v47, %v4671_v53  ;;  %5794 = vst.msk [vmem:[%s8573_s28 + $0x470] sm:$0xff] %vm5651_vm4, %v5345_v56  ;;  %v4899_v62 = vadd.f32 %v9927_v47, %v4446_v58  ;;  %v7329_v0 = vpop.f32.mrb[146].mxu0 }
 0x23b   : > { %6018 = vst.msk [vmem:[%s8573_s28 + $0xb70] sm:$0xff] %vm5651_vm4, %v5569_v57  ;;  %v5123_v63 = vadd.f32 %v9927_v47, %v4670_v59  ;;  %v7665_v1 = vpop.f32.mrb[146].mxu1  ;;  %v5348_v2 = vmax.f32 %v4900_v60, 0.0  ;;  %v4449_v4 = vmul.f32 %v9888_v25, %v7329_v0  ;;  %v2788_v6 = vpop.f32.mrb[147].mxu0 }
 0x23c   : > { %v5572_v3 = vmax.f32 %v5124_v61, 0.0  ;;  %v4673_v5 = vmul.f32 %v9888_v25, %v7665_v1  ;;  %v3908_v7 = vpop.f32.mrb[147].mxu1  ;;  %v5347_v8 = vmax.f32 %v4899_v62, 0.0  ;;  %v4448_v10 = vmul.f32 %v9888_v25, %v2788_v6 }
 0x23d   : > { %v5571_v9 = vmax.f32 %v5123_v63, 0.0  ;;  %v4672_v11 = vmul.f32 %v9888_v25, %v3908_v7  ;;  %5797 = vst.msk [vmem:[%s8573_s28 + $0x488] sm:$0xff] %vm5651_vm4, %v5348_v2  ;;  %v4902_v12 = vadd.f32 %v9927_v47, %v4449_v4 }
 0x23e   : > { %6021 = vst.msk [vmem:[%s8573_s28 + $0xb88] sm:$0xff] %vm5651_vm4, %v5572_v3  ;;  %v5126_v13 = vadd.f32 %v9927_v47, %v4673_v5  ;;  %5796 = vst.msk [vmem:[%s8573_s28 + $0x480] sm:$0xff] %vm5651_vm4, %v5347_v8  ;;  %v4901_v14 = vadd.f32 %v9927_v47, %v4448_v10  ;;  %v7332_v16 = vpop.f32.mrb[148].mxu0 }
 0x23f   : > { %6020 = vst.msk [vmem:[%s8573_s28 + $0xb80] sm:$0xff] %vm5651_vm4, %v5571_v9  ;;  %v5125_v15 = vadd.f32 %v9927_v47, %v4672_v11  ;;  %v7668_v17 = vpop.f32.mrb[148].mxu1  ;;  %v5350_v18 = vmax.f32 %v4902_v12, 0.0  ;;  %v4451_v20 = vmul.f32 %v9888_v25, %v7332_v16  ;;  %v2798_v22 = vpop.f32.mrb[149].mxu0 }
 0x240   : > { %v5574_v19 = vmax.f32 %v5126_v13, 0.0  ;;  %v4675_v21 = vmul.f32 %v9888_v25, %v7668_v17  ;;  %v3918_v28 = vpop.f32.mrb[149].mxu1  ;;  %v5349_v23 = vmax.f32 %v4901_v14, 0.0  ;;  %v4450_v24 = vmul.f32 %v9888_v25, %v2798_v22 }
 0x241   : > { %v5573_v34 = vmax.f32 %v5125_v15, 0.0  ;;  %v4674_v26 = vmul.f32 %v9888_v25, %v3918_v28  ;;  %5799 = vst.msk [vmem:[%s8573_s28 + $0x498] sm:$0xff] %vm5651_vm4, %v5350_v18  ;;  %v4904_v27 = vadd.f32 %v9927_v47, %v4451_v20 }
 0x242   : > { %6023 = vst.msk [vmem:[%s8573_s28 + $0xb98] sm:$0xff] %vm5651_vm4, %v5574_v19  ;;  %v5128_v29 = vadd.f32 %v9927_v47, %v4675_v21  ;;  %5798 = vst.msk [vmem:[%s8573_s28 + $0x490] sm:$0xff] %vm5651_vm4, %v5349_v23  ;;  %v4903_v31 = vadd.f32 %v9927_v47, %v4450_v24  ;;  %v7335_v32 = vpop.f32.mrb[150].mxu0 }
 0x243   : > { %6022 = vst.msk [vmem:[%s8573_s28 + $0xb90] sm:$0xff] %vm5651_vm4, %v5573_v34  ;;  %v5127_v30 = vadd.f32 %v9927_v47, %v4674_v26  ;;  %v7671_v33 = vpop.f32.mrb[150].mxu1  ;;  %v5352_v35 = vmax.f32 %v4904_v27, 0.0  ;;  %v4453_v37 = vmul.f32 %v9888_v25, %v7335_v32  ;;  %v2808_v40 = vpop.f32.mrb[151].mxu0 }
 0x244   : > { %v5576_v36 = vmax.f32 %v5128_v29, 0.0  ;;  %v4677_v38 = vmul.f32 %v9888_v25, %v7671_v33  ;;  %v3928_v41 = vpop.f32.mrb[151].mxu1  ;;  %v5351_v39 = vmax.f32 %v4903_v31, 0.0  ;;  %v4452_v43 = vmul.f32 %v9888_v25, %v2808_v40 }
 0x245   : > { %v5575_v42 = vmax.f32 %v5127_v30, 0.0  ;;  %v4676_v44 = vmul.f32 %v9888_v25, %v3928_v41  ;;  %5801 = vst.msk [vmem:[%s8573_s28 + $0x4a8] sm:$0xff] %vm5651_vm4, %v5352_v35  ;;  %v4906_v45 = vadd.f32 %v9927_v47, %v4453_v37 }
 0x246   : > { %6025 = vst.msk [vmem:[%s8573_s28 + $0xba8] sm:$0xff] %vm5651_vm4, %v5576_v36  ;;  %v5130_v46 = vadd.f32 %v9927_v47, %v4677_v38  ;;  %5800 = vst.msk [vmem:[%s8573_s28 + $0x4a0] sm:$0xff] %vm5651_vm4, %v5351_v39  ;;  %v4905_v48 = vadd.f32 %v9927_v47, %v4452_v43  ;;  %v7338_v50 = vpop.f32.mrb[152].mxu0 }
 0x247   : > { %6024 = vst.msk [vmem:[%s8573_s28 + $0xba0] sm:$0xff] %vm5651_vm4, %v5575_v42  ;;  %v5129_v49 = vadd.f32 %v9927_v47, %v4676_v44  ;;  %v7674_v51 = vpop.f32.mrb[152].mxu1  ;;  %v5354_v52 = vmax.f32 %v4906_v45, 0.0  ;;  %v4455_v54 = vmul.f32 %v9888_v25, %v7338_v50  ;;  %v2818_v56 = vpop.f32.mrb[153].mxu0 }
 0x248   : > { %v5578_v53 = vmax.f32 %v5130_v46, 0.0  ;;  %v4679_v55 = vmul.f32 %v9888_v25, %v7674_v51  ;;  %v3938_v57 = vpop.f32.mrb[153].mxu1  ;;  %v5353_v58 = vmax.f32 %v4905_v48, 0.0  ;;  %v4454_v60 = vmul.f32 %v9888_v25, %v2818_v56 }
 0x249   : > { %v5577_v59 = vmax.f32 %v5129_v49, 0.0  ;;  %v4678_v61 = vmul.f32 %v9888_v25, %v3938_v57  ;;  %5803 = vst.msk [vmem:[%s8573_s28 + $0x4b8] sm:$0xff] %vm5651_vm4, %v5354_v52  ;;  %v4908_v62 = vadd.f32 %v9927_v47, %v4455_v54 }
 0x24a   : > { %6027 = vst.msk [vmem:[%s8573_s28 + $0xbb8] sm:$0xff] %vm5651_vm4, %v5578_v53  ;;  %v5132_v63 = vadd.f32 %v9927_v47, %v4679_v55  ;;  %5802 = vst.msk [vmem:[%s8573_s28 + $0x4b0] sm:$0xff] %vm5651_vm4, %v5353_v58  ;;  %v4907_v0 = vadd.f32 %v9927_v47, %v4454_v60  ;;  %v7341_v2 = vpop.f32.mrb[154].mxu0  ;;  %v10318_v55 = vld [vmem:[%s10907_s2] ss:$0 sm:$0xff] }
 0x24b   : > { %6026 = vst.msk [vmem:[%s8573_s28 + $0xbb0] sm:$0xff] %vm5651_vm4, %v5577_v59  ;;  %v5131_v1 = vadd.f32 %v9927_v47, %v4678_v61  ;;  %v7677_v3 = vpop.f32.mrb[154].mxu1  ;;  %v5356_v4 = vmax.f32 %v4908_v62, 0.0  ;;  %v4457_v6 = vmul.f32 %v9888_v25, %v7341_v2  ;;  %v2828_v8 = vpop.f32.mrb[155].mxu0 }
 0x24c   : > { %v5580_v5 = vmax.f32 %v5132_v63, 0.0  ;;  %v4681_v7 = vmul.f32 %v9888_v25, %v7677_v3  ;;  %v3948_v9 = vpop.f32.mrb[155].mxu1  ;;  %v5355_v10 = vmax.f32 %v4907_v0, 0.0  ;;  %v4456_v12 = vmul.f32 %v9888_v25, %v2828_v8 }
 0x24d   : > { %v5579_v11 = vmax.f32 %v5131_v1, 0.0  ;;  %v4680_v13 = vmul.f32 %v9888_v25, %v3948_v9  ;;  %5805 = vst.msk [vmem:[%s8573_s28 + $0x4c8] sm:$0xff] %vm5651_vm4, %v5356_v4  ;;  %v4910_v14 = vadd.f32 %v9927_v47, %v4457_v6 }
 0x24e   : > { %6029 = vst.msk [vmem:[%s8573_s28 + $0xbc8] sm:$0xff] %vm5651_vm4, %v5580_v5  ;;  %v5134_v15 = vadd.f32 %v9927_v47, %v4681_v7  ;;  %5804 = vst.msk [vmem:[%s8573_s28 + $0x4c0] sm:$0xff] %vm5651_vm4, %v5355_v10  ;;  %v4909_v16 = vadd.f32 %v9927_v47, %v4456_v12  ;;  %v7344_v18 = vpop.f32.mrb[156].mxu0 }
 0x24f   : > { %6028 = vst.msk [vmem:[%s8573_s28 + $0xbc0] sm:$0xff] %vm5651_vm4, %v5579_v11  ;;  %v5133_v17 = vadd.f32 %v9927_v47, %v4680_v13  ;;  %v7680_v19 = vpop.f32.mrb[156].mxu1  ;;  %v5358_v20 = vmax.f32 %v4910_v14, 0.0  ;;  %v4459_v22 = vmul.f32 %v9888_v25, %v7344_v18  ;;  %v2838_v23 = vpop.f32.mrb[157].mxu0  ;;  %v10353_v18 = vld [vmem:[%s10907_s2 + $0x1] ss:$0 sm:$0xff] }
 0x250   : > { %v5582_v21 = vmax.f32 %v5134_v15, 0.0  ;;  %v4683_v28 = vmul.f32 %v9888_v25, %v7680_v19  ;;  %v3958_v34 = vpop.f32.mrb[157].mxu1  ;;  %v5357_v24 = vmax.f32 %v4909_v16, 0.0  ;;  %v4458_v27 = vmul.f32 %v9888_v25, %v2838_v23 }
 0x251   : > { %v5581_v26 = vmax.f32 %v5133_v17, 0.0  ;;  %v4682_v29 = vmul.f32 %v9888_v25, %v3958_v34  ;;  %5807 = vst.msk [vmem:[%s8573_s28 + $0x4d8] sm:$0xff] %vm5651_vm4, %v5358_v20  ;;  %v4912_v31 = vadd.f32 %v9927_v47, %v4459_v22 }
 0x252   : > { %6031 = vst.msk [vmem:[%s8573_s28 + $0xbd8] sm:$0xff] %vm5651_vm4, %v5582_v21  ;;  %v5136_v30 = vadd.f32 %v9927_v47, %v4683_v28  ;;  %5806 = vst.msk [vmem:[%s8573_s28 + $0x4d0] sm:$0xff] %vm5651_vm4, %v5357_v24  ;;  %v4911_v32 = vadd.f32 %v9927_v47, %v4458_v27  ;;  %v7347_v35 = vpop.f32.mrb[158].mxu0 }
 0x253   : > { %6030 = vst.msk [vmem:[%s8573_s28 + $0xbd0] sm:$0xff] %vm5651_vm4, %v5581_v26  ;;  %v5135_v33 = vadd.f32 %v9927_v47, %v4682_v29  ;;  %v7683_v36 = vpop.f32.mrb[158].mxu1  ;;  %v5360_v37 = vmax.f32 %v4912_v31, 0.0  ;;  %v4461_v40 = vmul.f32 %v9888_v25, %v7347_v35  ;;  %v2848_v39 = vpop.f32.mrb[159].mxu0 }
 0x254   : > { %v5584_v38 = vmax.f32 %v5136_v30, 0.0  ;;  %v4685_v41 = vmul.f32 %v9888_v25, %v7683_v36  ;;  %v3968_v42 = vpop.f32.mrb[159].mxu1  ;;  %v5359_v43 = vmax.f32 %v4911_v32, 0.0  ;;  %v4460_v45 = vmul.f32 %v9888_v25, %v2848_v39 }
 0x255   : > { %v5583_v44 = vmax.f32 %v5135_v33, 0.0  ;;  %v4684_v46 = vmul.f32 %v9888_v25, %v3968_v42  ;;  %5809 = vst.msk [vmem:[%s8573_s28 + $0x4e8] sm:$0xff] %vm5651_vm4, %v5360_v37  ;;  %v4914_v48 = vadd.f32 %v9927_v47, %v4461_v40 }
 0x256   : > { %6033 = vst.msk [vmem:[%s8573_s28 + $0xbe8] sm:$0xff] %vm5651_vm4, %v5584_v38  ;;  %v5138_v49 = vadd.f32 %v9927_v47, %v4685_v41  ;;  %5808 = vst.msk [vmem:[%s8573_s28 + $0x4e0] sm:$0xff] %vm5651_vm4, %v5359_v43  ;;  %v4913_v50 = vadd.f32 %v9927_v47, %v4460_v45  ;;  %v7350_v52 = vpop.f32.mrb[160].mxu0 }
 0x257   : > { %6032 = vst.msk [vmem:[%s8573_s28 + $0xbe0] sm:$0xff] %vm5651_vm4, %v5583_v44  ;;  %v5137_v51 = vadd.f32 %v9927_v47, %v4684_v46  ;;  %v7686_v25 = vpop.f32.mrb[160].mxu1  ;;  %v5362_v53 = vmax.f32 %v4914_v48, 0.0  ;;  %v4463_v56 = vmul.f32 %v10318_v55, %v7350_v52  ;;  %v2858_v58 = vpop.f32.mrb[161].mxu0 }
 0x258   : > { %v5586_v54 = vmax.f32 %v5138_v49, 0.0  ;;  %v4687_v57 = vmul.f32 %v10318_v55, %v7686_v25  ;;  %v3978_v59 = vpop.f32.mrb[161].mxu1  ;;  %v5361_v60 = vmax.f32 %v4913_v50, 0.0  ;;  %v4462_v62 = vmul.f32 %v10318_v55, %v2858_v58 }
 0x259   : > { %v5585_v61 = vmax.f32 %v5137_v51, 0.0  ;;  %v4686_v63 = vmul.f32 %v10318_v55, %v3978_v59  ;;  %5811 = vst.msk [vmem:[%s8573_s28 + $0x4f8] sm:$0xff] %vm5651_vm4, %v5362_v53  ;;  %v4916_v0 = vadd.f32 %v9927_v47, %v4463_v56 }
 0x25a   : > { %6035 = vst.msk [vmem:[%s8573_s28 + $0xbf8] sm:$0xff] %vm5651_vm4, %v5586_v54  ;;  %v5140_v1 = vadd.f32 %v9927_v47, %v4687_v57  ;;  %5810 = vst.msk [vmem:[%s8573_s28 + $0x4f0] sm:$0xff] %vm5651_vm4, %v5361_v60  ;;  %v4915_v2 = vadd.f32 %v9927_v47, %v4462_v62  ;;  %v7353_v4 = vpop.f32.mrb[162].mxu0 }
 0x25b   : > { %6034 = vst.msk [vmem:[%s8573_s28 + $0xbf0] sm:$0xff] %vm5651_vm4, %v5585_v61  ;;  %v5139_v3 = vadd.f32 %v9927_v47, %v4686_v63  ;;  %v7689_v5 = vpop.f32.mrb[162].mxu1  ;;  %v5364_v6 = vmax.f32 %v4916_v0, 0.0  ;;  %v4465_v8 = vmul.f32 %v10318_v55, %v7353_v4  ;;  %v2868_v10 = vpop.f32.mrb[163].mxu0 }
 0x25c   : > { %v5588_v7 = vmax.f32 %v5140_v1, 0.0  ;;  %v4689_v9 = vmul.f32 %v10318_v55, %v7689_v5  ;;  %v3988_v11 = vpop.f32.mrb[163].mxu1  ;;  %v5363_v12 = vmax.f32 %v4915_v2, 0.0  ;;  %v4464_v14 = vmul.f32 %v10318_v55, %v2868_v10 }
 0x25d   : > { %v5587_v13 = vmax.f32 %v5139_v3, 0.0  ;;  %v4688_v15 = vmul.f32 %v10318_v55, %v3988_v11  ;;  %5813 = vst.msk [vmem:[%s8573_s28 + $0x508] sm:$0xff] %vm5651_vm4, %v5364_v6  ;;  %v4918_v16 = vadd.f32 %v9927_v47, %v4465_v8 }
 0x25e   : > { %6037 = vst.msk [vmem:[%s8573_s28 + $0xc08] sm:$0xff] %vm5651_vm4, %v5588_v7  ;;  %v5142_v17 = vadd.f32 %v9927_v47, %v4689_v9  ;;  %5812 = vst.msk [vmem:[%s8573_s28 + $0x500] sm:$0xff] %vm5651_vm4, %v5363_v12  ;;  %v4917_v19 = vadd.f32 %v10353_v18, %v4464_v14  ;;  %v7356_v21 = vpop.f32.mrb[164].mxu0 }
 0x25f   : > { %6036 = vst.msk [vmem:[%s8573_s28 + $0xc00] sm:$0xff] %vm5651_vm4, %v5587_v13  ;;  %v5141_v20 = vadd.f32 %v10353_v18, %v4688_v15  ;;  %v7692_v22 = vpop.f32.mrb[164].mxu1  ;;  %v5366_v47 = vmax.f32 %v4918_v16, 0.0  ;;  %v4467_v23 = vmul.f32 %v10318_v55, %v7356_v21  ;;  %v2878_v24 = vpop.f32.mrb[165].mxu0 }
 0x260   : > { %v5590_v28 = vmax.f32 %v5142_v17, 0.0  ;;  %v4691_v34 = vmul.f32 %v10318_v55, %v7692_v22  ;;  %v3998_v26 = vpop.f32.mrb[165].mxu1  ;;  %v5365_v27 = vmax.f32 %v4917_v19, 0.0  ;;  %v4466_v31 = vmul.f32 %v10318_v55, %v2878_v24 }
 0x261   : > { %v5589_v29 = vmax.f32 %v5141_v20, 0.0  ;;  %v4690_v30 = vmul.f32 %v10318_v55, %v3998_v26  ;;  %5815 = vst.msk [vmem:[%s8573_s28 + $0x518] sm:$0xff] %vm5651_vm4, %v5366_v47  ;;  %v4920_v32 = vadd.f32 %v10353_v18, %v4467_v23 }
 0x262   : > { %6039 = vst.msk [vmem:[%s8573_s28 + $0xc18] sm:$0xff] %vm5651_vm4, %v5590_v28  ;;  %v5144_v33 = vadd.f32 %v10353_v18, %v4691_v34  ;;  %5814 = vst.msk [vmem:[%s8573_s28 + $0x510] sm:$0xff] %vm5651_vm4, %v5365_v27  ;;  %v4919_v35 = vadd.f32 %v10353_v18, %v4466_v31  ;;  %v7359_v37 = vpop.f32.mrb[166].mxu0 }
 0x263   : > { %6038 = vst.msk [vmem:[%s8573_s28 + $0xc10] sm:$0xff] %vm5651_vm4, %v5589_v29  ;;  %v5143_v36 = vadd.f32 %v10353_v18, %v4690_v30  ;;  %v7695_v38 = vpop.f32.mrb[166].mxu1  ;;  %v5368_v40 = vmax.f32 %v4920_v32, 0.0  ;;  %v4469_v39 = vmul.f32 %v10318_v55, %v7359_v37  ;;  %v2888_v43 = vpop.f32.mrb[167].mxu0 }
 0x264   : > { %v5592_v41 = vmax.f32 %v5144_v33, 0.0  ;;  %v4693_v42 = vmul.f32 %v10318_v55, %v7695_v38  ;;  %v4008_v44 = vpop.f32.mrb[167].mxu1  ;;  %v5367_v45 = vmax.f32 %v4919_v35, 0.0  ;;  %v4468_v48 = vmul.f32 %v10318_v55, %v2888_v43 }
 0x265   : > { %v5591_v46 = vmax.f32 %v5143_v36, 0.0  ;;  %v4692_v49 = vmul.f32 %v10318_v55, %v4008_v44  ;;  %5817 = vst.msk [vmem:[%s8573_s28 + $0x528] sm:$0xff] %vm5651_vm4, %v5368_v40  ;;  %v4922_v50 = vadd.f32 %v10353_v18, %v4469_v39 }
 0x266   : > { %6041 = vst.msk [vmem:[%s8573_s28 + $0xc28] sm:$0xff] %vm5651_vm4, %v5592_v41  ;;  %v5146_v51 = vadd.f32 %v10353_v18, %v4693_v42  ;;  %5816 = vst.msk [vmem:[%s8573_s28 + $0x520] sm:$0xff] %vm5651_vm4, %v5367_v45  ;;  %v4921_v52 = vadd.f32 %v10353_v18, %v4468_v48  ;;  %v7362_v53 = vpop.f32.mrb[168].mxu0 }
 0x267   : > { %6040 = vst.msk [vmem:[%s8573_s28 + $0xc20] sm:$0xff] %vm5651_vm4, %v5591_v46  ;;  %v5145_v25 = vadd.f32 %v10353_v18, %v4692_v49  ;;  %v7698_v54 = vpop.f32.mrb[168].mxu1  ;;  %v5370_v56 = vmax.f32 %v4922_v50, 0.0  ;;  %v4471_v58 = vmul.f32 %v10318_v55, %v7362_v53  ;;  %v2898_v60 = vpop.f32.mrb[169].mxu0 }
 0x268   : > { %v5594_v57 = vmax.f32 %v5146_v51, 0.0  ;;  %v4695_v59 = vmul.f32 %v10318_v55, %v7698_v54  ;;  %v4018_v61 = vpop.f32.mrb[169].mxu1  ;;  %v5369_v62 = vmax.f32 %v4921_v52, 0.0  ;;  %v4470_v0 = vmul.f32 %v10318_v55, %v2898_v60 }
 0x269   : > { %v5593_v63 = vmax.f32 %v5145_v25, 0.0  ;;  %v4694_v1 = vmul.f32 %v10318_v55, %v4018_v61  ;;  %5819 = vst.msk [vmem:[%s8573_s28 + $0x538] sm:$0xff] %vm5651_vm4, %v5370_v56  ;;  %v4924_v2 = vadd.f32 %v10353_v18, %v4471_v58 }
 0x26a   : > { %6043 = vst.msk [vmem:[%s8573_s28 + $0xc38] sm:$0xff] %vm5651_vm4, %v5594_v57  ;;  %v5148_v3 = vadd.f32 %v10353_v18, %v4695_v59  ;;  %5818 = vst.msk [vmem:[%s8573_s28 + $0x530] sm:$0xff] %vm5651_vm4, %v5369_v62  ;;  %v4923_v4 = vadd.f32 %v10353_v18, %v4470_v0  ;;  %v7365_v6 = vpop.f32.mrb[170].mxu0 }
 0x26b   : > { %6042 = vst.msk [vmem:[%s8573_s28 + $0xc30] sm:$0xff] %vm5651_vm4, %v5593_v63  ;;  %v5147_v5 = vadd.f32 %v10353_v18, %v4694_v1  ;;  %v7701_v7 = vpop.f32.mrb[170].mxu1  ;;  %v5372_v8 = vmax.f32 %v4924_v2, 0.0  ;;  %v4473_v10 = vmul.f32 %v10318_v55, %v7365_v6  ;;  %v2908_v12 = vpop.f32.mrb[171].mxu0 }
 0x26c   : > { %v5596_v9 = vmax.f32 %v5148_v3, 0.0  ;;  %v4697_v11 = vmul.f32 %v10318_v55, %v7701_v7  ;;  %v4028_v13 = vpop.f32.mrb[171].mxu1  ;;  %v5371_v14 = vmax.f32 %v4923_v4, 0.0  ;;  %v4472_v16 = vmul.f32 %v10318_v55, %v2908_v12 }
 0x26d   : > { %v5595_v15 = vmax.f32 %v5147_v5, 0.0  ;;  %v4696_v17 = vmul.f32 %v10318_v55, %v4028_v13  ;;  %5821 = vst.msk [vmem:[%s8573_s28 + $0x548] sm:$0xff] %vm5651_vm4, %v5372_v8  ;;  %v4926_v19 = vadd.f32 %v10353_v18, %v4473_v10 }
 0x26e   : > { %6045 = vst.msk [vmem:[%s8573_s28 + $0xc48] sm:$0xff] %vm5651_vm4, %v5596_v9  ;;  %v5150_v20 = vadd.f32 %v10353_v18, %v4697_v11  ;;  %5820 = vst.msk [vmem:[%s8573_s28 + $0x540] sm:$0xff] %vm5651_vm4, %v5371_v14  ;;  %v4925_v21 = vadd.f32 %v10353_v18, %v4472_v16  ;;  %v7368_v47 = vpop.f32.mrb[172].mxu0 }
 0x26f   : > { %6044 = vst.msk [vmem:[%s8573_s28 + $0xc40] sm:$0xff] %vm5651_vm4, %v5595_v15  ;;  %v5149_v22 = vadd.f32 %v10353_v18, %v4696_v17  ;;  %v7704_v28 = vpop.f32.mrb[172].mxu1  ;;  %v5374_v23 = vmax.f32 %v4926_v19, 0.0  ;;  %v4475_v24 = vmul.f32 %v10318_v55, %v7368_v47  ;;  %v2918_v27 = vpop.f32.mrb[173].mxu0 }
 0x270   : > { %v5598_v34 = vmax.f32 %v5150_v20, 0.0  ;;  %v4699_v26 = vmul.f32 %v10318_v55, %v7704_v28  ;;  %v4038_v29 = vpop.f32.mrb[173].mxu1  ;;  %v5373_v31 = vmax.f32 %v4925_v21, 0.0  ;;  %v4474_v32 = vmul.f32 %v10318_v55, %v2918_v27 }
 0x271   : > { %v5597_v30 = vmax.f32 %v5149_v22, 0.0  ;;  %v4698_v33 = vmul.f32 %v10318_v55, %v4038_v29  ;;  %5823 = vst.msk [vmem:[%s8573_s28 + $0x558] sm:$0xff] %vm5651_vm4, %v5374_v23  ;;  %v4928_v35 = vadd.f32 %v10353_v18, %v4475_v24 }
 0x272   : > { %6047 = vst.msk [vmem:[%s8573_s28 + $0xc58] sm:$0xff] %vm5651_vm4, %v5598_v34  ;;  %v5152_v36 = vadd.f32 %v10353_v18, %v4699_v26  ;;  %5822 = vst.msk [vmem:[%s8573_s28 + $0x550] sm:$0xff] %vm5651_vm4, %v5373_v31  ;;  %v4927_v37 = vadd.f32 %v10353_v18, %v4474_v32  ;;  %v7371_v40 = vpop.f32.mrb[174].mxu0 }
 0x273   : > { %6046 = vst.msk [vmem:[%s8573_s28 + $0xc50] sm:$0xff] %vm5651_vm4, %v5597_v30  ;;  %v5151_v38 = vadd.f32 %v10353_v18, %v4698_v33  ;;  %v7707_v41 = vpop.f32.mrb[174].mxu1  ;;  %v5376_v39 = vmax.f32 %v4928_v35, 0.0  ;;  %v4477_v43 = vmul.f32 %v10318_v55, %v7371_v40  ;;  %v2928_v45 = vpop.f32.mrb[175].mxu0 }
 0x274   : > { %v5600_v42 = vmax.f32 %v5152_v36, 0.0  ;;  %v4701_v44 = vmul.f32 %v10318_v55, %v7707_v41  ;;  %v4048_v46 = vpop.f32.mrb[175].mxu1  ;;  %v5375_v48 = vmax.f32 %v4927_v37, 0.0  ;;  %v4476_v50 = vmul.f32 %v10318_v55, %v2928_v45 }
 0x275   : > { %v5599_v49 = vmax.f32 %v5151_v38, 0.0  ;;  %v4700_v51 = vmul.f32 %v10318_v55, %v4048_v46  ;;  %5825 = vst.msk [vmem:[%s8573_s28 + $0x568] sm:$0xff] %vm5651_vm4, %v5376_v39  ;;  %v4930_v52 = vadd.f32 %v10353_v18, %v4477_v43 }
 0x276   : > { %6049 = vst.msk [vmem:[%s8573_s28 + $0xc68] sm:$0xff] %vm5651_vm4, %v5600_v42  ;;  %v5154_v25 = vadd.f32 %v10353_v18, %v4701_v44  ;;  %5824 = vst.msk [vmem:[%s8573_s28 + $0x560] sm:$0xff] %vm5651_vm4, %v5375_v48  ;;  %v4929_v53 = vadd.f32 %v10353_v18, %v4476_v50  ;;  %v7374_v56 = vpop.f32.mrb[176].mxu0 }
 0x277   : > { %6048 = vst.msk [vmem:[%s8573_s28 + $0xc60] sm:$0xff] %vm5651_vm4, %v5599_v49  ;;  %v5153_v54 = vadd.f32 %v10353_v18, %v4700_v51  ;;  %v7710_v57 = vpop.f32.mrb[176].mxu1  ;;  %v5378_v58 = vmax.f32 %v4930_v52, 0.0  ;;  %v4479_v60 = vmul.f32 %v10318_v55, %v7374_v56  ;;  %v2938_v62 = vpop.f32.mrb[177].mxu0 }
 0x278   : > { %v5602_v59 = vmax.f32 %v5154_v25, 0.0  ;;  %v4703_v61 = vmul.f32 %v10318_v55, %v7710_v57  ;;  %v4058_v63 = vpop.f32.mrb[177].mxu1  ;;  %v5377_v0 = vmax.f32 %v4929_v53, 0.0  ;;  %v4478_v2 = vmul.f32 %v10318_v55, %v2938_v62 }
 0x279   : > { %v5601_v1 = vmax.f32 %v5153_v54, 0.0  ;;  %v4702_v3 = vmul.f32 %v10318_v55, %v4058_v63  ;;  %5827 = vst.msk [vmem:[%s8573_s28 + $0x578] sm:$0xff] %vm5651_vm4, %v5378_v58  ;;  %v4932_v4 = vadd.f32 %v10353_v18, %v4479_v60 }
 0x27a   : > { %6051 = vst.msk [vmem:[%s8573_s28 + $0xc78] sm:$0xff] %vm5651_vm4, %v5602_v59  ;;  %v5156_v5 = vadd.f32 %v10353_v18, %v4703_v61  ;;  %5826 = vst.msk [vmem:[%s8573_s28 + $0x570] sm:$0xff] %vm5651_vm4, %v5377_v0  ;;  %v4931_v6 = vadd.f32 %v10353_v18, %v4478_v2  ;;  %v7377_v8 = vpop.f32.mrb[178].mxu0 }
 0x27b   : > { %6050 = vst.msk [vmem:[%s8573_s28 + $0xc70] sm:$0xff] %vm5651_vm4, %v5601_v1  ;;  %v5155_v7 = vadd.f32 %v10353_v18, %v4702_v3  ;;  %v7713_v9 = vpop.f32.mrb[178].mxu1  ;;  %v5380_v10 = vmax.f32 %v4932_v4, 0.0  ;;  %v4481_v12 = vmul.f32 %v10318_v55, %v7377_v8  ;;  %v2948_v14 = vpop.f32.mrb[179].mxu0 }
 0x27c   : > { %v5604_v11 = vmax.f32 %v5156_v5, 0.0  ;;  %v4705_v13 = vmul.f32 %v10318_v55, %v7713_v9  ;;  %v4068_v15 = vpop.f32.mrb[179].mxu1  ;;  %v5379_v16 = vmax.f32 %v4931_v6, 0.0  ;;  %v4480_v19 = vmul.f32 %v10318_v55, %v2948_v14 }
 0x27d   : > { %v5603_v17 = vmax.f32 %v5155_v7, 0.0  ;;  %v4704_v20 = vmul.f32 %v10318_v55, %v4068_v15  ;;  %5829 = vst.msk [vmem:[%s8573_s28 + $0x588] sm:$0xff] %vm5651_vm4, %v5380_v10  ;;  %v4934_v21 = vadd.f32 %v10353_v18, %v4481_v12 }
 0x27e   : > { %6053 = vst.msk [vmem:[%s8573_s28 + $0xc88] sm:$0xff] %vm5651_vm4, %v5604_v11  ;;  %v5158_v22 = vadd.f32 %v10353_v18, %v4705_v13  ;;  %5828 = vst.msk [vmem:[%s8573_s28 + $0x580] sm:$0xff] %vm5651_vm4, %v5379_v16  ;;  %v4933_v47 = vadd.f32 %v10353_v18, %v4480_v19  ;;  %v7380_v23 = vpop.f32.mrb[180].mxu0 }
 0x27f   : > { %6052 = vst.msk [vmem:[%s8573_s28 + $0xc80] sm:$0xff] %vm5651_vm4, %v5603_v17  ;;  %v5157_v28 = vadd.f32 %v10353_v18, %v4704_v20  ;;  %v7716_v34 = vpop.f32.mrb[180].mxu1  ;;  %v5382_v24 = vmax.f32 %v4934_v21, 0.0  ;;  %v4483_v27 = vmul.f32 %v10318_v55, %v7380_v23  ;;  %v2958_v31 = vpop.f32.mrb[181].mxu0 }
 0x280   : > { %v5606_v26 = vmax.f32 %v5158_v22, 0.0  ;;  %v4707_v29 = vmul.f32 %v10318_v55, %v7716_v34  ;;  %v4078_v30 = vpop.f32.mrb[181].mxu1  ;;  %v5381_v32 = vmax.f32 %v4933_v47, 0.0  ;;  %v4482_v35 = vmul.f32 %v10318_v55, %v2958_v31 }
 0x281   : > { %v5605_v33 = vmax.f32 %v5157_v28, 0.0  ;;  %v4706_v36 = vmul.f32 %v10318_v55, %v4078_v30  ;;  %5831 = vst.msk [vmem:[%s8573_s28 + $0x598] sm:$0xff] %vm5651_vm4, %v5382_v24  ;;  %v4936_v37 = vadd.f32 %v10353_v18, %v4483_v27 }
 0x282   : > { %6055 = vst.msk [vmem:[%s8573_s28 + $0xc98] sm:$0xff] %vm5651_vm4, %v5606_v26  ;;  %v5160_v38 = vadd.f32 %v10353_v18, %v4707_v29  ;;  %5830 = vst.msk [vmem:[%s8573_s28 + $0x590] sm:$0xff] %vm5651_vm4, %v5381_v32  ;;  %v4935_v40 = vadd.f32 %v10353_v18, %v4482_v35  ;;  %v7383_v39 = vpop.f32.mrb[182].mxu0 }
 0x283   : > { %6054 = vst.msk [vmem:[%s8573_s28 + $0xc90] sm:$0xff] %vm5651_vm4, %v5605_v33  ;;  %v5159_v41 = vadd.f32 %v10353_v18, %v4706_v36  ;;  %v7719_v42 = vpop.f32.mrb[182].mxu1  ;;  %v5384_v43 = vmax.f32 %v4936_v37, 0.0  ;;  %v4485_v45 = vmul.f32 %v10318_v55, %v7383_v39  ;;  %v2968_v48 = vpop.f32.mrb[183].mxu0 }
 0x284   : > { %v5608_v44 = vmax.f32 %v5160_v38, 0.0  ;;  %v4709_v46 = vmul.f32 %v10318_v55, %v7719_v42  ;;  %v4088_v49 = vpop.f32.mrb[183].mxu1  ;;  %v5383_v50 = vmax.f32 %v4935_v40, 0.0  ;;  %v4484_v52 = vmul.f32 %v10318_v55, %v2968_v48 }
 0x285   : > { %v5607_v51 = vmax.f32 %v5159_v41, 0.0  ;;  %v4708_v25 = vmul.f32 %v10318_v55, %v4088_v49  ;;  %5833 = vst.msk [vmem:[%s8573_s28 + $0x5a8] sm:$0xff] %vm5651_vm4, %v5384_v43  ;;  %v4938_v53 = vadd.f32 %v10353_v18, %v4485_v45 }
 0x286   : > { %6057 = vst.msk [vmem:[%s8573_s28 + $0xca8] sm:$0xff] %vm5651_vm4, %v5608_v44  ;;  %v5162_v54 = vadd.f32 %v10353_v18, %v4709_v46  ;;  %5832 = vst.msk [vmem:[%s8573_s28 + $0x5a0] sm:$0xff] %vm5651_vm4, %v5383_v50  ;;  %v4937_v56 = vadd.f32 %v10353_v18, %v4484_v52  ;;  %v7386_v58 = vpop.f32.mrb[184].mxu0 }
 0x287   : > { %6056 = vst.msk [vmem:[%s8573_s28 + $0xca0] sm:$0xff] %vm5651_vm4, %v5607_v51  ;;  %v5161_v57 = vadd.f32 %v10353_v18, %v4708_v25  ;;  %v7722_v59 = vpop.f32.mrb[184].mxu1  ;;  %v5386_v60 = vmax.f32 %v4938_v53, 0.0  ;;  %v4487_v62 = vmul.f32 %v10318_v55, %v7386_v58  ;;  %v2978_v0 = vpop.f32.mrb[185].mxu0 }
 0x288   : > { %v5610_v61 = vmax.f32 %v5162_v54, 0.0  ;;  %v4711_v63 = vmul.f32 %v10318_v55, %v7722_v59  ;;  %v4098_v1 = vpop.f32.mrb[185].mxu1  ;;  %v5385_v2 = vmax.f32 %v4937_v56, 0.0  ;;  %v4486_v4 = vmul.f32 %v10318_v55, %v2978_v0 }
 0x289   : > { %v5609_v3 = vmax.f32 %v5161_v57, 0.0  ;;  %v4710_v5 = vmul.f32 %v10318_v55, %v4098_v1  ;;  %5835 = vst.msk [vmem:[%s8573_s28 + $0x5b8] sm:$0xff] %vm5651_vm4, %v5386_v60  ;;  %v4940_v6 = vadd.f32 %v10353_v18, %v4487_v62 }
 0x28a   : > { %6059 = vst.msk [vmem:[%s8573_s28 + $0xcb8] sm:$0xff] %vm5651_vm4, %v5610_v61  ;;  %v5164_v7 = vadd.f32 %v10353_v18, %v4711_v63  ;;  %5834 = vst.msk [vmem:[%s8573_s28 + $0x5b0] sm:$0xff] %vm5651_vm4, %v5385_v2  ;;  %v4939_v8 = vadd.f32 %v10353_v18, %v4486_v4  ;;  %v7389_v10 = vpop.f32.mrb[186].mxu0 }
 0x28b   : > { %6058 = vst.msk [vmem:[%s8573_s28 + $0xcb0] sm:$0xff] %vm5651_vm4, %v5609_v3  ;;  %v5163_v9 = vadd.f32 %v10353_v18, %v4710_v5  ;;  %v7725_v11 = vpop.f32.mrb[186].mxu1  ;;  %v5388_v12 = vmax.f32 %v4940_v6, 0.0  ;;  %v4489_v14 = vmul.f32 %v10318_v55, %v7389_v10  ;;  %v2988_v16 = vpop.f32.mrb[187].mxu0 }
 0x28c   : > { %v5612_v13 = vmax.f32 %v5164_v7, 0.0  ;;  %v4713_v15 = vmul.f32 %v10318_v55, %v7725_v11  ;;  %v4108_v17 = vpop.f32.mrb[187].mxu1  ;;  %v5387_v19 = vmax.f32 %v4939_v8, 0.0  ;;  %v4488_v21 = vmul.f32 %v10318_v55, %v2988_v16 }
 0x28d   : > { %v5611_v20 = vmax.f32 %v5163_v9, 0.0  ;;  %v4712_v22 = vmul.f32 %v10318_v55, %v4108_v17  ;;  %5837 = vst.msk [vmem:[%s8573_s28 + $0x5c8] sm:$0xff] %vm5651_vm4, %v5388_v12  ;;  %v4942_v47 = vadd.f32 %v10353_v18, %v4489_v14 }
 0x28e   : > { %6061 = vst.msk [vmem:[%s8573_s28 + $0xcc8] sm:$0xff] %vm5651_vm4, %v5612_v13  ;;  %v5166_v28 = vadd.f32 %v10353_v18, %v4713_v15  ;;  %5836 = vst.msk [vmem:[%s8573_s28 + $0x5c0] sm:$0xff] %vm5651_vm4, %v5387_v19  ;;  %v4941_v23 = vadd.f32 %v10353_v18, %v4488_v21  ;;  %v7392_v24 = vpop.f32.mrb[188].mxu0 }
 0x28f   : > { %6060 = vst.msk [vmem:[%s8573_s28 + $0xcc0] sm:$0xff] %vm5651_vm4, %v5611_v20  ;;  %v5165_v34 = vadd.f32 %v10353_v18, %v4712_v22  ;;  %v7728_v26 = vpop.f32.mrb[188].mxu1  ;;  %v5390_v27 = vmax.f32 %v4942_v47, 0.0  ;;  %v4491_v31 = vmul.f32 %v10318_v55, %v7392_v24  ;;  %v2998_v32 = vpop.f32.mrb[189].mxu0 }
 0x290   : > { %v5614_v29 = vmax.f32 %v5166_v28, 0.0  ;;  %v4715_v30 = vmul.f32 %v10318_v55, %v7728_v26  ;;  %v4118_v33 = vpop.f32.mrb[189].mxu1  ;;  %v5389_v35 = vmax.f32 %v4941_v23, 0.0  ;;  %v4490_v37 = vmul.f32 %v10318_v55, %v2998_v32 }
 0x291   : > { %v5613_v36 = vmax.f32 %v5165_v34, 0.0  ;;  %v4714_v38 = vmul.f32 %v10318_v55, %v4118_v33  ;;  %5839 = vst.msk [vmem:[%s8573_s28 + $0x5d8] sm:$0xff] %vm5651_vm4, %v5390_v27  ;;  %v4944_v40 = vadd.f32 %v10353_v18, %v4491_v31 }
 0x292   : > { %6063 = vst.msk [vmem:[%s8573_s28 + $0xcd8] sm:$0xff] %vm5651_vm4, %v5614_v29  ;;  %v5168_v41 = vadd.f32 %v10353_v18, %v4715_v30  ;;  %5838 = vst.msk [vmem:[%s8573_s28 + $0x5d0] sm:$0xff] %vm5651_vm4, %v5389_v35  ;;  %v4943_v39 = vadd.f32 %v10353_v18, %v4490_v37  ;;  %v7395_v43 = vpop.f32.mrb[190].mxu0 }
 0x293   : > { %6062 = vst.msk [vmem:[%s8573_s28 + $0xcd0] sm:$0xff] %vm5651_vm4, %v5613_v36  ;;  %v5167_v42 = vadd.f32 %v10353_v18, %v4714_v38  ;;  %v7731_v44 = vpop.f32.mrb[190].mxu1  ;;  %v5392_v45 = vmax.f32 %v4944_v40, 0.0  ;;  %v4493_v48 = vmul.f32 %v10318_v55, %v7395_v43  ;;  %v3008_v50 = vpop.f32.mrb[191].mxu0 }
 0x294   : > { %v5616_v46 = vmax.f32 %v5168_v41, 0.0  ;;  %v4717_v49 = vmul.f32 %v10318_v55, %v7731_v44  ;;  %v4128_v51 = vpop.f32.mrb[191].mxu1  ;;  %v5391_v52 = vmax.f32 %v4943_v39, 0.0  ;;  %v4492_v53 = vmul.f32 %v10318_v55, %v3008_v50 }
 0x295   : > { %v5615_v25 = vmax.f32 %v5167_v42, 0.0  ;;  %v4716_v54 = vmul.f32 %v10318_v55, %v4128_v51  ;;  %5841 = vst.msk [vmem:[%s8573_s28 + $0x5e8] sm:$0xff] %vm5651_vm4, %v5392_v45  ;;  %v4946_v56 = vadd.f32 %v10353_v18, %v4493_v48 }
 0x296   : > { %6065 = vst.msk [vmem:[%s8573_s28 + $0xce8] sm:$0xff] %vm5651_vm4, %v5616_v46  ;;  %v5170_v57 = vadd.f32 %v10353_v18, %v4717_v49  ;;  %5840 = vst.msk [vmem:[%s8573_s28 + $0x5e0] sm:$0xff] %vm5651_vm4, %v5391_v52  ;;  %v4945_v58 = vadd.f32 %v10353_v18, %v4492_v53  ;;  %v7398_v60 = vpop.f32.mrb[192].mxu0 }
 0x297   : > { %6064 = vst.msk [vmem:[%s8573_s28 + $0xce0] sm:$0xff] %vm5651_vm4, %v5615_v25  ;;  %v5169_v59 = vadd.f32 %v10353_v18, %v4716_v54  ;;  %v7734_v61 = vpop.f32.mrb[192].mxu1  ;;  %v5394_v62 = vmax.f32 %v4946_v56, 0.0  ;;  %v4495_v0 = vmul.f32 %v10318_v55, %v7398_v60  ;;  %v3018_v2 = vpop.f32.mrb[193].mxu0 }
 0x298   : > { %v5618_v63 = vmax.f32 %v5170_v57, 0.0  ;;  %v4719_v1 = vmul.f32 %v10318_v55, %v7734_v61  ;;  %v4138_v3 = vpop.f32.mrb[193].mxu1  ;;  %v5393_v4 = vmax.f32 %v4945_v58, 0.0  ;;  %v4494_v6 = vmul.f32 %v10318_v55, %v3018_v2 }
 0x299   : > { %v5617_v5 = vmax.f32 %v5169_v59, 0.0  ;;  %v4718_v7 = vmul.f32 %v10318_v55, %v4138_v3  ;;  %5843 = vst.msk [vmem:[%s8573_s28 + $0x5f8] sm:$0xff] %vm5651_vm4, %v5394_v62  ;;  %v4948_v8 = vadd.f32 %v10353_v18, %v4495_v0 }
 0x29a   : > { %6067 = vst.msk [vmem:[%s8573_s28 + $0xcf8] sm:$0xff] %vm5651_vm4, %v5618_v63  ;;  %v5172_v9 = vadd.f32 %v10353_v18, %v4719_v1  ;;  %5842 = vst.msk [vmem:[%s8573_s28 + $0x5f0] sm:$0xff] %vm5651_vm4, %v5393_v4  ;;  %v4947_v10 = vadd.f32 %v10353_v18, %v4494_v6  ;;  %v7401_v12 = vpop.f32.mrb[194].mxu0 }
 0x29b   : > { %6066 = vst.msk [vmem:[%s8573_s28 + $0xcf0] sm:$0xff] %vm5651_vm4, %v5617_v5  ;;  %v5171_v11 = vadd.f32 %v10353_v18, %v4718_v7  ;;  %v7737_v13 = vpop.f32.mrb[194].mxu1  ;;  %v5396_v14 = vmax.f32 %v4948_v8, 0.0  ;;  %v4497_v16 = vmul.f32 %v10318_v55, %v7401_v12  ;;  %v3028_v19 = vpop.f32.mrb[195].mxu0 }
 0x29c   : > { %v5620_v15 = vmax.f32 %v5172_v9, 0.0  ;;  %v4721_v17 = vmul.f32 %v10318_v55, %v7737_v13  ;;  %v4148_v20 = vpop.f32.mrb[195].mxu1  ;;  %v5395_v21 = vmax.f32 %v4947_v10, 0.0  ;;  %v4496_v47 = vmul.f32 %v10318_v55, %v3028_v19 }
 0x29d   : > { %v5619_v22 = vmax.f32 %v5171_v11, 0.0  ;;  %v4720_v28 = vmul.f32 %v10318_v55, %v4148_v20  ;;  %5845 = vst.msk [vmem:[%s8573_s28 + $0x608] sm:$0xff] %vm5651_vm4, %v5396_v14  ;;  %v4950_v23 = vadd.f32 %v10353_v18, %v4497_v16 }
 0x29e   : > { %6069 = vst.msk [vmem:[%s8573_s28 + $0xd08] sm:$0xff] %vm5651_vm4, %v5620_v15  ;;  %v5174_v34 = vadd.f32 %v10353_v18, %v4721_v17  ;;  %5844 = vst.msk [vmem:[%s8573_s28 + $0x600] sm:$0xff] %vm5651_vm4, %v5395_v21  ;;  %v4949_v24 = vadd.f32 %v10353_v18, %v4496_v47  ;;  %v7404_v27 = vpop.f32.mrb[196].mxu0 }
 0x29f   : > { %6068 = vst.msk [vmem:[%s8573_s28 + $0xd00] sm:$0xff] %vm5651_vm4, %v5619_v22  ;;  %v5173_v26 = vadd.f32 %v10353_v18, %v4720_v28  ;;  %v7740_v29 = vpop.f32.mrb[196].mxu1  ;;  %v5398_v31 = vmax.f32 %v4950_v23, 0.0  ;;  %v4499_v32 = vmul.f32 %v10318_v55, %v7404_v27  ;;  %v3038_v35 = vpop.f32.mrb[197].mxu0 }
 0x2a0   : > { %v5622_v30 = vmax.f32 %v5174_v34, 0.0  ;;  %v4723_v33 = vmul.f32 %v10318_v55, %v7740_v29  ;;  %v4158_v36 = vpop.f32.mrb[197].mxu1  ;;  %v5397_v37 = vmax.f32 %v4949_v24, 0.0  ;;  %v4498_v40 = vmul.f32 %v10318_v55, %v3038_v35 }
 0x2a1   : > { %v5621_v38 = vmax.f32 %v5173_v26, 0.0  ;;  %v4722_v41 = vmul.f32 %v10318_v55, %v4158_v36  ;;  %5847 = vst.msk [vmem:[%s8573_s28 + $0x618] sm:$0xff] %vm5651_vm4, %v5398_v31  ;;  %v4952_v39 = vadd.f32 %v10353_v18, %v4499_v32 }
 0x2a2   : > { %6071 = vst.msk [vmem:[%s8573_s28 + $0xd18] sm:$0xff] %vm5651_vm4, %v5622_v30  ;;  %v5176_v42 = vadd.f32 %v10353_v18, %v4723_v33  ;;  %5846 = vst.msk [vmem:[%s8573_s28 + $0x610] sm:$0xff] %vm5651_vm4, %v5397_v37  ;;  %v4951_v43 = vadd.f32 %v10353_v18, %v4498_v40  ;;  %v7407_v45 = vpop.f32.mrb[198].mxu0 }
 0x2a3   : > { %6070 = vst.msk [vmem:[%s8573_s28 + $0xd10] sm:$0xff] %vm5651_vm4, %v5621_v38  ;;  %v5175_v44 = vadd.f32 %v10353_v18, %v4722_v41  ;;  %v7743_v46 = vpop.f32.mrb[198].mxu1  ;;  %v5400_v48 = vmax.f32 %v4952_v39, 0.0  ;;  %v4501_v50 = vmul.f32 %v10318_v55, %v7407_v45  ;;  %v3048_v52 = vpop.f32.mrb[199].mxu0 }
 0x2a4   : > { %v5624_v49 = vmax.f32 %v5176_v42, 0.0  ;;  %v4725_v51 = vmul.f32 %v10318_v55, %v7743_v46  ;;  %v4168_v25 = vpop.f32.mrb[199].mxu1  ;;  %v5399_v53 = vmax.f32 %v4951_v43, 0.0  ;;  %v4500_v56 = vmul.f32 %v10318_v55, %v3048_v52 }
 0x2a5   : > { %v5623_v54 = vmax.f32 %v5175_v44, 0.0  ;;  %v4724_v57 = vmul.f32 %v10318_v55, %v4168_v25  ;;  %5849 = vst.msk [vmem:[%s8573_s28 + $0x628] sm:$0xff] %vm5651_vm4, %v5400_v48  ;;  %v4954_v58 = vadd.f32 %v10353_v18, %v4501_v50 }
 0x2a6   : > { %6073 = vst.msk [vmem:[%s8573_s28 + $0xd28] sm:$0xff] %vm5651_vm4, %v5624_v49  ;;  %v5178_v59 = vadd.f32 %v10353_v18, %v4725_v51  ;;  %5848 = vst.msk [vmem:[%s8573_s28 + $0x620] sm:$0xff] %vm5651_vm4, %v5399_v53  ;;  %v4953_v60 = vadd.f32 %v10353_v18, %v4500_v56  ;;  %v7410_v62 = vpop.f32.mrb[200].mxu0 }
 0x2a7   : > { %6072 = vst.msk [vmem:[%s8573_s28 + $0xd20] sm:$0xff] %vm5651_vm4, %v5623_v54  ;;  %v5177_v61 = vadd.f32 %v10353_v18, %v4724_v57  ;;  %v7746_v63 = vpop.f32.mrb[200].mxu1  ;;  %v5402_v0 = vmax.f32 %v4954_v58, 0.0  ;;  %v4503_v2 = vmul.f32 %v10318_v55, %v7410_v62  ;;  %v3058_v4 = vpop.f32.mrb[201].mxu0 }
 0x2a8   : > { %v5626_v1 = vmax.f32 %v5178_v59, 0.0  ;;  %v4727_v3 = vmul.f32 %v10318_v55, %v7746_v63  ;;  %v4178_v5 = vpop.f32.mrb[201].mxu1  ;;  %v5401_v6 = vmax.f32 %v4953_v60, 0.0  ;;  %v4502_v8 = vmul.f32 %v10318_v55, %v3058_v4 }
 0x2a9   : > { %v5625_v7 = vmax.f32 %v5177_v61, 0.0  ;;  %v4726_v9 = vmul.f32 %v10318_v55, %v4178_v5  ;;  %5851 = vst.msk [vmem:[%s8573_s28 + $0x638] sm:$0xff] %vm5651_vm4, %v5402_v0  ;;  %v4956_v10 = vadd.f32 %v10353_v18, %v4503_v2 }
 0x2aa   : > { %6075 = vst.msk [vmem:[%s8573_s28 + $0xd38] sm:$0xff] %vm5651_vm4, %v5626_v1  ;;  %v5180_v11 = vadd.f32 %v10353_v18, %v4727_v3  ;;  %5850 = vst.msk [vmem:[%s8573_s28 + $0x630] sm:$0xff] %vm5651_vm4, %v5401_v6  ;;  %v4955_v12 = vadd.f32 %v10353_v18, %v4502_v8  ;;  %v7413_v14 = vpop.f32.mrb[202].mxu0 }
 0x2ab   : > { %6074 = vst.msk [vmem:[%s8573_s28 + $0xd30] sm:$0xff] %vm5651_vm4, %v5625_v7  ;;  %v5179_v13 = vadd.f32 %v10353_v18, %v4726_v9  ;;  %v7749_v15 = vpop.f32.mrb[202].mxu1  ;;  %v5404_v16 = vmax.f32 %v4956_v10, 0.0  ;;  %v4505_v19 = vmul.f32 %v10318_v55, %v7413_v14  ;;  %v3068_v21 = vpop.f32.mrb[203].mxu0 }
 0x2ac   : > { %v5628_v17 = vmax.f32 %v5180_v11, 0.0  ;;  %v4729_v20 = vmul.f32 %v10318_v55, %v7749_v15  ;;  %v4188_v22 = vpop.f32.mrb[203].mxu1  ;;  %v5403_v47 = vmax.f32 %v4955_v12, 0.0  ;;  %v4504_v23 = vmul.f32 %v10318_v55, %v3068_v21 }
 0x2ad   : > { %v5627_v28 = vmax.f32 %v5179_v13, 0.0  ;;  %v4728_v34 = vmul.f32 %v10318_v55, %v4188_v22  ;;  %5853 = vst.msk [vmem:[%s8573_s28 + $0x648] sm:$0xff] %vm5651_vm4, %v5404_v16  ;;  %v4958_v24 = vadd.f32 %v10353_v18, %v4505_v19 }
 0x2ae   : > { %6077 = vst.msk [vmem:[%s8573_s28 + $0xd48] sm:$0xff] %vm5651_vm4, %v5628_v17  ;;  %v5182_v26 = vadd.f32 %v10353_v18, %v4729_v20  ;;  %5852 = vst.msk [vmem:[%s8573_s28 + $0x640] sm:$0xff] %vm5651_vm4, %v5403_v47  ;;  %v4957_v27 = vadd.f32 %v10353_v18, %v4504_v23  ;;  %v7416_v31 = vpop.f32.mrb[204].mxu0 }
 0x2af   : > { %6076 = vst.msk [vmem:[%s8573_s28 + $0xd40] sm:$0xff] %vm5651_vm4, %v5627_v28  ;;  %v5181_v29 = vadd.f32 %v10353_v18, %v4728_v34  ;;  %v7752_v30 = vpop.f32.mrb[204].mxu1  ;;  %v5406_v32 = vmax.f32 %v4958_v24, 0.0  ;;  %v4507_v35 = vmul.f32 %v10318_v55, %v7416_v31  ;;  %v3078_v37 = vpop.f32.mrb[205].mxu0 }
 0x2b0   : > { %v5630_v33 = vmax.f32 %v5182_v26, 0.0  ;;  %v4731_v36 = vmul.f32 %v10318_v55, %v7752_v30  ;;  %v4198_v38 = vpop.f32.mrb[205].mxu1  ;;  %v5405_v40 = vmax.f32 %v4957_v27, 0.0  ;;  %v4506_v39 = vmul.f32 %v10318_v55, %v3078_v37 }
 0x2b1   : > { %v5629_v41 = vmax.f32 %v5181_v29, 0.0  ;;  %v4730_v42 = vmul.f32 %v10318_v55, %v4198_v38  ;;  %5855 = vst.msk [vmem:[%s8573_s28 + $0x658] sm:$0xff] %vm5651_vm4, %v5406_v32  ;;  %v4960_v43 = vadd.f32 %v10353_v18, %v4507_v35 }
 0x2b2   : > { %6079 = vst.msk [vmem:[%s8573_s28 + $0xd58] sm:$0xff] %vm5651_vm4, %v5630_v33  ;;  %v5184_v44 = vadd.f32 %v10353_v18, %v4731_v36  ;;  %5854 = vst.msk [vmem:[%s8573_s28 + $0x650] sm:$0xff] %vm5651_vm4, %v5405_v40  ;;  %v4959_v45 = vadd.f32 %v10353_v18, %v4506_v39  ;;  %v7419_v48 = vpop.f32.mrb[206].mxu0  ;;  %v10744_v36 = vld [vmem:[%s10907_s2] ss:$0 sm:$0xff] }
 0x2b3   : > { %6078 = vst.msk [vmem:[%s8573_s28 + $0xd50] sm:$0xff] %vm5651_vm4, %v5629_v41  ;;  %v5183_v46 = vadd.f32 %v10353_v18, %v4730_v42  ;;  %v7755_v49 = vpop.f32.mrb[206].mxu1  ;;  %v5408_v50 = vmax.f32 %v4960_v43, 0.0  ;;  %v4509_v52 = vmul.f32 %v10318_v55, %v7419_v48  ;;  %v3088_v53 = vpop.f32.mrb[207].mxu0 }
 0x2b4   : > { %v5632_v51 = vmax.f32 %v5184_v44, 0.0  ;;  %v4733_v25 = vmul.f32 %v10318_v55, %v7755_v49  ;;  %v4208_v54 = vpop.f32.mrb[207].mxu1  ;;  %v5407_v56 = vmax.f32 %v4959_v45, 0.0  ;;  %v4508_v58 = vmul.f32 %v10318_v55, %v3088_v53 }
 0x2b5   : > { %v5631_v57 = vmax.f32 %v5183_v46, 0.0  ;;  %v4732_v59 = vmul.f32 %v10318_v55, %v4208_v54  ;;  %5857 = vst.msk [vmem:[%s8573_s28 + $0x668] sm:$0xff] %vm5651_vm4, %v5408_v50  ;;  %v4962_v60 = vadd.f32 %v10353_v18, %v4509_v52 }
 0x2b6   : > { %6081 = vst.msk [vmem:[%s8573_s28 + $0xd68] sm:$0xff] %vm5651_vm4, %v5632_v51  ;;  %v5186_v61 = vadd.f32 %v10353_v18, %v4733_v25  ;;  %5856 = vst.msk [vmem:[%s8573_s28 + $0x660] sm:$0xff] %vm5651_vm4, %v5407_v56  ;;  %v4961_v62 = vadd.f32 %v10353_v18, %v4508_v58  ;;  %v7422_v0 = vpop.f32.mrb[208].mxu0 }
 0x2b7   : > { %6080 = vst.msk [vmem:[%s8573_s28 + $0xd60] sm:$0xff] %vm5651_vm4, %v5631_v57  ;;  %v5185_v63 = vadd.f32 %v10353_v18, %v4732_v59  ;;  %v7758_v1 = vpop.f32.mrb[208].mxu1  ;;  %v5410_v2 = vmax.f32 %v4962_v60, 0.0  ;;  %v4511_v4 = vmul.f32 %v10318_v55, %v7422_v0  ;;  %v3098_v6 = vpop.f32.mrb[209].mxu0 }
 0x2b8   : > { %v5634_v3 = vmax.f32 %v5186_v61, 0.0  ;;  %v4735_v5 = vmul.f32 %v10318_v55, %v7758_v1  ;;  %v4218_v7 = vpop.f32.mrb[209].mxu1  ;;  %v5409_v8 = vmax.f32 %v4961_v62, 0.0  ;;  %v4510_v10 = vmul.f32 %v10318_v55, %v3098_v6 }
 0x2b9   : > { %v5633_v9 = vmax.f32 %v5185_v63, 0.0  ;;  %v4734_v11 = vmul.f32 %v10318_v55, %v4218_v7  ;;  %5859 = vst.msk [vmem:[%s8573_s28 + $0x678] sm:$0xff] %vm5651_vm4, %v5410_v2  ;;  %v4964_v12 = vadd.f32 %v10353_v18, %v4511_v4 }
 0x2ba   : > { %6083 = vst.msk [vmem:[%s8573_s28 + $0xd78] sm:$0xff] %vm5651_vm4, %v5634_v3  ;;  %v5188_v13 = vadd.f32 %v10353_v18, %v4735_v5  ;;  %5858 = vst.msk [vmem:[%s8573_s28 + $0x670] sm:$0xff] %vm5651_vm4, %v5409_v8  ;;  %v4963_v14 = vadd.f32 %v10353_v18, %v4510_v10  ;;  %v7425_v16 = vpop.f32.mrb[210].mxu0 }
 0x2bb   : > { %6082 = vst.msk [vmem:[%s8573_s28 + $0xd70] sm:$0xff] %vm5651_vm4, %v5633_v9  ;;  %v5187_v15 = vadd.f32 %v10353_v18, %v4734_v11  ;;  %v7761_v17 = vpop.f32.mrb[210].mxu1  ;;  %v5412_v19 = vmax.f32 %v4964_v12, 0.0  ;;  %v4513_v21 = vmul.f32 %v10318_v55, %v7425_v16  ;;  %v3108_v47 = vpop.f32.mrb[211].mxu0 }
 0x2bc   : > { %v5636_v20 = vmax.f32 %v5188_v13, 0.0  ;;  %v4737_v22 = vmul.f32 %v10318_v55, %v7761_v17  ;;  %v4228_v28 = vpop.f32.mrb[211].mxu1  ;;  %v5411_v23 = vmax.f32 %v4963_v14, 0.0  ;;  %v4512_v24 = vmul.f32 %v10318_v55, %v3108_v47 }
 0x2bd   : > { %v5635_v34 = vmax.f32 %v5187_v15, 0.0  ;;  %v4736_v26 = vmul.f32 %v10318_v55, %v4228_v28  ;;  %5861 = vst.msk [vmem:[%s8573_s28 + $0x688] sm:$0xff] %vm5651_vm4, %v5412_v19  ;;  %v4966_v27 = vadd.f32 %v10353_v18, %v4513_v21 }
 0x2be   : > { %6085 = vst.msk [vmem:[%s8573_s28 + $0xd88] sm:$0xff] %vm5651_vm4, %v5636_v20  ;;  %v5190_v29 = vadd.f32 %v10353_v18, %v4737_v22  ;;  %5860 = vst.msk [vmem:[%s8573_s28 + $0x680] sm:$0xff] %vm5651_vm4, %v5411_v23  ;;  %v4965_v31 = vadd.f32 %v10353_v18, %v4512_v24  ;;  %v7428_v32 = vpop.f32.mrb[212].mxu0 }
 0x2bf   : > { %6084 = vst.msk [vmem:[%s8573_s28 + $0xd80] sm:$0xff] %vm5651_vm4, %v5635_v34  ;;  %v5189_v30 = vadd.f32 %v10353_v18, %v4736_v26  ;;  %v7764_v55 = vpop.f32.mrb[212].mxu1  ;;  %v5414_v33 = vmax.f32 %v4966_v27, 0.0  ;;  %v4515_v37 = vmul.f32 %v10744_v36, %v7428_v32  ;;  %v3118_v40 = vpop.f32.mrb[213].mxu0 }
 0x2c0   : > { %v5638_v35 = vmax.f32 %v5190_v29, 0.0  ;;  %v4739_v38 = vmul.f32 %v10744_v36, %v7764_v55  ;;  %v4238_v41 = vpop.f32.mrb[213].mxu1  ;;  %v5413_v39 = vmax.f32 %v4965_v31, 0.0  ;;  %v4514_v43 = vmul.f32 %v10744_v36, %v3118_v40 }
 0x2c1   : > { %v5637_v42 = vmax.f32 %v5189_v30, 0.0  ;;  %v4738_v44 = vmul.f32 %v10744_v36, %v4238_v41  ;;  %5863 = vst.msk [vmem:[%s8573_s28 + $0x698] sm:$0xff] %vm5651_vm4, %v5414_v33  ;;  %v4968_v45 = vadd.f32 %v10353_v18, %v4515_v37 }
 0x2c2   : > { %6087 = vst.msk [vmem:[%s8573_s28 + $0xd98] sm:$0xff] %vm5651_vm4, %v5638_v35  ;;  %v5192_v46 = vadd.f32 %v10353_v18, %v4739_v38  ;;  %5862 = vst.msk [vmem:[%s8573_s28 + $0x690] sm:$0xff] %vm5651_vm4, %v5413_v39  ;;  %v4967_v48 = vadd.f32 %v10353_v18, %v4514_v43  ;;  %v7431_v50 = vpop.f32.mrb[214].mxu0 }
 0x2c3   : > { %6086 = vst.msk [vmem:[%s8573_s28 + $0xd90] sm:$0xff] %vm5651_vm4, %v5637_v42  ;;  %v5191_v49 = vadd.f32 %v10353_v18, %v4738_v44  ;;  %v7767_v51 = vpop.f32.mrb[214].mxu1  ;;  %v5416_v52 = vmax.f32 %v4968_v45, 0.0  ;;  %v4517_v53 = vmul.f32 %v10744_v36, %v7431_v50  ;;  %v3128_v56 = vpop.f32.mrb[215].mxu0  ;;  %v10773_v18 = vld [vmem:[%s10907_s2 + $0x1] ss:$0 sm:$0xff] }
 0x2c4   : > { %v5640_v25 = vmax.f32 %v5192_v46, 0.0  ;;  %v4741_v54 = vmul.f32 %v10744_v36, %v7767_v51  ;;  %v4248_v57 = vpop.f32.mrb[215].mxu1  ;;  %v5415_v58 = vmax.f32 %v4967_v48, 0.0  ;;  %v4516_v60 = vmul.f32 %v10744_v36, %v3128_v56 }
 0x2c5   : > { %v5639_v59 = vmax.f32 %v5191_v49, 0.0  ;;  %v4740_v61 = vmul.f32 %v10744_v36, %v4248_v57  ;;  %5865 = vst.msk [vmem:[%s8573_s28 + $0x6a8] sm:$0xff] %vm5651_vm4, %v5416_v52  ;;  %v4970_v62 = vadd.f32 %v10773_v18, %v4517_v53 }
 0x2c6   : > { %6089 = vst.msk [vmem:[%s8573_s28 + $0xda8] sm:$0xff] %vm5651_vm4, %v5640_v25  ;;  %v5194_v63 = vadd.f32 %v10773_v18, %v4741_v54  ;;  %5864 = vst.msk [vmem:[%s8573_s28 + $0x6a0] sm:$0xff] %vm5651_vm4, %v5415_v58  ;;  %v4969_v0 = vadd.f32 %v10773_v18, %v4516_v60  ;;  %v7434_v2 = vpop.f32.mrb[216].mxu0 }
 0x2c7   : > { %6088 = vst.msk [vmem:[%s8573_s28 + $0xda0] sm:$0xff] %vm5651_vm4, %v5639_v59  ;;  %v5193_v1 = vadd.f32 %v10773_v18, %v4740_v61  ;;  %v7770_v3 = vpop.f32.mrb[216].mxu1  ;;  %v5418_v4 = vmax.f32 %v4970_v62, 0.0  ;;  %v4519_v6 = vmul.f32 %v10744_v36, %v7434_v2  ;;  %v3138_v8 = vpop.f32.mrb[217].mxu0 }
 0x2c8   : > { %v5642_v5 = vmax.f32 %v5194_v63, 0.0  ;;  %v4743_v7 = vmul.f32 %v10744_v36, %v7770_v3  ;;  %v4258_v9 = vpop.f32.mrb[217].mxu1  ;;  %v5417_v10 = vmax.f32 %v4969_v0, 0.0  ;;  %v4518_v12 = vmul.f32 %v10744_v36, %v3138_v8 }
 0x2c9   : > { %v5641_v11 = vmax.f32 %v5193_v1, 0.0  ;;  %v4742_v13 = vmul.f32 %v10744_v36, %v4258_v9  ;;  %5867 = vst.msk [vmem:[%s8573_s28 + $0x6b8] sm:$0xff] %vm5651_vm4, %v5418_v4  ;;  %v4972_v14 = vadd.f32 %v10773_v18, %v4519_v6 }
 0x2ca   : > { %6091 = vst.msk [vmem:[%s8573_s28 + $0xdb8] sm:$0xff] %vm5651_vm4, %v5642_v5  ;;  %v5196_v15 = vadd.f32 %v10773_v18, %v4743_v7  ;;  %5866 = vst.msk [vmem:[%s8573_s28 + $0x6b0] sm:$0xff] %vm5651_vm4, %v5417_v10  ;;  %v4971_v16 = vadd.f32 %v10773_v18, %v4518_v12  ;;  %v7437_v19 = vpop.f32.mrb[218].mxu0 }
 0x2cb   : > { %6090 = vst.msk [vmem:[%s8573_s28 + $0xdb0] sm:$0xff] %vm5651_vm4, %v5641_v11  ;;  %v5195_v17 = vadd.f32 %v10773_v18, %v4742_v13  ;;  %v7773_v20 = vpop.f32.mrb[218].mxu1  ;;  %v5420_v21 = vmax.f32 %v4972_v14, 0.0  ;;  %v4521_v47 = vmul.f32 %v10744_v36, %v7437_v19  ;;  %v3148_v23 = vpop.f32.mrb[219].mxu0 }
 0x2cc   : > { %v5644_v22 = vmax.f32 %v5196_v15, 0.0  ;;  %v4745_v28 = vmul.f32 %v10744_v36, %v7773_v20  ;;  %v4268_v34 = vpop.f32.mrb[219].mxu1  ;;  %v5419_v24 = vmax.f32 %v4971_v16, 0.0  ;;  %v4520_v27 = vmul.f32 %v10744_v36, %v3148_v23 }
 0x2cd   : > { %v5643_v26 = vmax.f32 %v5195_v17, 0.0  ;;  %v4744_v29 = vmul.f32 %v10744_v36, %v4268_v34  ;;  %5869 = vst.msk [vmem:[%s8573_s28 + $0x6c8] sm:$0xff] %vm5651_vm4, %v5420_v21  ;;  %v4974_v31 = vadd.f32 %v10773_v18, %v4521_v47 }
 0x2ce   : > { %6093 = vst.msk [vmem:[%s8573_s28 + $0xdc8] sm:$0xff] %vm5651_vm4, %v5644_v22  ;;  %v5198_v30 = vadd.f32 %v10773_v18, %v4745_v28  ;;  %5868 = vst.msk [vmem:[%s8573_s28 + $0x6c0] sm:$0xff] %vm5651_vm4, %v5419_v24  ;;  %v4973_v32 = vadd.f32 %v10773_v18, %v4520_v27  ;;  %v7440_v33 = vpop.f32.mrb[220].mxu0 }
 0x2cf   : > { %6092 = vst.msk [vmem:[%s8573_s28 + $0xdc0] sm:$0xff] %vm5651_vm4, %v5643_v26  ;;  %v5197_v55 = vadd.f32 %v10773_v18, %v4744_v29  ;;  %v7776_v35 = vpop.f32.mrb[220].mxu1  ;;  %v5422_v37 = vmax.f32 %v4974_v31, 0.0  ;;  %v4523_v40 = vmul.f32 %v10744_v36, %v7440_v33  ;;  %v3158_v39 = vpop.f32.mrb[221].mxu0 }
 0x2d0   : > { %v5646_v38 = vmax.f32 %v5198_v30, 0.0  ;;  %v4747_v41 = vmul.f32 %v10744_v36, %v7776_v35  ;;  %v4278_v42 = vpop.f32.mrb[221].mxu1  ;;  %v5421_v43 = vmax.f32 %v4973_v32, 0.0  ;;  %v4522_v45 = vmul.f32 %v10744_v36, %v3158_v39 }
 0x2d1   : > { %v5645_v44 = vmax.f32 %v5197_v55, 0.0  ;;  %v4746_v46 = vmul.f32 %v10744_v36, %v4278_v42  ;;  %5871 = vst.msk [vmem:[%s8573_s28 + $0x6d8] sm:$0xff] %vm5651_vm4, %v5422_v37  ;;  %v4976_v48 = vadd.f32 %v10773_v18, %v4523_v40 }
 0x2d2   : > { %6095 = vst.msk [vmem:[%s8573_s28 + $0xdd8] sm:$0xff] %vm5651_vm4, %v5646_v38  ;;  %v5200_v49 = vadd.f32 %v10773_v18, %v4747_v41  ;;  %5870 = vst.msk [vmem:[%s8573_s28 + $0x6d0] sm:$0xff] %vm5651_vm4, %v5421_v43  ;;  %v4975_v50 = vadd.f32 %v10773_v18, %v4522_v45  ;;  %v7443_v52 = vpop.f32.mrb[222].mxu0 }
 0x2d3   : > { %6094 = vst.msk [vmem:[%s8573_s28 + $0xdd0] sm:$0xff] %vm5651_vm4, %v5645_v44  ;;  %v5199_v51 = vadd.f32 %v10773_v18, %v4746_v46  ;;  %v7779_v25 = vpop.f32.mrb[222].mxu1  ;;  %v5424_v53 = vmax.f32 %v4976_v48, 0.0  ;;  %v4525_v56 = vmul.f32 %v10744_v36, %v7443_v52  ;;  %v3168_v58 = vpop.f32.mrb[223].mxu0 }
 0x2d4   : > { %v5648_v54 = vmax.f32 %v5200_v49, 0.0  ;;  %v4749_v57 = vmul.f32 %v10744_v36, %v7779_v25  ;;  %v4288_v59 = vpop.f32.mrb[223].mxu1  ;;  %v5423_v60 = vmax.f32 %v4975_v50, 0.0  ;;  %v4524_v62 = vmul.f32 %v10744_v36, %v3168_v58 }
 0x2d5   : > { %v5647_v61 = vmax.f32 %v5199_v51, 0.0  ;;  %v4748_v63 = vmul.f32 %v10744_v36, %v4288_v59  ;;  %5873 = vst.msk [vmem:[%s8573_s28 + $0x6e8] sm:$0xff] %vm5651_vm4, %v5424_v53  ;;  %v4978_v0 = vadd.f32 %v10773_v18, %v4525_v56 }
 0x2d6   : > { %6097 = vst.msk [vmem:[%s8573_s28 + $0xde8] sm:$0xff] %vm5651_vm4, %v5648_v54  ;;  %v5202_v1 = vadd.f32 %v10773_v18, %v4749_v57  ;;  %5872 = vst.msk [vmem:[%s8573_s28 + $0x6e0] sm:$0xff] %vm5651_vm4, %v5423_v60  ;;  %v4977_v36 = vadd.f32 %v10773_v18, %v4524_v62 }
 0x2d7   : > { %6096 = vst.msk [vmem:[%s8573_s28 + $0xde0] sm:$0xff] %vm5651_vm4, %v5647_v61  ;;  %v5201_v2 = vadd.f32 %v10773_v18, %v4748_v63  ;;  %v5426_v3 = vmax.f32 %v4978_v0, 0.0 }
 0x2d8   : > { %v5650_v4 = vmax.f32 %v5202_v1, 0.0  ;;  %v5425_v5 = vmax.f32 %v4977_v36, 0.0 }
 0x2d9   : > { %v5649_v6 = vmax.f32 %v5201_v2, 0.0  ;;  %5875 = vst.msk [vmem:[%s8573_s28 + $0x6f8] sm:$0xff] %vm5651_vm4, %v5426_v3 }
 0x2da   : > { %6099 = vst.msk [vmem:[%s8573_s28 + $0xdf8] sm:$0xff] %vm5651_vm4, %v5650_v4  ;;  %5874 = vst.msk [vmem:[%s8573_s28 + $0x6f0] sm:$0xff] %vm5651_vm4, %v5425_v5 }
 0x2db   : > { %6098 = vst.msk [vmem:[%s8573_s28 + $0xdf0] sm:$0xff] %vm5651_vm4, %v5649_v6 }
 0x2dc   : > { %7900 = shalt.err (!%p7897_p1)
}
 0x2dd   : > { %s7901_s28 = scalar_lea.hbm %s10852_s11, 57344  ;;  %s7905_s27 = scalar_lea.hbm %s10908_s3, 1605632 }
 0x2de   : > { %p7902_p3 = scmp.ne.s32.totalorder %s10852_s11, %s7901_s28  ;;  %p7906_p0 = scmp.lt.u32.totalorder %s10852_s11, %s10908_s3 }
 0x2df   : > { %p7907_p2 = scmp.lt.u32.totalorder %s7905_s27, %s7901_s28  ;;  %p7909_p6 = scmp.lt.u32.totalorder %s7901_s28, %s10852_s11 }
 0x2e0   : > { %p7903_p4 = pnand %p7902_p3, %p10914_p10 }
 0x2e1   : > { %p7908_p7 = por %p7907_p2, %p7906_p0 }
 0x2e2   : > { %p7904_p5 = pneg %p7903_p4 }
 0x2e3   : > { %p7910_p11 = por %p7909_p6, %p7908_p7 }
 0x2e5   : > { %p7911_p12 = pnand %p7910_p11, %p7904_p5 }
 0x2e7   : > { %7914 = shalt.err (!%p7911_p12)
}
 0x2e8   : > { %s7960_s9 = smov 128   ;;  %s7961_s30 = smov 8  }
 0x2e9   : > { %7798 = dma.vmem_to_hbm [thread:$0]  (%p10914_p10), %s10854_s6, 57344, %s10852_s11, %s6101_s17, %s7960_s9, %s7960_s9, %s7961_s30  }
 0x2ea PF: > { %p7809_p8 = scmp.ge.s32.totalorder %s7953_s15, 2  ;;  %s6129_s4 = sand.u32 1, %s7941_s12  }
 0x2eb   : > { %p10915_p9 = scmp.ne.s32.totalorder %s10912_s24, 0  ;;  %s6130_s16 = scalar_lea.sflag [#allocation4], %s6129_s4 }
 0x2ed   : > { %p7805_p13 = pnand %p7809_p8, %p10915_p9 }
 0x2ef   : > { %7936 = dma.done.wait (!%p7805_p13), %s6130_s16, 57344  }
 0x2f0   : > { %7938 = vsyncadd (!%p7805_p13), %s6130_s16, 4294909952  ;;  %p16_p1 = scmp.ge.s32.totalorder %s8007_s18, 30   ;;  %s10916_s12 = smov %s7945_s13 }
 0x2f1   : > { %s10917_s13 = smov %s7949_s14  ;;  %s10918_s14 = smov %s8019_s21 }
 0x2f2   : > { %s10919_s15 = smov %s8007_s18  ;;  %18 = sbr.rel (!%p16_p1) target bundleno = 5 (0x5), region = 77 }
 0x2f9   :  { %6135 = vsyncpa [#allocation3], 1 }
 0x2fa   :  { %6137 = vsyncpa [#allocation3 + $0x1], 1 }
 0x2fb   :  { %6138 = vsyncpa [#allocation4], 1 }
 0x2fc   :  { %6140 = vsyncpa [#allocation4 + $0x1], 1 }

</bundles_post_ra>
